<compile_context>
chip_gen: v5e
topology: v5e:2x2
jax: 0.10.0
libtpu: 0.0.40
codegen_flags: <defaults>
</compile_context>

<pallas_src>
import functools

import jax
import jax.numpy as jnp
from jax.experimental import pallas as pl
from jax.experimental.pallas import tpu as pltpu

VMEM_SPEC = pl.BlockSpec(memory_space=pltpu.MemorySpace.VMEM)


# ------------------------------ in-kernel helpers --------------------------- #

def _leaky_relu(x, alpha):
    return jnp.where(x > 0, x, alpha * x)


def _elu(x):
    # F.elu(alpha=1); clamp arg of exp so the unselected branch stays finite.
    return jnp.where(x > 0, x, jnp.exp(jnp.minimum(x, 0.0)) - 1.0)


def _l2_normalize(x):
    nrm = jnp.sqrt(jnp.sum(x * x, axis=-1, keepdims=True))
    return x / jnp.maximum(nrm, 1e-12)


def _masked_softmax(e, addmask):
    e = e + addmask                       # additive mask: 0 on edges, -9e15 elsewhere
    m = jnp.max(e, axis=1, keepdims=True)
    p = jnp.exp(e - m)
    return p / jnp.sum(p, axis=1, keepdims=True)


# --------------------------- fused per-timestep GCN -------------------------- #

def make_gcn_kernel(n_pe_layers, nheads, nhid, alpha, bn_eps=1e-5):
    """One grid step = one timestep: points encoder + 2x GraphAtten + tran1 + Sparsification."""

    def kernel(*refs):
        pts_ref, descs_ref, mask_ref = refs[0], refs[1], refs[2]
        param_refs = iter(refs[3:-1])
        o_ref = refs[-1]

        def nxt():
            return next(param_refs)[...]

        addmask = mask_ref[0]                                  # [N, N]
        descs = descs_ref[0]                                   # [N, ddim]
        ddim = descs.shape[1]

        # ---- PointsEncoder: Linear (+ BatchNorm(train) + ReLU) ... + L2 normalize ----
        h = pts_ref[0]                                         # [N, pdim]
        for i in range(n_pe_layers):
            w, b = nxt(), nxt()
            h = jnp.dot(h, w, preferred_element_type=jnp.float32) + b
            if i != n_pe_layers - 1:
                g, beta = nxt(), nxt()
                mean = jnp.mean(h, axis=0, keepdims=True)
                var = jnp.mean((h - mean) * (h - mean), axis=0, keepdims=True)  # biased
                h = (h - mean) * jax.lax.rsqrt(var + bn_eps) * g + beta
                h = jnp.maximum(h, 0.0)
        h = _l2_normalize(h)

        # ---- GraphAtten block (stacked heads, concat-free output projection) ----
        def atten_from_wh(wh, a_heads, w_out, a_out):
            # wh: [N, nheads*nhid]; a_heads block-diagonal -> one MXU op for all f1/f2
            f = jnp.dot(wh, a_heads, preferred_element_type=jnp.float32)   # [N, 2*nheads]
            wo = None
            for hd in range(nheads):
                f1 = f[:, 2 * hd:2 * hd + 1]                               # [N, 1]
                f2 = f[:, 2 * hd + 1:2 * hd + 2]                           # [N, 1]
                attn = _masked_softmax(_leaky_relu(f1 + f2.T, alpha), addmask)
                head = _elu(jnp.dot(attn, wh[:, hd * nhid:(hd + 1) * nhid],
                                    preferred_element_type=jnp.float32))
                # concat(heads) @ w_out == sum_h head_h @ w_out[h-th row block]
                contrib = jnp.dot(head, w_out[hd * nhid:(hd + 1) * nhid, :],
                                  preferred_element_type=jnp.float32)
                wo = contrib if wo is None else wo + contrib
            # output attention head (concat=False) followed by F.elu
            fo = jnp.dot(wo, a_out, preferred_element_type=jnp.float32)    # [N, 2]
            attn = _masked_softmax(
                _leaky_relu(fo[:, 0:1] + fo[:, 1:2].T, alpha), addmask)
            return _elu(jnp.dot(attn, wo, preferred_element_type=jnp.float32))

        # atten1: input is [descs | encoded_points]; split the projection -> no concat needed.
        w_heads, a_heads, w_out, a_out = nxt(), nxt(), nxt(), nxt()
        wh = (jnp.dot(descs, w_heads[:ddim, :], preferred_element_type=jnp.float32)
              + jnp.dot(h, w_heads[ddim:, :], preferred_element_type=jnp.float32))
        x = atten_from_wh(wh, a_heads, w_out, a_out)

        # atten2
        w_heads, a_heads, w_out, a_out = nxt(), nxt(), nxt(), nxt()
        wh = jnp.dot(x, w_heads, preferred_element_type=jnp.float32)
        x = atten_from_wh(wh, a_heads, w_out, a_out)

        # ---- tran1 + ReLU ----
        w, b = nxt(), nxt()
        x = jnp.maximum(jnp.dot(x, w, preferred_element_type=jnp.float32) + b, 0.0)

        # ---- Sparsification ----
        wf1, bf1, wf2, bf2, wl1, bl1, wl2, bl2 = [nxt() for _ in range(8)]
        d = jnp.maximum(jnp.dot(x, wf1, preferred_element_type=jnp.float32) + bf1, 0.0)
        d = jnp.maximum(jnp.dot(d, wf2, preferred_element_type=jnp.float32) + bf2, 0.0)
        loc = jnp.maximum(jnp.dot(x, wl1, preferred_element_type=jnp.float32) + bl1, 0.0)
        loc = jnp.maximum(jnp.dot(loc, wl2, preferred_element_type=jnp.float32) + bl2, 0.0)
        o_ref[0] = loc * d

    return kernel


def _flatten_gcn_params(params):
    flat = []
    pe = params["pe"]
    n_layers = len(pe["ws"])
    for i in range(n_layers):
        flat += [pe["ws"][i], pe["bs"][i]]
        if i != n_layers - 1:
            flat += [pe["gamma"][i], pe["beta"][i]]
    for name in ("atten1", "atten2"):
        a = params[name]
        flat += [a["w_heads"], a["a_heads"], a["w_out"], a["a_out"]]
    flat += [params["tran1_w"], params["tran1_b"]]
    sp = params["sp"]
    flat += [sp["wf1"], sp["bf1"], sp["wf2"], sp["bf2"],
             sp["wl1"], sp["bl1"], sp["wl2"], sp["bl2"]]
    return flat


def fused_gcn(params, cfg, points, descs, adjmask):
    seq, n, pdim = points.shape
    ddim = descs.shape[2]
    nout = params["sp"]["wf2"].shape[1]
    flat = _flatten_gcn_params(params)
    kernel = make_gcn_kernel(len(params["pe"]["ws"]), cfg["nheads"],
                             cfg["hidden_dim"], cfg["alpha"])
    in_specs = [
        pl.BlockSpec((1, n, pdim), lambda t: (t, 0, 0)),
        pl.BlockSpec((1, n, ddim), lambda t: (t, 0, 0)),
        pl.BlockSpec((1, n, n), lambda t: (t, 0, 0)),
    ] + [pl.BlockSpec(p.shape, lambda t: (0, 0)) for p in flat]   # weights: constant block
    return pl.pallas_call(
        kernel,
        out_shape=jax.ShapeDtypeStruct((seq, n, nout), jnp.float32),
        grid=(seq,),
        in_specs=in_specs,
        out_specs=pl.BlockSpec((1, n, nout), lambda t: (t, 0, 0)),
        compiler_params=pltpu.CompilerParams(
            dimension_semantics=("parallel",),          # second TC on v7x
            vmem_limit_bytes=32 * 1024 * 1024,
        ),
    )(points, descs, adjmask, *flat)


# ----------------------------------- TCN ------------------------------------ #

def _tcn_kernel(x_ref, w_ref, b_ref, o_ref, *, ksize, length):
    # mean_t(Conv1d(x)) == b + (1/L) * sum_k (colsum of rows [k, k+L) of x) @ W_k
    x = x_ref[...]                                            # [T, Cin]
    t = x.shape[0]
    cout = b_ref.shape[1]
    row = jax.lax.broadcasted_iota(jnp.int32, (t, 1), 0)
    acc = jnp.zeros((1, cout), jnp.float32)
    for k in range(ksize):
        valid = jnp.logical_and(row >= k, row < k + length).astype(jnp.float32)
        s = jnp.sum(x * valid, axis=0, keepdims=True)         # [1, Cin], alignment-safe
        acc = acc + jnp.dot(s, w_ref[k], preferred_element_type=jnp.float32)
    y = acc * (1.0 / length) + b_ref[...]                     # [1, Cout]
    nrm = jnp.sqrt(jnp.sum(y * y, axis=-1, keepdims=True))
    o_ref[...] = y / jnp.maximum(nrm, 1e-12)                  # F.normalize(p=2, dim=1)


def tcn(x, w, b):
    ksize, _, cout = w.shape
    length = x.shape[0] - ksize + 1
    return pl.pallas_call(
        functools.partial(_tcn_kernel, ksize=ksize, length=length),
        out_shape=jax.ShapeDtypeStruct((1, cout), jnp.float32),
        in_specs=[VMEM_SPEC] * 3,
        out_specs=VMEM_SPEC,
    )(x, w, b)


# ------------------------------ model wrapper -------------------------------- #

def airobject_forward(params, cfg, points, descs, adjmask):
    node_feats = fused_gcn(params, cfg, points, descs, adjmask)      # [seq, N, nout]
    seq, n, nout = node_feats.shape
    evol = node_feats.reshape(seq * n, nout)                         # torch.cat along dim 0
    return tcn(evol, params["tcn_w"], params["tcn_b"])


# ------------------------------ params / main -------------------------------- #

def init_params(key, cfg):
    dims = cfg["points_encoder_dims"]
    nfeat = cfg["descriptor_dim"] + dims[-1]
    nhid, nheads, nout = cfg["hidden_dim"], cfg["nheads"], cfg["nout"]
    tin, tout, ksize = (cfg["temporal_encoder_dim"], cfg["temporal_encoder_out_dim"],
                        cfg["temporal_kernel_size"])
    keys = iter(jax.random.split(key, 128))

    def w(shape, scale=0.1):
        return (scale * jax.random.normal(next(keys), shape)).astype(jnp.float32)

    pe = {"ws": [], "bs": [], "gamma": [], "beta": []}
    for i in range(len(dims) - 1):
        pe["ws"].append(w((dims[i], dims[i + 1])))
        pe["bs"].append(w((1, dims[i + 1])))
        if i != len(dims) - 2:
            pe["gamma"].append(jnp.ones((1, dims[i + 1]), jnp.float32))
            pe["beta"].append(jnp.zeros((1, dims[i + 1]), jnp.float32))

    def gat_params(fin):
        # per-head a1/a2 folded into one block-diagonal matrix -> single MXU op per layer
        a_heads = jnp.zeros((nheads * nhid, 2 * nheads), jnp.float32)
        for h in range(nheads):
            a_heads = a_heads.at[h * nhid:(h + 1) * nhid, 2 * h].set(w((nhid,)))
            a_heads = a_heads.at[h * nhid:(h + 1) * nhid, 2 * h + 1].set(w((nhid,)))
        return {
            "w_heads": w((fin, nheads * nhid)),      # per-head W stacked column-wise
            "a_heads": a_heads,
            "w_out": w((nheads * nhid, nfeat)),
            "a_out": w((nfeat, 2)),                  # [a1 | a2] of the output head
        }

    params = {
        "pe": pe,
        "atten1": gat_params(nfeat),
        "atten2": gat_params(nfeat),
        "tran1_w": w((nfeat, nfeat)),
        "tran1_b": w((1, nfeat)),
        "sp": {
            "wf1": w((nfeat, nfeat)), "bf1": w((1, nfeat)),
            "wf2": w((nfeat, nout)), "bf2": w((1, nout)),
            "wl1": w((nfeat, nfeat)), "bl1": w((1, nfeat)),
            "wl2": w((nfeat, nout)), "bl2": w((1, nout)),
        },
        # PyTorch Conv1d weight [Cout, Cin, k] stored here as [k, Cin, Cout].
        "tcn_w": w((ksize, tin, tout)),
        "tcn_b": w((1, tout)),
    }
    return params


if __name__ == "__main__":
    config = {
        "points_encoder_dims": [2, 32, 32],
        "descriptor_dim": 32,
        "hidden_dim": 16,
        "alpha": 0.2,
        "nheads": 4,
        "nout": 32,
        "temporal_encoder_dim": 32,       # == nout (TCN consumes GCN node features)
        "temporal_encoder_out_dim": 64,
        "temporal_kernel_size": 3,
    }

    key = jax.random.PRNGKey(0)
    kp, kd, ka, kw = jax.random.split(key, 4)
    params = init_params(kw, config)

    seq_len, n_pts = 3, 16
    points = jax.random.uniform(kp, (seq_len, n_pts, 2), jnp.float32)
    descs = jax.random.normal(kd, (seq_len, n_pts, config["descriptor_dim"]), jnp.float32)
    r = jax.random.uniform(ka, (seq_len, n_pts, n_pts), jnp.float32)
    adj = ((r + jnp.swapaxes(r, 1, 2)) > 1.0).astype(jnp.float32)
    adj = jnp.maximum(adj, jnp.eye(n_pts, dtype=jnp.float32)[None])       # self loops
    adjmask = jnp.where(adj > 0, 0.0, -9e15).astype(jnp.float32)          # additive softmax mask

    out = airobject_forward(params, config, points, descs, adjmask)
    out = jax.block_until_ready(out)

    assert out.shape == (1, config["temporal_encoder_out_dim"]), out.shape
    assert bool(jnp.all(jnp.isfinite(out)))
    print("KERNEL_OK")
</pallas_src>

<mosaic_0001>
module attributes {stable_mosaic.version = 11 : i64} {
  func.func @kernel(%arg0: i32, %arg1: memref<1x16x2xf32, #tpu.memory_space<vmem>>, %arg2: memref<1x16x32xf32, #tpu.memory_space<vmem>>, %arg3: memref<1x16x16xf32, #tpu.memory_space<vmem>>, %arg4: memref<2x32xf32, #tpu.memory_space<vmem>>, %arg5: memref<1x32xf32, #tpu.memory_space<vmem>>, %arg6: memref<1x32xf32, #tpu.memory_space<vmem>>, %arg7: memref<1x32xf32, #tpu.memory_space<vmem>>, %arg8: memref<32x32xf32, #tpu.memory_space<vmem>>, %arg9: memref<1x32xf32, #tpu.memory_space<vmem>>, %arg10: memref<64x64xf32, #tpu.memory_space<vmem>>, %arg11: memref<64x8xf32, #tpu.memory_space<vmem>>, %arg12: memref<64x64xf32, #tpu.memory_space<vmem>>, %arg13: memref<64x2xf32, #tpu.memory_space<vmem>>, %arg14: memref<64x64xf32, #tpu.memory_space<vmem>>, %arg15: memref<64x8xf32, #tpu.memory_space<vmem>>, %arg16: memref<64x64xf32, #tpu.memory_space<vmem>>, %arg17: memref<64x2xf32, #tpu.memory_space<vmem>>, %arg18: memref<64x64xf32, #tpu.memory_space<vmem>>, %arg19: memref<1x64xf32, #tpu.memory_space<vmem>>, %arg20: memref<64x64xf32, #tpu.memory_space<vmem>>, %arg21: memref<1x64xf32, #tpu.memory_space<vmem>>, %arg22: memref<64x32xf32, #tpu.memory_space<vmem>>, %arg23: memref<1x32xf32, #tpu.memory_space<vmem>>, %arg24: memref<64x64xf32, #tpu.memory_space<vmem>>, %arg25: memref<1x64xf32, #tpu.memory_space<vmem>>, %arg26: memref<64x32xf32, #tpu.memory_space<vmem>>, %arg27: memref<1x32xf32, #tpu.memory_space<vmem>>, %arg28: memref<1x16x32xf32, #tpu.memory_space<vmem>>) attributes {dimension_semantics = [#tpu.dimension_semantics<parallel>], iteration_bounds = array<i64: 3>, scalar_prefetch = 0 : i64, scratch_operands = 0 : i64, tpu.core_type = #tpu.core_type<tc>, window_params = [{transform_indices = @transform_0, window_bounds = array<i64: 1, 16, 2>}, {transform_indices = @transform_1, window_bounds = array<i64: 1, 16, 32>}, {transform_indices = @transform_2, window_bounds = array<i64: 1, 16, 16>}, {pipeline_mode = #tpu.pipeline_mode<synchronous>, transform_indices = @transform_3, window_bounds = array<i64: 2, 32>}, {pipeline_mode = #tpu.pipeline_mode<synchronous>, transform_indices = @transform_4, window_bounds = array<i64: 1, 32>}, {pipeline_mode = #tpu.pipeline_mode<synchronous>, transform_indices = @transform_5, window_bounds = array<i64: 1, 32>}, {pipeline_mode = #tpu.pipeline_mode<synchronous>, transform_indices = @transform_6, window_bounds = array<i64: 1, 32>}, {pipeline_mode = #tpu.pipeline_mode<synchronous>, transform_indices = @transform_7, window_bounds = array<i64: 32, 32>}, {pipeline_mode = #tpu.pipeline_mode<synchronous>, transform_indices = @transform_8, window_bounds = array<i64: 1, 32>}, {pipeline_mode = #tpu.pipeline_mode<synchronous>, transform_indices = @transform_9, window_bounds = array<i64: 64, 64>}, {pipeline_mode = #tpu.pipeline_mode<synchronous>, transform_indices = @transform_10, window_bounds = array<i64: 64, 8>}, {pipeline_mode = #tpu.pipeline_mode<synchronous>, transform_indices = @transform_11, window_bounds = array<i64: 64, 64>}, {pipeline_mode = #tpu.pipeline_mode<synchronous>, transform_indices = @transform_12, window_bounds = array<i64: 64, 2>}, {pipeline_mode = #tpu.pipeline_mode<synchronous>, transform_indices = @transform_13, window_bounds = array<i64: 64, 64>}, {pipeline_mode = #tpu.pipeline_mode<synchronous>, transform_indices = @transform_14, window_bounds = array<i64: 64, 8>}, {pipeline_mode = #tpu.pipeline_mode<synchronous>, transform_indices = @transform_15, window_bounds = array<i64: 64, 64>}, {pipeline_mode = #tpu.pipeline_mode<synchronous>, transform_indices = @transform_16, window_bounds = array<i64: 64, 2>}, {pipeline_mode = #tpu.pipeline_mode<synchronous>, transform_indices = @transform_17, window_bounds = array<i64: 64, 64>}, {pipeline_mode = #tpu.pipeline_mode<synchronous>, transform_indices = @transform_18, window_bounds = array<i64: 1, 64>}, {pipeline_mode = #tpu.pipeline_mode<synchronous>, transform_indices = @transform_19, window_bounds = array<i64: 64, 64>}, {pipeline_mode = #tpu.pipeline_mode<synchronous>, transform_indices = @transform_20, window_bounds = array<i64: 1, 64>}, {pipeline_mode = #tpu.pipeline_mode<synchronous>, transform_indices = @transform_21, window_bounds = array<i64: 64, 32>}, {pipeline_mode = #tpu.pipeline_mode<synchronous>, transform_indices = @transform_22, window_bounds = array<i64: 1, 32>}, {pipeline_mode = #tpu.pipeline_mode<synchronous>, transform_indices = @transform_23, window_bounds = array<i64: 64, 64>}, {pipeline_mode = #tpu.pipeline_mode<synchronous>, transform_indices = @transform_24, window_bounds = array<i64: 1, 64>}, {pipeline_mode = #tpu.pipeline_mode<synchronous>, transform_indices = @transform_25, window_bounds = array<i64: 64, 32>}, {pipeline_mode = #tpu.pipeline_mode<synchronous>, transform_indices = @transform_26, window_bounds = array<i64: 1, 32>}, {transform_indices = @transform_27, window_bounds = array<i64: 1, 16, 32>}]} {
    %c0 = arith.constant 0 : index
    %c0_0 = arith.constant 0 : index
    %c0_1 = arith.constant 0 : index
    %0 = vector.load %arg3[%c0, %c0_0, %c0_1] : memref<1x16x16xf32, #tpu.memory_space<vmem>>, vector<1x16x16xf32>
    %1 = vector.shape_cast %0 : vector<1x16x16xf32> to vector<16x16xf32>
    %c0_2 = arith.constant 0 : index
    %c0_3 = arith.constant 0 : index
    %c0_4 = arith.constant 0 : index
    %2 = vector.load %arg2[%c0_2, %c0_3, %c0_4] : memref<1x16x32xf32, #tpu.memory_space<vmem>>, vector<1x16x32xf32>
    %3 = vector.shape_cast %2 : vector<1x16x32xf32> to vector<16x32xf32>
    %c0_5 = arith.constant 0 : index
    %c0_6 = arith.constant 0 : index
    %c0_7 = arith.constant 0 : index
    %4 = vector.load %arg1[%c0_5, %c0_6, %c0_7] : memref<1x16x2xf32, #tpu.memory_space<vmem>>, vector<1x16x2xf32>
    %5 = vector.shape_cast %4 : vector<1x16x2xf32> to vector<16x2xf32>
    %c0_8 = arith.constant 0 : index
    %c0_9 = arith.constant 0 : index
    %6 = vector.load %arg4[%c0_8, %c0_9] : memref<2x32xf32, #tpu.memory_space<vmem>>, vector<2x32xf32>
    %c0_10 = arith.constant 0 : index
    %c0_11 = arith.constant 0 : index
    %7 = vector.load %arg5[%c0_10, %c0_11] : memref<1x32xf32, #tpu.memory_space<vmem>>, vector<1x32xf32>
    %cst = arith.constant dense<0.000000e+00> : vector<16x32xf32>
    %8 = tpu.matmul %5, %6, %cst {dimension_numbers = #tpu.dot_dimension_numbers<[1], [0], [0], [1], [0, 0, 1, 1], [], []>} : vector<16x2xf32>, vector<2x32xf32>, vector<16x32xf32> -> vector<16x32xf32>
    %9 = vector.broadcast %7 : vector<1x32xf32> to vector<16x32xf32>
    %10 = arith.addf %8, %9 : vector<16x32xf32>
    %c0_12 = arith.constant 0 : index
    %c0_13 = arith.constant 0 : index
    %11 = vector.load %arg6[%c0_12, %c0_13] : memref<1x32xf32, #tpu.memory_space<vmem>>, vector<1x32xf32>
    %c0_14 = arith.constant 0 : index
    %c0_15 = arith.constant 0 : index
    %12 = vector.load %arg7[%c0_14, %c0_15] : memref<1x32xf32, #tpu.memory_space<vmem>>, vector<1x32xf32>
    %cst_16 = arith.constant dense<0.000000e+00> : vector<32xf32>
    %13 = vector.multi_reduction <add>, %10, %cst_16 [0] : vector<16x32xf32> to vector<32xf32>
    %14 = vector.shape_cast %13 : vector<32xf32> to vector<1x32xf32>
    %cst_17 = arith.constant 1.600000e+01 : f32
    %15 = vector.broadcast %cst_17 : f32 to vector<1x32xf32>
    %16 = arith.divf %14, %15 : vector<1x32xf32>
    %17 = vector.broadcast %16 : vector<1x32xf32> to vector<16x32xf32>
    %18 = arith.subf %10, %17 : vector<16x32xf32>
    %19 = vector.broadcast %16 : vector<1x32xf32> to vector<16x32xf32>
    %20 = arith.subf %10, %19 : vector<16x32xf32>
    %21 = arith.mulf %18, %20 : vector<16x32xf32>
    %cst_18 = arith.constant dense<0.000000e+00> : vector<32xf32>
    %22 = vector.multi_reduction <add>, %21, %cst_18 [0] : vector<16x32xf32> to vector<32xf32>
    %23 = vector.shape_cast %22 : vector<32xf32> to vector<1x32xf32>
    %cst_19 = arith.constant 1.600000e+01 : f32
    %24 = vector.broadcast %cst_19 : f32 to vector<1x32xf32>
    %25 = arith.divf %23, %24 : vector<1x32xf32>
    %26 = vector.broadcast %16 : vector<1x32xf32> to vector<16x32xf32>
    %27 = arith.subf %10, %26 : vector<16x32xf32>
    %cst_20 = arith.constant 9.99999974E-6 : f32
    %28 = vector.broadcast %cst_20 : f32 to vector<1x32xf32>
    %29 = arith.addf %25, %28 : vector<1x32xf32>
    %30 = math.rsqrt %29 : vector<1x32xf32>
    %31 = vector.broadcast %30 : vector<1x32xf32> to vector<16x32xf32>
    %32 = arith.mulf %27, %31 : vector<16x32xf32>
    %33 = vector.broadcast %11 : vector<1x32xf32> to vector<16x32xf32>
    %34 = arith.mulf %32, %33 : vector<16x32xf32>
    %35 = vector.broadcast %12 : vector<1x32xf32> to vector<16x32xf32>
    %36 = arith.addf %34, %35 : vector<16x32xf32>
    %cst_21 = arith.constant 0.000000e+00 : f32
    %37 = vector.broadcast %cst_21 : f32 to vector<16x32xf32>
    %38 = arith.maximumf %36, %37 : vector<16x32xf32>
    %c0_22 = arith.constant 0 : index
    %c0_23 = arith.constant 0 : index
    %39 = vector.load %arg8[%c0_22, %c0_23] : memref<32x32xf32, #tpu.memory_space<vmem>>, vector<32x32xf32>
    %c0_24 = arith.constant 0 : index
    %c0_25 = arith.constant 0 : index
    %40 = vector.load %arg9[%c0_24, %c0_25] : memref<1x32xf32, #tpu.memory_space<vmem>>, vector<1x32xf32>
    %cst_26 = arith.constant dense<0.000000e+00> : vector<16x32xf32>
    %41 = tpu.matmul %38, %39, %cst_26 {dimension_numbers = #tpu.dot_dimension_numbers<[1], [0], [0], [1], [0, 0, 1, 1], [], []>} : vector<16x32xf32>, vector<32x32xf32>, vector<16x32xf32> -> vector<16x32xf32>
    %42 = vector.broadcast %40 : vector<1x32xf32> to vector<16x32xf32>
    %43 = arith.addf %41, %42 : vector<16x32xf32>
    %44 = arith.mulf %43, %43 : vector<16x32xf32>
    %cst_27 = arith.constant dense<0.000000e+00> : vector<16xf32>
    %45 = vector.multi_reduction <add>, %44, %cst_27 [1] : vector<16x32xf32> to vector<16xf32>
    %46 = vector.shape_cast %45 : vector<16xf32> to vector<16x1xf32>
    %47 = math.sqrt %46 : vector<16x1xf32>
    %cst_28 = arith.constant 9.99999996E-13 : f32
    %48 = vector.broadcast %cst_28 : f32 to vector<16x1xf32>
    %49 = arith.maximumf %47, %48 : vector<16x1xf32>
    %50 = vector.broadcast %49 : vector<16x1xf32> to vector<16x32xf32>
    %51 = arith.divf %43, %50 : vector<16x32xf32>
    %c0_29 = arith.constant 0 : index
    %c0_30 = arith.constant 0 : index
    %52 = vector.load %arg10[%c0_29, %c0_30] : memref<64x64xf32, #tpu.memory_space<vmem>>, vector<64x64xf32>
    %c0_31 = arith.constant 0 : index
    %c0_32 = arith.constant 0 : index
    %53 = vector.load %arg11[%c0_31, %c0_32] : memref<64x8xf32, #tpu.memory_space<vmem>>, vector<64x8xf32>
    %c0_33 = arith.constant 0 : index
    %c0_34 = arith.constant 0 : index
    %54 = vector.load %arg12[%c0_33, %c0_34] : memref<64x64xf32, #tpu.memory_space<vmem>>, vector<64x64xf32>
    %c0_35 = arith.constant 0 : index
    %c0_36 = arith.constant 0 : index
    %55 = vector.load %arg13[%c0_35, %c0_36] : memref<64x2xf32, #tpu.memory_space<vmem>>, vector<64x2xf32>
    %56 = vector.extract_strided_slice %52 {offsets = [0, 0], sizes = [32, 64], strides = [1, 1]} : vector<64x64xf32> to vector<32x64xf32>
    %cst_37 = arith.constant dense<0.000000e+00> : vector<16x64xf32>
    %57 = tpu.matmul %3, %56, %cst_37 {dimension_numbers = #tpu.dot_dimension_numbers<[1], [0], [0], [1], [0, 0, 1, 1], [], []>} : vector<16x32xf32>, vector<32x64xf32>, vector<16x64xf32> -> vector<16x64xf32>
    %58 = vector.extract_strided_slice %52 {offsets = [32, 0], sizes = [32, 64], strides = [1, 1]} : vector<64x64xf32> to vector<32x64xf32>
    %cst_38 = arith.constant dense<0.000000e+00> : vector<16x64xf32>
    %59 = tpu.matmul %51, %58, %cst_38 {dimension_numbers = #tpu.dot_dimension_numbers<[1], [0], [0], [1], [0, 0, 1, 1], [], []>} : vector<16x32xf32>, vector<32x64xf32>, vector<16x64xf32> -> vector<16x64xf32>
    %60 = arith.addf %57, %59 : vector<16x64xf32>
    %cst_39 = arith.constant dense<0.000000e+00> : vector<16x8xf32>
    %61 = tpu.matmul %60, %53, %cst_39 {dimension_numbers = #tpu.dot_dimension_numbers<[1], [0], [0], [1], [0, 0, 1, 1], [], []>} : vector<16x64xf32>, vector<64x8xf32>, vector<16x8xf32> -> vector<16x8xf32>
    %62 = vector.extract_strided_slice %61 {offsets = [0, 0], sizes = [16, 1], strides = [1, 1]} : vector<16x8xf32> to vector<16x1xf32>
    %63 = vector.extract_strided_slice %61 {offsets = [0, 1], sizes = [16, 1], strides = [1, 1]} : vector<16x8xf32> to vector<16x1xf32>
    %64 = tpu.transpose %63, [1, 0] : vector<16x1xf32> -> vector<1x16xf32>
    %65 = vector.broadcast %62 : vector<16x1xf32> to vector<16x16xf32>
    %66 = vector.broadcast %64 : vector<1x16xf32> to vector<16x16xf32>
    %67 = arith.addf %65, %66 : vector<16x16xf32>
    %cst_40 = arith.constant 0.000000e+00 : f32
    %68 = vector.broadcast %cst_40 : f32 to vector<16x16xf32>
    %69 = arith.cmpf ogt, %67, %68 : vector<16x16xf32>
    %cst_41 = arith.constant 2.000000e-01 : f32
    %70 = vector.broadcast %cst_41 : f32 to vector<16x16xf32>
    %71 = arith.mulf %70, %67 : vector<16x16xf32>
    %72 = arith.select %69, %67, %71 : vector<16x16xi1>, vector<16x16xf32>
    %73 = arith.addf %72, %1 : vector<16x16xf32>
    %cst_42 = arith.constant dense<0xFF800000> : vector<16xf32>
    %74 = vector.multi_reduction <maximumf>, %73, %cst_42 [1] : vector<16x16xf32> to vector<16xf32>
    %75 = vector.shape_cast %74 : vector<16xf32> to vector<16x1xf32>
    %76 = vector.broadcast %75 : vector<16x1xf32> to vector<16x16xf32>
    %77 = arith.subf %73, %76 : vector<16x16xf32>
    %78 = math.exp %77 : vector<16x16xf32>
    %cst_43 = arith.constant dense<0.000000e+00> : vector<16xf32>
    %79 = vector.multi_reduction <add>, %78, %cst_43 [1] : vector<16x16xf32> to vector<16xf32>
    %80 = vector.shape_cast %79 : vector<16xf32> to vector<16x1xf32>
    %81 = vector.broadcast %80 : vector<16x1xf32> to vector<16x16xf32>
    %82 = arith.divf %78, %81 : vector<16x16xf32>
    %83 = vector.extract_strided_slice %60 {offsets = [0, 0], sizes = [16, 16], strides = [1, 1]} : vector<16x64xf32> to vector<16x16xf32>
    %cst_44 = arith.constant dense<0.000000e+00> : vector<16x16xf32>
    %84 = tpu.matmul %82, %83, %cst_44 {dimension_numbers = #tpu.dot_dimension_numbers<[1], [0], [0], [1], [0, 0, 1, 1], [], []>} : vector<16x16xf32>, vector<16x16xf32>, vector<16x16xf32> -> vector<16x16xf32>
    %cst_45 = arith.constant 0.000000e+00 : f32
    %85 = vector.broadcast %cst_45 : f32 to vector<16x16xf32>
    %86 = arith.cmpf ogt, %84, %85 : vector<16x16xf32>
    %cst_46 = arith.constant 0.000000e+00 : f32
    %87 = vector.broadcast %cst_46 : f32 to vector<16x16xf32>
    %88 = arith.minimumf %84, %87 : vector<16x16xf32>
    %89 = math.exp %88 : vector<16x16xf32>
    %cst_47 = arith.constant 1.000000e+00 : f32
    %90 = vector.broadcast %cst_47 : f32 to vector<16x16xf32>
    %91 = arith.subf %89, %90 : vector<16x16xf32>
    %92 = arith.select %86, %84, %91 : vector<16x16xi1>, vector<16x16xf32>
    %93 = vector.extract_strided_slice %54 {offsets = [0, 0], sizes = [16, 64], strides = [1, 1]} : vector<64x64xf32> to vector<16x64xf32>
    %cst_48 = arith.constant dense<0.000000e+00> : vector<16x64xf32>
    %94 = tpu.matmul %92, %93, %cst_48 {dimension_numbers = #tpu.dot_dimension_numbers<[1], [0], [0], [1], [0, 0, 1, 1], [], []>} : vector<16x16xf32>, vector<16x64xf32>, vector<16x64xf32> -> vector<16x64xf32>
    %95 = vector.extract_strided_slice %61 {offsets = [0, 2], sizes = [16, 1], strides = [1, 1]} : vector<16x8xf32> to vector<16x1xf32>
    %96 = vector.extract_strided_slice %61 {offsets = [0, 3], sizes = [16, 1], strides = [1, 1]} : vector<16x8xf32> to vector<16x1xf32>
    %97 = tpu.transpose %96, [1, 0] : vector<16x1xf32> -> vector<1x16xf32>
    %98 = vector.broadcast %95 : vector<16x1xf32> to vector<16x16xf32>
    %99 = vector.broadcast %97 : vector<1x16xf32> to vector<16x16xf32>
    %100 = arith.addf %98, %99 : vector<16x16xf32>
    %cst_49 = arith.constant 0.000000e+00 : f32
    %101 = vector.broadcast %cst_49 : f32 to vector<16x16xf32>
    %102 = arith.cmpf ogt, %100, %101 : vector<16x16xf32>
    %cst_50 = arith.constant 2.000000e-01 : f32
    %103 = vector.broadcast %cst_50 : f32 to vector<16x16xf32>
    %104 = arith.mulf %103, %100 : vector<16x16xf32>
    %105 = arith.select %102, %100, %104 : vector<16x16xi1>, vector<16x16xf32>
    %106 = arith.addf %105, %1 : vector<16x16xf32>
    %cst_51 = arith.constant dense<0xFF800000> : vector<16xf32>
    %107 = vector.multi_reduction <maximumf>, %106, %cst_51 [1] : vector<16x16xf32> to vector<16xf32>
    %108 = vector.shape_cast %107 : vector<16xf32> to vector<16x1xf32>
    %109 = vector.broadcast %108 : vector<16x1xf32> to vector<16x16xf32>
    %110 = arith.subf %106, %109 : vector<16x16xf32>
    %111 = math.exp %110 : vector<16x16xf32>
    %cst_52 = arith.constant dense<0.000000e+00> : vector<16xf32>
    %112 = vector.multi_reduction <add>, %111, %cst_52 [1] : vector<16x16xf32> to vector<16xf32>
    %113 = vector.shape_cast %112 : vector<16xf32> to vector<16x1xf32>
    %114 = vector.broadcast %113 : vector<16x1xf32> to vector<16x16xf32>
    %115 = arith.divf %111, %114 : vector<16x16xf32>
    %116 = vector.extract_strided_slice %60 {offsets = [0, 16], sizes = [16, 16], strides = [1, 1]} : vector<16x64xf32> to vector<16x16xf32>
    %cst_53 = arith.constant dense<0.000000e+00> : vector<16x16xf32>
    %117 = tpu.matmul %115, %116, %cst_53 {dimension_numbers = #tpu.dot_dimension_numbers<[1], [0], [0], [1], [0, 0, 1, 1], [], []>} : vector<16x16xf32>, vector<16x16xf32>, vector<16x16xf32> -> vector<16x16xf32>
    %cst_54 = arith.constant 0.000000e+00 : f32
    %118 = vector.broadcast %cst_54 : f32 to vector<16x16xf32>
    %119 = arith.cmpf ogt, %117, %118 : vector<16x16xf32>
    %cst_55 = arith.constant 0.000000e+00 : f32
    %120 = vector.broadcast %cst_55 : f32 to vector<16x16xf32>
    %121 = arith.minimumf %117, %120 : vector<16x16xf32>
    %122 = math.exp %121 : vector<16x16xf32>
    %cst_56 = arith.constant 1.000000e+00 : f32
    %123 = vector.broadcast %cst_56 : f32 to vector<16x16xf32>
    %124 = arith.subf %122, %123 : vector<16x16xf32>
    %125 = arith.select %119, %117, %124 : vector<16x16xi1>, vector<16x16xf32>
    %126 = vector.extract_strided_slice %54 {offsets = [16, 0], sizes = [16, 64], strides = [1, 1]} : vector<64x64xf32> to vector<16x64xf32>
    %cst_57 = arith.constant dense<0.000000e+00> : vector<16x64xf32>
    %127 = tpu.matmul %125, %126, %cst_57 {dimension_numbers = #tpu.dot_dimension_numbers<[1], [0], [0], [1], [0, 0, 1, 1], [], []>} : vector<16x16xf32>, vector<16x64xf32>, vector<16x64xf32> -> vector<16x64xf32>
    %128 = arith.addf %94, %127 : vector<16x64xf32>
    %129 = vector.extract_strided_slice %61 {offsets = [0, 4], sizes = [16, 1], strides = [1, 1]} : vector<16x8xf32> to vector<16x1xf32>
    %130 = vector.extract_strided_slice %61 {offsets = [0, 5], sizes = [16, 1], strides = [1, 1]} : vector<16x8xf32> to vector<16x1xf32>
    %131 = tpu.transpose %130, [1, 0] : vector<16x1xf32> -> vector<1x16xf32>
    %132 = vector.broadcast %129 : vector<16x1xf32> to vector<16x16xf32>
    %133 = vector.broadcast %131 : vector<1x16xf32> to vector<16x16xf32>
    %134 = arith.addf %132, %133 : vector<16x16xf32>
    %cst_58 = arith.constant 0.000000e+00 : f32
    %135 = vector.broadcast %cst_58 : f32 to vector<16x16xf32>
    %136 = arith.cmpf ogt, %134, %135 : vector<16x16xf32>
    %cst_59 = arith.constant 2.000000e-01 : f32
    %137 = vector.broadcast %cst_59 : f32 to vector<16x16xf32>
    %138 = arith.mulf %137, %134 : vector<16x16xf32>
    %139 = arith.select %136, %134, %138 : vector<16x16xi1>, vector<16x16xf32>
    %140 = arith.addf %139, %1 : vector<16x16xf32>
    %cst_60 = arith.constant dense<0xFF800000> : vector<16xf32>
    %141 = vector.multi_reduction <maximumf>, %140, %cst_60 [1] : vector<16x16xf32> to vector<16xf32>
    %142 = vector.shape_cast %141 : vector<16xf32> to vector<16x1xf32>
    %143 = vector.broadcast %142 : vector<16x1xf32> to vector<16x16xf32>
    %144 = arith.subf %140, %143 : vector<16x16xf32>
    %145 = math.exp %144 : vector<16x16xf32>
    %cst_61 = arith.constant dense<0.000000e+00> : vector<16xf32>
    %146 = vector.multi_reduction <add>, %145, %cst_61 [1] : vector<16x16xf32> to vector<16xf32>
    %147 = vector.shape_cast %146 : vector<16xf32> to vector<16x1xf32>
    %148 = vector.broadcast %147 : vector<16x1xf32> to vector<16x16xf32>
    %149 = arith.divf %145, %148 : vector<16x16xf32>
    %150 = vector.extract_strided_slice %60 {offsets = [0, 32], sizes = [16, 16], strides = [1, 1]} : vector<16x64xf32> to vector<16x16xf32>
    %cst_62 = arith.constant dense<0.000000e+00> : vector<16x16xf32>
    %151 = tpu.matmul %149, %150, %cst_62 {dimension_numbers = #tpu.dot_dimension_numbers<[1], [0], [0], [1], [0, 0, 1, 1], [], []>} : vector<16x16xf32>, vector<16x16xf32>, vector<16x16xf32> -> vector<16x16xf32>
    %cst_63 = arith.constant 0.000000e+00 : f32
    %152 = vector.broadcast %cst_63 : f32 to vector<16x16xf32>
    %153 = arith.cmpf ogt, %151, %152 : vector<16x16xf32>
    %cst_64 = arith.constant 0.000000e+00 : f32
    %154 = vector.broadcast %cst_64 : f32 to vector<16x16xf32>
    %155 = arith.minimumf %151, %154 : vector<16x16xf32>
    %156 = math.exp %155 : vector<16x16xf32>
    %cst_65 = arith.constant 1.000000e+00 : f32
    %157 = vector.broadcast %cst_65 : f32 to vector<16x16xf32>
    %158 = arith.subf %156, %157 : vector<16x16xf32>
    %159 = arith.select %153, %151, %158 : vector<16x16xi1>, vector<16x16xf32>
    %160 = vector.extract_strided_slice %54 {offsets = [32, 0], sizes = [16, 64], strides = [1, 1]} : vector<64x64xf32> to vector<16x64xf32>
    %cst_66 = arith.constant dense<0.000000e+00> : vector<16x64xf32>
    %161 = tpu.matmul %159, %160, %cst_66 {dimension_numbers = #tpu.dot_dimension_numbers<[1], [0], [0], [1], [0, 0, 1, 1], [], []>} : vector<16x16xf32>, vector<16x64xf32>, vector<16x64xf32> -> vector<16x64xf32>
    %162 = arith.addf %128, %161 : vector<16x64xf32>
    %163 = vector.extract_strided_slice %61 {offsets = [0, 6], sizes = [16, 1], strides = [1, 1]} : vector<16x8xf32> to vector<16x1xf32>
    %164 = vector.extract_strided_slice %61 {offsets = [0, 7], sizes = [16, 1], strides = [1, 1]} : vector<16x8xf32> to vector<16x1xf32>
    %165 = tpu.transpose %164, [1, 0] : vector<16x1xf32> -> vector<1x16xf32>
    %166 = vector.broadcast %163 : vector<16x1xf32> to vector<16x16xf32>
    %167 = vector.broadcast %165 : vector<1x16xf32> to vector<16x16xf32>
    %168 = arith.addf %166, %167 : vector<16x16xf32>
    %cst_67 = arith.constant 0.000000e+00 : f32
    %169 = vector.broadcast %cst_67 : f32 to vector<16x16xf32>
    %170 = arith.cmpf ogt, %168, %169 : vector<16x16xf32>
    %cst_68 = arith.constant 2.000000e-01 : f32
    %171 = vector.broadcast %cst_68 : f32 to vector<16x16xf32>
    %172 = arith.mulf %171, %168 : vector<16x16xf32>
    %173 = arith.select %170, %168, %172 : vector<16x16xi1>, vector<16x16xf32>
    %174 = arith.addf %173, %1 : vector<16x16xf32>
    %cst_69 = arith.constant dense<0xFF800000> : vector<16xf32>
    %175 = vector.multi_reduction <maximumf>, %174, %cst_69 [1] : vector<16x16xf32> to vector<16xf32>
    %176 = vector.shape_cast %175 : vector<16xf32> to vector<16x1xf32>
    %177 = vector.broadcast %176 : vector<16x1xf32> to vector<16x16xf32>
    %178 = arith.subf %174, %177 : vector<16x16xf32>
    %179 = math.exp %178 : vector<16x16xf32>
    %cst_70 = arith.constant dense<0.000000e+00> : vector<16xf32>
    %180 = vector.multi_reduction <add>, %179, %cst_70 [1] : vector<16x16xf32> to vector<16xf32>
    %181 = vector.shape_cast %180 : vector<16xf32> to vector<16x1xf32>
    %182 = vector.broadcast %181 : vector<16x1xf32> to vector<16x16xf32>
    %183 = arith.divf %179, %182 : vector<16x16xf32>
    %184 = vector.extract_strided_slice %60 {offsets = [0, 48], sizes = [16, 16], strides = [1, 1]} : vector<16x64xf32> to vector<16x16xf32>
    %cst_71 = arith.constant dense<0.000000e+00> : vector<16x16xf32>
    %185 = tpu.matmul %183, %184, %cst_71 {dimension_numbers = #tpu.dot_dimension_numbers<[1], [0], [0], [1], [0, 0, 1, 1], [], []>} : vector<16x16xf32>, vector<16x16xf32>, vector<16x16xf32> -> vector<16x16xf32>
    %cst_72 = arith.constant 0.000000e+00 : f32
    %186 = vector.broadcast %cst_72 : f32 to vector<16x16xf32>
    %187 = arith.cmpf ogt, %185, %186 : vector<16x16xf32>
    %cst_73 = arith.constant 0.000000e+00 : f32
    %188 = vector.broadcast %cst_73 : f32 to vector<16x16xf32>
    %189 = arith.minimumf %185, %188 : vector<16x16xf32>
    %190 = math.exp %189 : vector<16x16xf32>
    %cst_74 = arith.constant 1.000000e+00 : f32
    %191 = vector.broadcast %cst_74 : f32 to vector<16x16xf32>
    %192 = arith.subf %190, %191 : vector<16x16xf32>
    %193 = arith.select %187, %185, %192 : vector<16x16xi1>, vector<16x16xf32>
    %194 = vector.extract_strided_slice %54 {offsets = [48, 0], sizes = [16, 64], strides = [1, 1]} : vector<64x64xf32> to vector<16x64xf32>
    %cst_75 = arith.constant dense<0.000000e+00> : vector<16x64xf32>
    %195 = tpu.matmul %193, %194, %cst_75 {dimension_numbers = #tpu.dot_dimension_numbers<[1], [0], [0], [1], [0, 0, 1, 1], [], []>} : vector<16x16xf32>, vector<16x64xf32>, vector<16x64xf32> -> vector<16x64xf32>
    %196 = arith.addf %162, %195 : vector<16x64xf32>
    %cst_76 = arith.constant dense<0.000000e+00> : vector<16x2xf32>
    %197 = tpu.matmul %196, %55, %cst_76 {dimension_numbers = #tpu.dot_dimension_numbers<[1], [0], [0], [1], [0, 0, 1, 1], [], []>} : vector<16x64xf32>, vector<64x2xf32>, vector<16x2xf32> -> vector<16x2xf32>
    %198 = vector.extract_strided_slice %197 {offsets = [0, 0], sizes = [16, 1], strides = [1, 1]} : vector<16x2xf32> to vector<16x1xf32>
    %199 = vector.extract_strided_slice %197 {offsets = [0, 1], sizes = [16, 1], strides = [1, 1]} : vector<16x2xf32> to vector<16x1xf32>
    %200 = tpu.transpose %199, [1, 0] : vector<16x1xf32> -> vector<1x16xf32>
    %201 = vector.broadcast %198 : vector<16x1xf32> to vector<16x16xf32>
    %202 = vector.broadcast %200 : vector<1x16xf32> to vector<16x16xf32>
    %203 = arith.addf %201, %202 : vector<16x16xf32>
    %cst_77 = arith.constant 0.000000e+00 : f32
    %204 = vector.broadcast %cst_77 : f32 to vector<16x16xf32>
    %205 = arith.cmpf ogt, %203, %204 : vector<16x16xf32>
    %cst_78 = arith.constant 2.000000e-01 : f32
    %206 = vector.broadcast %cst_78 : f32 to vector<16x16xf32>
    %207 = arith.mulf %206, %203 : vector<16x16xf32>
    %208 = arith.select %205, %203, %207 : vector<16x16xi1>, vector<16x16xf32>
    %209 = arith.addf %208, %1 : vector<16x16xf32>
    %cst_79 = arith.constant dense<0xFF800000> : vector<16xf32>
    %210 = vector.multi_reduction <maximumf>, %209, %cst_79 [1] : vector<16x16xf32> to vector<16xf32>
    %211 = vector.shape_cast %210 : vector<16xf32> to vector<16x1xf32>
    %212 = vector.broadcast %211 : vector<16x1xf32> to vector<16x16xf32>
    %213 = arith.subf %209, %212 : vector<16x16xf32>
    %214 = math.exp %213 : vector<16x16xf32>
    %cst_80 = arith.constant dense<0.000000e+00> : vector<16xf32>
    %215 = vector.multi_reduction <add>, %214, %cst_80 [1] : vector<16x16xf32> to vector<16xf32>
    %216 = vector.shape_cast %215 : vector<16xf32> to vector<16x1xf32>
    %217 = vector.broadcast %216 : vector<16x1xf32> to vector<16x16xf32>
    %218 = arith.divf %214, %217 : vector<16x16xf32>
    %cst_81 = arith.constant dense<0.000000e+00> : vector<16x64xf32>
    %219 = tpu.matmul %218, %196, %cst_81 {dimension_numbers = #tpu.dot_dimension_numbers<[1], [0], [0], [1], [0, 0, 1, 1], [], []>} : vector<16x16xf32>, vector<16x64xf32>, vector<16x64xf32> -> vector<16x64xf32>
    %cst_82 = arith.constant 0.000000e+00 : f32
    %220 = vector.broadcast %cst_82 : f32 to vector<16x64xf32>
    %221 = arith.cmpf ogt, %219, %220 : vector<16x64xf32>
    %cst_83 = arith.constant 0.000000e+00 : f32
    %222 = vector.broadcast %cst_83 : f32 to vector<16x64xf32>
    %223 = arith.minimumf %219, %222 : vector<16x64xf32>
    %224 = math.exp %223 : vector<16x64xf32>
    %cst_84 = arith.constant 1.000000e+00 : f32
    %225 = vector.broadcast %cst_84 : f32 to vector<16x64xf32>
    %226 = arith.subf %224, %225 : vector<16x64xf32>
    %227 = arith.select %221, %219, %226 : vector<16x64xi1>, vector<16x64xf32>
    %c0_85 = arith.constant 0 : index
    %c0_86 = arith.constant 0 : index
    %228 = vector.load %arg14[%c0_85, %c0_86] : memref<64x64xf32, #tpu.memory_space<vmem>>, vector<64x64xf32>
    %c0_87 = arith.constant 0 : index
    %c0_88 = arith.constant 0 : index
    %229 = vector.load %arg15[%c0_87, %c0_88] : memref<64x8xf32, #tpu.memory_space<vmem>>, vector<64x8xf32>
    %c0_89 = arith.constant 0 : index
    %c0_90 = arith.constant 0 : index
    %230 = vector.load %arg16[%c0_89, %c0_90] : memref<64x64xf32, #tpu.memory_space<vmem>>, vector<64x64xf32>
    %c0_91 = arith.constant 0 : index
    %c0_92 = arith.constant 0 : index
    %231 = vector.load %arg17[%c0_91, %c0_92] : memref<64x2xf32, #tpu.memory_space<vmem>>, vector<64x2xf32>
    %cst_93 = arith.constant dense<0.000000e+00> : vector<16x64xf32>
    %232 = tpu.matmul %227, %228, %cst_93 {dimension_numbers = #tpu.dot_dimension_numbers<[1], [0], [0], [1], [0, 0, 1, 1], [], []>} : vector<16x64xf32>, vector<64x64xf32>, vector<16x64xf32> -> vector<16x64xf32>
    %cst_94 = arith.constant dense<0.000000e+00> : vector<16x8xf32>
    %233 = tpu.matmul %232, %229, %cst_94 {dimension_numbers = #tpu.dot_dimension_numbers<[1], [0], [0], [1], [0, 0, 1, 1], [], []>} : vector<16x64xf32>, vector<64x8xf32>, vector<16x8xf32> -> vector<16x8xf32>
    %234 = vector.extract_strided_slice %233 {offsets = [0, 0], sizes = [16, 1], strides = [1, 1]} : vector<16x8xf32> to vector<16x1xf32>
    %235 = vector.extract_strided_slice %233 {offsets = [0, 1], sizes = [16, 1], strides = [1, 1]} : vector<16x8xf32> to vector<16x1xf32>
    %236 = tpu.transpose %235, [1, 0] : vector<16x1xf32> -> vector<1x16xf32>
    %237 = vector.broadcast %234 : vector<16x1xf32> to vector<16x16xf32>
    %238 = vector.broadcast %236 : vector<1x16xf32> to vector<16x16xf32>
    %239 = arith.addf %237, %238 : vector<16x16xf32>
    %cst_95 = arith.constant 0.000000e+00 : f32
    %240 = vector.broadcast %cst_95 : f32 to vector<16x16xf32>
    %241 = arith.cmpf ogt, %239, %240 : vector<16x16xf32>
    %cst_96 = arith.constant 2.000000e-01 : f32
    %242 = vector.broadcast %cst_96 : f32 to vector<16x16xf32>
    %243 = arith.mulf %242, %239 : vector<16x16xf32>
    %244 = arith.select %241, %239, %243 : vector<16x16xi1>, vector<16x16xf32>
    %245 = arith.addf %244, %1 : vector<16x16xf32>
    %cst_97 = arith.constant dense<0xFF800000> : vector<16xf32>
    %246 = vector.multi_reduction <maximumf>, %245, %cst_97 [1] : vector<16x16xf32> to vector<16xf32>
    %247 = vector.shape_cast %246 : vector<16xf32> to vector<16x1xf32>
    %248 = vector.broadcast %247 : vector<16x1xf32> to vector<16x16xf32>
    %249 = arith.subf %245, %248 : vector<16x16xf32>
    %250 = math.exp %249 : vector<16x16xf32>
    %cst_98 = arith.constant dense<0.000000e+00> : vector<16xf32>
    %251 = vector.multi_reduction <add>, %250, %cst_98 [1] : vector<16x16xf32> to vector<16xf32>
    %252 = vector.shape_cast %251 : vector<16xf32> to vector<16x1xf32>
    %253 = vector.broadcast %252 : vector<16x1xf32> to vector<16x16xf32>
    %254 = arith.divf %250, %253 : vector<16x16xf32>
    %255 = vector.extract_strided_slice %232 {offsets = [0, 0], sizes = [16, 16], strides = [1, 1]} : vector<16x64xf32> to vector<16x16xf32>
    %cst_99 = arith.constant dense<0.000000e+00> : vector<16x16xf32>
    %256 = tpu.matmul %254, %255, %cst_99 {dimension_numbers = #tpu.dot_dimension_numbers<[1], [0], [0], [1], [0, 0, 1, 1], [], []>} : vector<16x16xf32>, vector<16x16xf32>, vector<16x16xf32> -> vector<16x16xf32>
    %cst_100 = arith.constant 0.000000e+00 : f32
    %257 = vector.broadcast %cst_100 : f32 to vector<16x16xf32>
    %258 = arith.cmpf ogt, %256, %257 : vector<16x16xf32>
    %cst_101 = arith.constant 0.000000e+00 : f32
    %259 = vector.broadcast %cst_101 : f32 to vector<16x16xf32>
    %260 = arith.minimumf %256, %259 : vector<16x16xf32>
    %261 = math.exp %260 : vector<16x16xf32>
    %cst_102 = arith.constant 1.000000e+00 : f32
    %262 = vector.broadcast %cst_102 : f32 to vector<16x16xf32>
    %263 = arith.subf %261, %262 : vector<16x16xf32>
    %264 = arith.select %258, %256, %263 : vector<16x16xi1>, vector<16x16xf32>
    %265 = vector.extract_strided_slice %230 {offsets = [0, 0], sizes = [16, 64], strides = [1, 1]} : vector<64x64xf32> to vector<16x64xf32>
    %cst_103 = arith.constant dense<0.000000e+00> : vector<16x64xf32>
    %266 = tpu.matmul %264, %265, %cst_103 {dimension_numbers = #tpu.dot_dimension_numbers<[1], [0], [0], [1], [0, 0, 1, 1], [], []>} : vector<16x16xf32>, vector<16x64xf32>, vector<16x64xf32> -> vector<16x64xf32>
    %267 = vector.extract_strided_slice %233 {offsets = [0, 2], sizes = [16, 1], strides = [1, 1]} : vector<16x8xf32> to vector<16x1xf32>
    %268 = vector.extract_strided_slice %233 {offsets = [0, 3], sizes = [16, 1], strides = [1, 1]} : vector<16x8xf32> to vector<16x1xf32>
    %269 = tpu.transpose %268, [1, 0] : vector<16x1xf32> -> vector<1x16xf32>
    %270 = vector.broadcast %267 : vector<16x1xf32> to vector<16x16xf32>
    %271 = vector.broadcast %269 : vector<1x16xf32> to vector<16x16xf32>
    %272 = arith.addf %270, %271 : vector<16x16xf32>
    %cst_104 = arith.constant 0.000000e+00 : f32
    %273 = vector.broadcast %cst_104 : f32 to vector<16x16xf32>
    %274 = arith.cmpf ogt, %272, %273 : vector<16x16xf32>
    %cst_105 = arith.constant 2.000000e-01 : f32
    %275 = vector.broadcast %cst_105 : f32 to vector<16x16xf32>
    %276 = arith.mulf %275, %272 : vector<16x16xf32>
    %277 = arith.select %274, %272, %276 : vector<16x16xi1>, vector<16x16xf32>
    %278 = arith.addf %277, %1 : vector<16x16xf32>
    %cst_106 = arith.constant dense<0xFF800000> : vector<16xf32>
    %279 = vector.multi_reduction <maximumf>, %278, %cst_106 [1] : vector<16x16xf32> to vector<16xf32>
    %280 = vector.shape_cast %279 : vector<16xf32> to vector<16x1xf32>
    %281 = vector.broadcast %280 : vector<16x1xf32> to vector<16x16xf32>
    %282 = arith.subf %278, %281 : vector<16x16xf32>
    %283 = math.exp %282 : vector<16x16xf32>
    %cst_107 = arith.constant dense<0.000000e+00> : vector<16xf32>
    %284 = vector.multi_reduction <add>, %283, %cst_107 [1] : vector<16x16xf32> to vector<16xf32>
    %285 = vector.shape_cast %284 : vector<16xf32> to vector<16x1xf32>
    %286 = vector.broadcast %285 : vector<16x1xf32> to vector<16x16xf32>
    %287 = arith.divf %283, %286 : vector<16x16xf32>
    %288 = vector.extract_strided_slice %232 {offsets = [0, 16], sizes = [16, 16], strides = [1, 1]} : vector<16x64xf32> to vector<16x16xf32>
    %cst_108 = arith.constant dense<0.000000e+00> : vector<16x16xf32>
    %289 = tpu.matmul %287, %288, %cst_108 {dimension_numbers = #tpu.dot_dimension_numbers<[1], [0], [0], [1], [0, 0, 1, 1], [], []>} : vector<16x16xf32>, vector<16x16xf32>, vector<16x16xf32> -> vector<16x16xf32>
    %cst_109 = arith.constant 0.000000e+00 : f32
    %290 = vector.broadcast %cst_109 : f32 to vector<16x16xf32>
    %291 = arith.cmpf ogt, %289, %290 : vector<16x16xf32>
    %cst_110 = arith.constant 0.000000e+00 : f32
    %292 = vector.broadcast %cst_110 : f32 to vector<16x16xf32>
    %293 = arith.minimumf %289, %292 : vector<16x16xf32>
    %294 = math.exp %293 : vector<16x16xf32>
    %cst_111 = arith.constant 1.000000e+00 : f32
    %295 = vector.broadcast %cst_111 : f32 to vector<16x16xf32>
    %296 = arith.subf %294, %295 : vector<16x16xf32>
    %297 = arith.select %291, %289, %296 : vector<16x16xi1>, vector<16x16xf32>
    %298 = vector.extract_strided_slice %230 {offsets = [16, 0], sizes = [16, 64], strides = [1, 1]} : vector<64x64xf32> to vector<16x64xf32>
    %cst_112 = arith.constant dense<0.000000e+00> : vector<16x64xf32>
    %299 = tpu.matmul %297, %298, %cst_112 {dimension_numbers = #tpu.dot_dimension_numbers<[1], [0], [0], [1], [0, 0, 1, 1], [], []>} : vector<16x16xf32>, vector<16x64xf32>, vector<16x64xf32> -> vector<16x64xf32>
    %300 = arith.addf %266, %299 : vector<16x64xf32>
    %301 = vector.extract_strided_slice %233 {offsets = [0, 4], sizes = [16, 1], strides = [1, 1]} : vector<16x8xf32> to vector<16x1xf32>
    %302 = vector.extract_strided_slice %233 {offsets = [0, 5], sizes = [16, 1], strides = [1, 1]} : vector<16x8xf32> to vector<16x1xf32>
    %303 = tpu.transpose %302, [1, 0] : vector<16x1xf32> -> vector<1x16xf32>
    %304 = vector.broadcast %301 : vector<16x1xf32> to vector<16x16xf32>
    %305 = vector.broadcast %303 : vector<1x16xf32> to vector<16x16xf32>
    %306 = arith.addf %304, %305 : vector<16x16xf32>
    %cst_113 = arith.constant 0.000000e+00 : f32
    %307 = vector.broadcast %cst_113 : f32 to vector<16x16xf32>
    %308 = arith.cmpf ogt, %306, %307 : vector<16x16xf32>
    %cst_114 = arith.constant 2.000000e-01 : f32
    %309 = vector.broadcast %cst_114 : f32 to vector<16x16xf32>
    %310 = arith.mulf %309, %306 : vector<16x16xf32>
    %311 = arith.select %308, %306, %310 : vector<16x16xi1>, vector<16x16xf32>
    %312 = arith.addf %311, %1 : vector<16x16xf32>
    %cst_115 = arith.constant dense<0xFF800000> : vector<16xf32>
    %313 = vector.multi_reduction <maximumf>, %312, %cst_115 [1] : vector<16x16xf32> to vector<16xf32>
    %314 = vector.shape_cast %313 : vector<16xf32> to vector<16x1xf32>
    %315 = vector.broadcast %314 : vector<16x1xf32> to vector<16x16xf32>
    %316 = arith.subf %312, %315 : vector<16x16xf32>
    %317 = math.exp %316 : vector<16x16xf32>
    %cst_116 = arith.constant dense<0.000000e+00> : vector<16xf32>
    %318 = vector.multi_reduction <add>, %317, %cst_116 [1] : vector<16x16xf32> to vector<16xf32>
    %319 = vector.shape_cast %318 : vector<16xf32> to vector<16x1xf32>
    %320 = vector.broadcast %319 : vector<16x1xf32> to vector<16x16xf32>
    %321 = arith.divf %317, %320 : vector<16x16xf32>
    %322 = vector.extract_strided_slice %232 {offsets = [0, 32], sizes = [16, 16], strides = [1, 1]} : vector<16x64xf32> to vector<16x16xf32>
    %cst_117 = arith.constant dense<0.000000e+00> : vector<16x16xf32>
    %323 = tpu.matmul %321, %322, %cst_117 {dimension_numbers = #tpu.dot_dimension_numbers<[1], [0], [0], [1], [0, 0, 1, 1], [], []>} : vector<16x16xf32>, vector<16x16xf32>, vector<16x16xf32> -> vector<16x16xf32>
    %cst_118 = arith.constant 0.000000e+00 : f32
    %324 = vector.broadcast %cst_118 : f32 to vector<16x16xf32>
    %325 = arith.cmpf ogt, %323, %324 : vector<16x16xf32>
    %cst_119 = arith.constant 0.000000e+00 : f32
    %326 = vector.broadcast %cst_119 : f32 to vector<16x16xf32>
    %327 = arith.minimumf %323, %326 : vector<16x16xf32>
    %328 = math.exp %327 : vector<16x16xf32>
    %cst_120 = arith.constant 1.000000e+00 : f32
    %329 = vector.broadcast %cst_120 : f32 to vector<16x16xf32>
    %330 = arith.subf %328, %329 : vector<16x16xf32>
    %331 = arith.select %325, %323, %330 : vector<16x16xi1>, vector<16x16xf32>
    %332 = vector.extract_strided_slice %230 {offsets = [32, 0], sizes = [16, 64], strides = [1, 1]} : vector<64x64xf32> to vector<16x64xf32>
    %cst_121 = arith.constant dense<0.000000e+00> : vector<16x64xf32>
    %333 = tpu.matmul %331, %332, %cst_121 {dimension_numbers = #tpu.dot_dimension_numbers<[1], [0], [0], [1], [0, 0, 1, 1], [], []>} : vector<16x16xf32>, vector<16x64xf32>, vector<16x64xf32> -> vector<16x64xf32>
    %334 = arith.addf %300, %333 : vector<16x64xf32>
    %335 = vector.extract_strided_slice %233 {offsets = [0, 6], sizes = [16, 1], strides = [1, 1]} : vector<16x8xf32> to vector<16x1xf32>
    %336 = vector.extract_strided_slice %233 {offsets = [0, 7], sizes = [16, 1], strides = [1, 1]} : vector<16x8xf32> to vector<16x1xf32>
    %337 = tpu.transpose %336, [1, 0] : vector<16x1xf32> -> vector<1x16xf32>
    %338 = vector.broadcast %335 : vector<16x1xf32> to vector<16x16xf32>
    %339 = vector.broadcast %337 : vector<1x16xf32> to vector<16x16xf32>
    %340 = arith.addf %338, %339 : vector<16x16xf32>
    %cst_122 = arith.constant 0.000000e+00 : f32
    %341 = vector.broadcast %cst_122 : f32 to vector<16x16xf32>
    %342 = arith.cmpf ogt, %340, %341 : vector<16x16xf32>
    %cst_123 = arith.constant 2.000000e-01 : f32
    %343 = vector.broadcast %cst_123 : f32 to vector<16x16xf32>
    %344 = arith.mulf %343, %340 : vector<16x16xf32>
    %345 = arith.select %342, %340, %344 : vector<16x16xi1>, vector<16x16xf32>
    %346 = arith.addf %345, %1 : vector<16x16xf32>
    %cst_124 = arith.constant dense<0xFF800000> : vector<16xf32>
    %347 = vector.multi_reduction <maximumf>, %346, %cst_124 [1] : vector<16x16xf32> to vector<16xf32>
    %348 = vector.shape_cast %347 : vector<16xf32> to vector<16x1xf32>
    %349 = vector.broadcast %348 : vector<16x1xf32> to vector<16x16xf32>
    %350 = arith.subf %346, %349 : vector<16x16xf32>
    %351 = math.exp %350 : vector<16x16xf32>
    %cst_125 = arith.constant dense<0.000000e+00> : vector<16xf32>
    %352 = vector.multi_reduction <add>, %351, %cst_125 [1] : vector<16x16xf32> to vector<16xf32>
    %353 = vector.shape_cast %352 : vector<16xf32> to vector<16x1xf32>
    %354 = vector.broadcast %353 : vector<16x1xf32> to vector<16x16xf32>
    %355 = arith.divf %351, %354 : vector<16x16xf32>
    %356 = vector.extract_strided_slice %232 {offsets = [0, 48], sizes = [16, 16], strides = [1, 1]} : vector<16x64xf32> to vector<16x16xf32>
    %cst_126 = arith.constant dense<0.000000e+00> : vector<16x16xf32>
    %357 = tpu.matmul %355, %356, %cst_126 {dimension_numbers = #tpu.dot_dimension_numbers<[1], [0], [0], [1], [0, 0, 1, 1], [], []>} : vector<16x16xf32>, vector<16x16xf32>, vector<16x16xf32> -> vector<16x16xf32>
    %cst_127 = arith.constant 0.000000e+00 : f32
    %358 = vector.broadcast %cst_127 : f32 to vector<16x16xf32>
    %359 = arith.cmpf ogt, %357, %358 : vector<16x16xf32>
    %cst_128 = arith.constant 0.000000e+00 : f32
    %360 = vector.broadcast %cst_128 : f32 to vector<16x16xf32>
    %361 = arith.minimumf %357, %360 : vector<16x16xf32>
    %362 = math.exp %361 : vector<16x16xf32>
    %cst_129 = arith.constant 1.000000e+00 : f32
    %363 = vector.broadcast %cst_129 : f32 to vector<16x16xf32>
    %364 = arith.subf %362, %363 : vector<16x16xf32>
    %365 = arith.select %359, %357, %364 : vector<16x16xi1>, vector<16x16xf32>
    %366 = vector.extract_strided_slice %230 {offsets = [48, 0], sizes = [16, 64], strides = [1, 1]} : vector<64x64xf32> to vector<16x64xf32>
    %cst_130 = arith.constant dense<0.000000e+00> : vector<16x64xf32>
    %367 = tpu.matmul %365, %366, %cst_130 {dimension_numbers = #tpu.dot_dimension_numbers<[1], [0], [0], [1], [0, 0, 1, 1], [], []>} : vector<16x16xf32>, vector<16x64xf32>, vector<16x64xf32> -> vector<16x64xf32>
    %368 = arith.addf %334, %367 : vector<16x64xf32>
    %cst_131 = arith.constant dense<0.000000e+00> : vector<16x2xf32>
    %369 = tpu.matmul %368, %231, %cst_131 {dimension_numbers = #tpu.dot_dimension_numbers<[1], [0], [0], [1], [0, 0, 1, 1], [], []>} : vector<16x64xf32>, vector<64x2xf32>, vector<16x2xf32> -> vector<16x2xf32>
    %370 = vector.extract_strided_slice %369 {offsets = [0, 0], sizes = [16, 1], strides = [1, 1]} : vector<16x2xf32> to vector<16x1xf32>
    %371 = vector.extract_strided_slice %369 {offsets = [0, 1], sizes = [16, 1], strides = [1, 1]} : vector<16x2xf32> to vector<16x1xf32>
    %372 = tpu.transpose %371, [1, 0] : vector<16x1xf32> -> vector<1x16xf32>
    %373 = vector.broadcast %370 : vector<16x1xf32> to vector<16x16xf32>
    %374 = vector.broadcast %372 : vector<1x16xf32> to vector<16x16xf32>
    %375 = arith.addf %373, %374 : vector<16x16xf32>
    %cst_132 = arith.constant 0.000000e+00 : f32
    %376 = vector.broadcast %cst_132 : f32 to vector<16x16xf32>
    %377 = arith.cmpf ogt, %375, %376 : vector<16x16xf32>
    %cst_133 = arith.constant 2.000000e-01 : f32
    %378 = vector.broadcast %cst_133 : f32 to vector<16x16xf32>
    %379 = arith.mulf %378, %375 : vector<16x16xf32>
    %380 = arith.select %377, %375, %379 : vector<16x16xi1>, vector<16x16xf32>
    %381 = arith.addf %380, %1 : vector<16x16xf32>
    %cst_134 = arith.constant dense<0xFF800000> : vector<16xf32>
    %382 = vector.multi_reduction <maximumf>, %381, %cst_134 [1] : vector<16x16xf32> to vector<16xf32>
    %383 = vector.shape_cast %382 : vector<16xf32> to vector<16x1xf32>
    %384 = vector.broadcast %383 : vector<16x1xf32> to vector<16x16xf32>
    %385 = arith.subf %381, %384 : vector<16x16xf32>
    %386 = math.exp %385 : vector<16x16xf32>
    %cst_135 = arith.constant dense<0.000000e+00> : vector<16xf32>
    %387 = vector.multi_reduction <add>, %386, %cst_135 [1] : vector<16x16xf32> to vector<16xf32>
    %388 = vector.shape_cast %387 : vector<16xf32> to vector<16x1xf32>
    %389 = vector.broadcast %388 : vector<16x1xf32> to vector<16x16xf32>
    %390 = arith.divf %386, %389 : vector<16x16xf32>
    %cst_136 = arith.constant dense<0.000000e+00> : vector<16x64xf32>
    %391 = tpu.matmul %390, %368, %cst_136 {dimension_numbers = #tpu.dot_dimension_numbers<[1], [0], [0], [1], [0, 0, 1, 1], [], []>} : vector<16x16xf32>, vector<16x64xf32>, vector<16x64xf32> -> vector<16x64xf32>
    %cst_137 = arith.constant 0.000000e+00 : f32
    %392 = vector.broadcast %cst_137 : f32 to vector<16x64xf32>
    %393 = arith.cmpf ogt, %391, %392 : vector<16x64xf32>
    %cst_138 = arith.constant 0.000000e+00 : f32
    %394 = vector.broadcast %cst_138 : f32 to vector<16x64xf32>
    %395 = arith.minimumf %391, %394 : vector<16x64xf32>
    %396 = math.exp %395 : vector<16x64xf32>
    %cst_139 = arith.constant 1.000000e+00 : f32
    %397 = vector.broadcast %cst_139 : f32 to vector<16x64xf32>
    %398 = arith.subf %396, %397 : vector<16x64xf32>
    %399 = arith.select %393, %391, %398 : vector<16x64xi1>, vector<16x64xf32>
    %c0_140 = arith.constant 0 : index
    %c0_141 = arith.constant 0 : index
    %400 = vector.load %arg18[%c0_140, %c0_141] : memref<64x64xf32, #tpu.memory_space<vmem>>, vector<64x64xf32>
    %c0_142 = arith.constant 0 : index
    %c0_143 = arith.constant 0 : index
    %401 = vector.load %arg19[%c0_142, %c0_143] : memref<1x64xf32, #tpu.memory_space<vmem>>, vector<1x64xf32>
    %cst_144 = arith.constant dense<0.000000e+00> : vector<16x64xf32>
    %402 = tpu.matmul %399, %400, %cst_144 {dimension_numbers = #tpu.dot_dimension_numbers<[1], [0], [0], [1], [0, 0, 1, 1], [], []>} : vector<16x64xf32>, vector<64x64xf32>, vector<16x64xf32> -> vector<16x64xf32>
    %403 = vector.broadcast %401 : vector<1x64xf32> to vector<16x64xf32>
    %404 = arith.addf %402, %403 : vector<16x64xf32>
    %cst_145 = arith.constant 0.000000e+00 : f32
    %405 = vector.broadcast %cst_145 : f32 to vector<16x64xf32>
    %406 = arith.maximumf %404, %405 : vector<16x64xf32>
    %c0_146 = arith.constant 0 : index
    %c0_147 = arith.constant 0 : index
    %407 = vector.load %arg20[%c0_146, %c0_147] : memref<64x64xf32, #tpu.memory_space<vmem>>, vector<64x64xf32>
    %c0_148 = arith.constant 0 : index
    %c0_149 = arith.constant 0 : index
    %408 = vector.load %arg21[%c0_148, %c0_149] : memref<1x64xf32, #tpu.memory_space<vmem>>, vector<1x64xf32>
    %c0_150 = arith.constant 0 : index
    %c0_151 = arith.constant 0 : index
    %409 = vector.load %arg22[%c0_150, %c0_151] : memref<64x32xf32, #tpu.memory_space<vmem>>, vector<64x32xf32>
    %c0_152 = arith.constant 0 : index
    %c0_153 = arith.constant 0 : index
    %410 = vector.load %arg23[%c0_152, %c0_153] : memref<1x32xf32, #tpu.memory_space<vmem>>, vector<1x32xf32>
    %c0_154 = arith.constant 0 : index
    %c0_155 = arith.constant 0 : index
    %411 = vector.load %arg24[%c0_154, %c0_155] : memref<64x64xf32, #tpu.memory_space<vmem>>, vector<64x64xf32>
    %c0_156 = arith.constant 0 : index
    %c0_157 = arith.constant 0 : index
    %412 = vector.load %arg25[%c0_156, %c0_157] : memref<1x64xf32, #tpu.memory_space<vmem>>, vector<1x64xf32>
    %c0_158 = arith.constant 0 : index
    %c0_159 = arith.constant 0 : index
    %413 = vector.load %arg26[%c0_158, %c0_159] : memref<64x32xf32, #tpu.memory_space<vmem>>, vector<64x32xf32>
    %c0_160 = arith.constant 0 : index
    %c0_161 = arith.constant 0 : index
    %414 = vector.load %arg27[%c0_160, %c0_161] : memref<1x32xf32, #tpu.memory_space<vmem>>, vector<1x32xf32>
    %cst_162 = arith.constant dense<0.000000e+00> : vector<16x64xf32>
    %415 = tpu.matmul %406, %407, %cst_162 {dimension_numbers = #tpu.dot_dimension_numbers<[1], [0], [0], [1], [0, 0, 1, 1], [], []>} : vector<16x64xf32>, vector<64x64xf32>, vector<16x64xf32> -> vector<16x64xf32>
    %416 = vector.broadcast %408 : vector<1x64xf32> to vector<16x64xf32>
    %417 = arith.addf %415, %416 : vector<16x64xf32>
    %cst_163 = arith.constant 0.000000e+00 : f32
    %418 = vector.broadcast %cst_163 : f32 to vector<16x64xf32>
    %419 = arith.maximumf %417, %418 : vector<16x64xf32>
    %cst_164 = arith.constant dense<0.000000e+00> : vector<16x32xf32>
    %420 = tpu.matmul %419, %409, %cst_164 {dimension_numbers = #tpu.dot_dimension_numbers<[1], [0], [0], [1], [0, 0, 1, 1], [], []>} : vector<16x64xf32>, vector<64x32xf32>, vector<16x32xf32> -> vector<16x32xf32>
    %421 = vector.broadcast %410 : vector<1x32xf32> to vector<16x32xf32>
    %422 = arith.addf %420, %421 : vector<16x32xf32>
    %cst_165 = arith.constant 0.000000e+00 : f32
    %423 = vector.broadcast %cst_165 : f32 to vector<16x32xf32>
    %424 = arith.maximumf %422, %423 : vector<16x32xf32>
    %cst_166 = arith.constant dense<0.000000e+00> : vector<16x64xf32>
    %425 = tpu.matmul %406, %411, %cst_166 {dimension_numbers = #tpu.dot_dimension_numbers<[1], [0], [0], [1], [0, 0, 1, 1], [], []>} : vector<16x64xf32>, vector<64x64xf32>, vector<16x64xf32> -> vector<16x64xf32>
    %426 = vector.broadcast %412 : vector<1x64xf32> to vector<16x64xf32>
    %427 = arith.addf %425, %426 : vector<16x64xf32>
    %cst_167 = arith.constant 0.000000e+00 : f32
    %428 = vector.broadcast %cst_167 : f32 to vector<16x64xf32>
    %429 = arith.maximumf %427, %428 : vector<16x64xf32>
    %cst_168 = arith.constant dense<0.000000e+00> : vector<16x32xf32>
    %430 = tpu.matmul %429, %413, %cst_168 {dimension_numbers = #tpu.dot_dimension_numbers<[1], [0], [0], [1], [0, 0, 1, 1], [], []>} : vector<16x64xf32>, vector<64x32xf32>, vector<16x32xf32> -> vector<16x32xf32>
    %431 = vector.broadcast %414 : vector<1x32xf32> to vector<16x32xf32>
    %432 = arith.addf %430, %431 : vector<16x32xf32>
    %cst_169 = arith.constant 0.000000e+00 : f32
    %433 = vector.broadcast %cst_169 : f32 to vector<16x32xf32>
    %434 = arith.maximumf %432, %433 : vector<16x32xf32>
    %435 = arith.mulf %434, %424 : vector<16x32xf32>
    %c0_170 = arith.constant 0 : index
    %c0_171 = arith.constant 0 : index
    %c0_172 = arith.constant 0 : index
    %436 = vector.load %arg28[%c0_170, %c0_171, %c0_172] : memref<1x16x32xf32, #tpu.memory_space<vmem>>, vector<1x16x32xf32>
    %437 = vector.shape_cast %436 : vector<1x16x32xf32> to vector<16x32xf32>
    %438 = vector.shape_cast %435 : vector<16x32xf32> to vector<1x16x32xf32>
    tpu.vector_store %arg28[%c0_170, %c0_171, %c0_172], %438 {strides = array<i32>} : memref<1x16x32xf32, #tpu.memory_space<vmem>>, vector<1x16x32xf32>,
    return
  }
  func.func @transform_0(%arg0: i32) -> (i32, i32, i32) {
    %c0_i32 = arith.constant 0 : i32
    %c0_i32_0 = arith.constant 0 : i32
    %c0_i32_1 = arith.constant 0 : i32
    return %arg0, %c0_i32, %c0_i32_0 : i32, i32, i32
  }
  func.func @transform_1(%arg0: i32) -> (i32, i32, i32) {
    %c0_i32 = arith.constant 0 : i32
    %c0_i32_0 = arith.constant 0 : i32
    %c0_i32_1 = arith.constant 0 : i32
    return %arg0, %c0_i32, %c0_i32_0 : i32, i32, i32
  }
  func.func @transform_2(%arg0: i32) -> (i32, i32, i32) {
    %c0_i32 = arith.constant 0 : i32
    %c0_i32_0 = arith.constant 0 : i32
    %c0_i32_1 = arith.constant 0 : i32
    return %arg0, %c0_i32, %c0_i32_0 : i32, i32, i32
  }
  func.func @transform_3(%arg0: i32) -> (i32, i32) {
    %c0_i32 = arith.constant 0 : i32
    %c0_i32_0 = arith.constant 0 : i32
    %c0_i32_1 = arith.constant 0 : i32
    return %c0_i32, %c0_i32_0 : i32, i32
  }
  func.func @transform_4(%arg0: i32) -> (i32, i32) {
    %c0_i32 = arith.constant 0 : i32
    %c0_i32_0 = arith.constant 0 : i32
    %c0_i32_1 = arith.constant 0 : i32
    return %c0_i32, %c0_i32_0 : i32, i32
  }
  func.func @transform_5(%arg0: i32) -> (i32, i32) {
    %c0_i32 = arith.constant 0 : i32
    %c0_i32_0 = arith.constant 0 : i32
    %c0_i32_1 = arith.constant 0 : i32
    return %c0_i32, %c0_i32_0 : i32, i32
  }
  func.func @transform_6(%arg0: i32) -> (i32, i32) {
    %c0_i32 = arith.constant 0 : i32
    %c0_i32_0 = arith.constant 0 : i32
    %c0_i32_1 = arith.constant 0 : i32
    return %c0_i32, %c0_i32_0 : i32, i32
  }
  func.func @transform_7(%arg0: i32) -> (i32, i32) {
    %c0_i32 = arith.constant 0 : i32
    %c0_i32_0 = arith.constant 0 : i32
    %c0_i32_1 = arith.constant 0 : i32
    return %c0_i32, %c0_i32_0 : i32, i32
  }
  func.func @transform_8(%arg0: i32) -> (i32, i32) {
    %c0_i32 = arith.constant 0 : i32
    %c0_i32_0 = arith.constant 0 : i32
    %c0_i32_1 = arith.constant 0 : i32
    return %c0_i32, %c0_i32_0 : i32, i32
  }
  func.func @transform_9(%arg0: i32) -> (i32, i32) {
    %c0_i32 = arith.constant 0 : i32
    %c0_i32_0 = arith.constant 0 : i32
    %c0_i32_1 = arith.constant 0 : i32
    return %c0_i32, %c0_i32_0 : i32, i32
  }
  func.func @transform_10(%arg0: i32) -> (i32, i32) {
    %c0_i32 = arith.constant 0 : i32
    %c0_i32_0 = arith.constant 0 : i32
    %c0_i32_1 = arith.constant 0 : i32
    return %c0_i32, %c0_i32_0 : i32, i32
  }
  func.func @transform_11(%arg0: i32) -> (i32, i32) {
    %c0_i32 = arith.constant 0 : i32
    %c0_i32_0 = arith.constant 0 : i32
    %c0_i32_1 = arith.constant 0 : i32
    return %c0_i32, %c0_i32_0 : i32, i32
  }
  func.func @transform_12(%arg0: i32) -> (i32, i32) {
    %c0_i32 = arith.constant 0 : i32
    %c0_i32_0 = arith.constant 0 : i32
    %c0_i32_1 = arith.constant 0 : i32
    return %c0_i32, %c0_i32_0 : i32, i32
  }
  func.func @transform_13(%arg0: i32) -> (i32, i32) {
    %c0_i32 = arith.constant 0 : i32
    %c0_i32_0 = arith.constant 0 : i32
    %c0_i32_1 = arith.constant 0 : i32
    return %c0_i32, %c0_i32_0 : i32, i32
  }
  func.func @transform_14(%arg0: i32) -> (i32, i32) {
    %c0_i32 = arith.constant 0 : i32
    %c0_i32_0 = arith.constant 0 : i32
    %c0_i32_1 = arith.constant 0 : i32
    return %c0_i32, %c0_i32_0 : i32, i32
  }
  func.func @transform_15(%arg0: i32) -> (i32, i32) {
    %c0_i32 = arith.constant 0 : i32
    %c0_i32_0 = arith.constant 0 : i32
    %c0_i32_1 = arith.constant 0 : i32
    return %c0_i32, %c0_i32_0 : i32, i32
  }
  func.func @transform_16(%arg0: i32) -> (i32, i32) {
    %c0_i32 = arith.constant 0 : i32
    %c0_i32_0 = arith.constant 0 : i32
    %c0_i32_1 = arith.constant 0 : i32
    return %c0_i32, %c0_i32_0 : i32, i32
  }
  func.func @transform_17(%arg0: i32) -> (i32, i32) {
    %c0_i32 = arith.constant 0 : i32
    %c0_i32_0 = arith.constant 0 : i32
    %c0_i32_1 = arith.constant 0 : i32
    return %c0_i32, %c0_i32_0 : i32, i32
  }
  func.func @transform_18(%arg0: i32) -> (i32, i32) {
    %c0_i32 = arith.constant 0 : i32
    %c0_i32_0 = arith.constant 0 : i32
    %c0_i32_1 = arith.constant 0 : i32
    return %c0_i32, %c0_i32_0 : i32, i32
  }
  func.func @transform_19(%arg0: i32) -> (i32, i32) {
    %c0_i32 = arith.constant 0 : i32
    %c0_i32_0 = arith.constant 0 : i32
    %c0_i32_1 = arith.constant 0 : i32
    return %c0_i32, %c0_i32_0 : i32, i32
  }
  func.func @transform_20(%arg0: i32) -> (i32, i32) {
    %c0_i32 = arith.constant 0 : i32
    %c0_i32_0 = arith.constant 0 : i32
    %c0_i32_1 = arith.constant 0 : i32
    return %c0_i32, %c0_i32_0 : i32, i32
  }
  func.func @transform_21(%arg0: i32) -> (i32, i32) {
    %c0_i32 = arith.constant 0 : i32
    %c0_i32_0 = arith.constant 0 : i32
    %c0_i32_1 = arith.constant 0 : i32
    return %c0_i32, %c0_i32_0 : i32, i32
  }
  func.func @transform_22(%arg0: i32) -> (i32, i32) {
    %c0_i32 = arith.constant 0 : i32
    %c0_i32_0 = arith.constant 0 : i32
    %c0_i32_1 = arith.constant 0 : i32
    return %c0_i32, %c0_i32_0 : i32, i32
  }
  func.func @transform_23(%arg0: i32) -> (i32, i32) {
    %c0_i32 = arith.constant 0 : i32
    %c0_i32_0 = arith.constant 0 : i32
    %c0_i32_1 = arith.constant 0 : i32
    return %c0_i32, %c0_i32_0 : i32, i32
  }
  func.func @transform_24(%arg0: i32) -> (i32, i32) {
    %c0_i32 = arith.constant 0 : i32
    %c0_i32_0 = arith.constant 0 : i32
    %c0_i32_1 = arith.constant 0 : i32
    return %c0_i32, %c0_i32_0 : i32, i32
  }
  func.func @transform_25(%arg0: i32) -> (i32, i32) {
    %c0_i32 = arith.constant 0 : i32
    %c0_i32_0 = arith.constant 0 : i32
    %c0_i32_1 = arith.constant 0 : i32
    return %c0_i32, %c0_i32_0 : i32, i32
  }
  func.func @transform_26(%arg0: i32) -> (i32, i32) {
    %c0_i32 = arith.constant 0 : i32
    %c0_i32_0 = arith.constant 0 : i32
    %c0_i32_1 = arith.constant 0 : i32
    return %c0_i32, %c0_i32_0 : i32, i32
  }
  func.func @transform_27(%arg0: i32) -> (i32, i32, i32) {
    %c0_i32 = arith.constant 0 : i32
    %c0_i32_0 = arith.constant 0 : i32
    %c0_i32_1 = arith.constant 0 : i32
    return %arg0, %c0_i32, %c0_i32_0 : i32, i32, i32
  }
}

</mosaic_0001>

<bundles_post_ra>
// kernel: tpu_custom_call.1
= control target key start
LH: loop header
LB: loop body
LE: loop exit
PB: predicated region body
PF: predicated region fallthrough
CT: control target
= control target key end

     0   :  { %s5031_s0 = inlined_call_operand.vmem [shape: f32[3,16,2], index: 0, kind: input, shape index: {}]   ;;  %s5032_s1 = inlined_call_operand.vmem [shape: f32[3,16,32], index: 1, kind: input, shape index: {}]   ;;  %s5033_s2 = inlined_call_operand.hbm [shape: f32[3,16,16], index: 2, kind: input, shape index: {}]   ;;  %s5034_s3 = inlined_call_operand.vmem [shape: f32[2,32], index: 3, kind: input, shape index: {}]   ;;  %s5035_s4 = inlined_call_operand.vmem [shape: f32[1,32], index: 4, kind: input, shape index: {}]   ;;  %s5036_s5 = inlined_call_operand.vmem [shape: f32[1,32], index: 5, kind: input, shape index: {}]   ;;  %s5037_s6 = inlined_call_operand.vmem [shape: f32[1,32], index: 6, kind: input, shape index: {}]   ;;  %s5038_s7 = inlined_call_operand.hbm [shape: f32[32,32], index: 7, kind: input, shape index: {}]   ;;  %s5039_s8 = inlined_call_operand.vmem [shape: f32[1,32], index: 8, kind: input, shape index: {}]   ;;  %s5040_s9 = inlined_call_operand.vmem [shape: f32[64,64], index: 9, kind: input, shape index: {}]   ;;  %s5041_s10 = inlined_call_operand.vmem [shape: f32[64,8], index: 10, kind: input, shape index: {}]   ;;  %s5042_s11 = inlined_call_operand.vmem [shape: f32[64,64], index: 11, kind: input, shape index: {}]   ;;  %s5043_s12 = inlined_call_operand.vmem [shape: f32[64,2], index: 12, kind: input, shape index: {}]   ;;  %s5044_s13 = inlined_call_operand.vmem [shape: f32[64,64], index: 13, kind: input, shape index: {}]   ;;  %s5045_s14 = inlined_call_operand.vmem [shape: f32[64,8], index: 14, kind: input, shape index: {}]   ;;  %s5046_s15 = inlined_call_operand.vmem [shape: f32[64,64], index: 15, kind: input, shape index: {}]   ;;  %s5047_s16 = inlined_call_operand.vmem [shape: f32[64,2], index: 16, kind: input, shape index: {}]   ;;  %s5048_s17 = inlined_call_operand.vmem [shape: f32[64,64], index: 17, kind: input, shape index: {}]   ;;  %s5049_s18 = inlined_call_operand.vmem [shape: f32[1,64], index: 18, kind: input, shape index: {}]   ;;  %s5050_s19 = inlined_call_operand.vmem [shape: f32[64,64], index: 19, kind: input, shape index: {}]   ;;  %s5051_s20 = inlined_call_operand.vmem [shape: f32[1,64], index: 20, kind: input, shape index: {}]   ;;  %s5052_s21 = inlined_call_operand.vmem [shape: f32[64,32], index: 21, kind: input, shape index: {}]   ;;  %s5053_s22 = inlined_call_operand.vmem [shape: f32[1,32], index: 22, kind: input, shape index: {}]   ;;  %s5054_s23 = inlined_call_operand.hbm [shape: f32[64,64], index: 23, kind: input, shape index: {}]   ;;  %s5055_s24 = inlined_call_operand.vmem [shape: f32[1,64], index: 24, kind: input, shape index: {}]   ;;  %s5056_s25 = inlined_call_operand.vmem [shape: f32[64,32], index: 25, kind: input, shape index: {}]   ;;  %s5057_s26 = inlined_call_operand.vmem [shape: f32[1,32], index: 26, kind: input, shape index: {}]   ;;  %s5058_s27 = inlined_call_operand.hbm [shape: f32[3,16,32], index: 27, kind: output, shape index: {}]  }
   0x1   :  { %5085 = sst [smem:[#allocation17_spill]] %s5031_s0 }
   0x2   :  { %5086 = sst [smem:[#allocation18_spill]] %s5032_s1 }
   0x3   :  { %5087 = sst [smem:[#allocation19_spill]] %s5033_s2 }
   0x4   :  { %5088 = sst [smem:[#allocation20_spill]] %s5034_s3 }
   0x5   :  { %5089 = sst [smem:[#allocation21_spill]] %s5035_s4 }
   0x6   :  { %5090 = sst [smem:[#allocation22_spill]] %s5036_s5 }
   0x7   :  { %5091 = sst [smem:[#allocation23_spill]] %s5037_s6 }
   0x8   :  { %5092 = sst [smem:[#allocation24_spill]] %s5038_s7 }
   0x9   :  { %5093 = sst [smem:[#allocation25_spill]] %s5039_s8 }
   0xa   :  { %5094 = sst [smem:[#allocation26_spill]] %s5040_s9 }
   0xb   :  { %5095 = sst [smem:[#allocation27_spill]] %s5041_s10 }
   0xc   :  { %5096 = sst [smem:[#allocation28_spill]] %s5042_s11 }
   0xd   :  { %5097 = sst [smem:[#allocation29_spill]] %s5053_s22 }
   0xe   :  { %5098 = sst [smem:[#allocation30_spill]] %s5054_s23 }
   0xf   :  { %5099 = sst [smem:[#allocation31_spill]] %s5055_s24 }
  0x10   :  { %5100 = sst [smem:[#allocation32_spill]] %s5057_s26 }
  0x11   :  { %5101 = sst [smem:[#allocation33_spill]] %s5058_s27 }
  0x12   :  { %32 = vsyncpa [#allocation3], 0 }
  0x13   :  { %34 = vsyncpa [#allocation3 + $0x1], 0 }
  0x14   :  { %35 = vsyncpa [#allocation6], 0 }
  0x15   :  { %36 = vsyncpa [#allocation4], 0 }
  0x16   :  { %38 = vsyncpa [#allocation4 + $0x1], 0  ;;  %s4180_s7 = smov 0   ;;  %s4182_s4 = smov 0  }
  0x17   :  { %s4184_s8 = smov 0   ;;  %s4186_s30 = smov 0  }
  0x18 LB: > { %5102 = sst [smem:[#allocation12_spill]] %s4008_s7  ;;  %s4201_s9 = sadd.s32 4294967295, %s4020_s30   ;;  %s4020_s30 = sphi %s4186_s30, %s5143_s30   ;;  %s4016_s8 = sphi %s4184_s8, %s5145_s8   ;;  %s4012_s4 = sphi %s4182_s4, %s5147_s4   ;;  %s4008_s7 = sphi %s4180_s7, %s5146_s7  }
  0x19   : > { %5103 = sst [smem:[#allocation13_spill]] %s4016_s8  ;;  %s3475_s5 = sadd.s32 4294967294, %s4020_s30  }
  0x1a   : > { %p116_p0 = scmp.ne.s32.totalorder %s4012_s4, %s4008_s7  ;;  %p117_p1 = scmp.eq.s32.totalorder %s4201_s9, 0 }
  0x1b   : > { %p644_p2 = scmp.eq.s32.totalorder %s4201_s9, 2  ;;  %p650_p3 = scmp.eq.s32.totalorder %s3475_s5, 2 }
  0x1c   : > { %p4210_p4 = por %p117_p1, %p116_p0  ;;  %p3476_p5 = scmp.ge.s32.totalorder %s4020_s30, 1 }
  0x1d   : > { %p4215_p6 = por %p650_p3, %p116_p0  ;;  %p657_p7 = scmp.lt.s32.totalorder %s4020_s30, 4 }
  0x1e   : > { %s5107_s1 = sld [smem:[#allocation24_spill]]  ;;  %s4022_s2 = smov [#allocation5]  }
  0x1f   : > { %s5105_s0 = scalar_select %p4215_p6, 1, 0 }
  0x20   : > { %p4223_p8 = pnand %p3476_p5, %p657_p7  ;;  %s682_s3 = sshll.u32 %s4022_s2, 4  ;;  %s683_s3 = int_to_ptr.vmem [resolvable:$true] %s682_s3 }
  0x21   : > { %5106 = sst [smem:[#allocation14_spill]] %s5105_s0  ;;  %s5067_s0 = smov 8  }
  0x22   : > { %p3598_p9 = pneg %p4223_p8  ;;  %s5109_s23 = sld [smem:[#allocation30_spill]] }
  0x23   : > { %s4025_s2 = smov [#allocation7]   ;;  %s4241_s5 = sadd.s32 1, %s4020_s30  }
  0x24   : > { %s680_s6 = sshll.u32 %s5107_s1, 4  ;;  %p3599_p10 = pnand %p3598_p9, %p117_p1  ;;  %s681_s6 = int_to_ptr.hbm [resolvable:$true] %s680_s6 }
  0x25   : > { %s5066_s1 = smov 128   ;;  %s741_s7 = sshll.u32 %s4025_s2, 4  ;;  %s742_s7 = int_to_ptr.vmem [resolvable:$true] %s741_s7 }
  0x26   : > { %3601 = dma.hbm_to_vmem [thread:$0]  (!%p3599_p10), %s681_s6, 512, %s683_s3, [#allocation6], %s5066_s1, %s5066_s1, %s5067_s0  }
  0x27   : > { %5110 = sst [smem:[#allocation15_spill]] %s4241_s5  ;;  %s103_s10 = sadd.s32 1, %s4016_s8 }
  0x28   : > { %s739_s29 = sshll.u32 %s5109_s23, 4  ;;  %s100_s23 = ssub.s32 %s4020_s30, %s4241_s5  ;;  %s740_s29 = int_to_ptr.hbm [resolvable:$true] %s739_s29 }
  0x29   : > { %3604 = dma.hbm_to_vmem [thread:$0]  (!%p3599_p10), %s740_s29, 1024, %s742_s7, [#allocation6], %s5066_s1, %s5066_s1, %s5067_s0  }
  0x2a   : > { %p110_p11 = scmp.ne.s32.totalorder %s4016_s8, %s4012_s4  ;;  %p101_p12 = scmp.eq.s32.totalorder %s100_s23, 0 }
  0x2b   : > { %p111_p13 = scmp.eq.s32.totalorder %s4020_s30, 0  ;;  %p3615_p3 = scmp.lt.s32.totalorder %s4020_s30, 3 }
  0x2c   : > { %p4251_p0 = por %p644_p2, %p110_p11  ;;  %s780_s3 = sand.u32 1, %s4016_s8  }
  0x2d   : > { %s4257_s6 = scalar_select %p101_p12, %s4016_s8, %s103_s10  }
  0x2e   : > { %p112_p5 = por %p111_p13, %p110_p11  ;;  %s3480_s2 = sshll.u32 %s780_s3, 4 }
  0x2f   : > { %5112 = sst [smem:[#allocation16_spill]] %s4257_s6  ;;  %s3582_s7 = sshll.u32 %s4020_s30, 4 }
  0x30   : > { %s5113_s0 = sld [smem:[#allocation19_spill]]  ;;  %s784_s5 = scalar_lea.vmem [#allocation2], %s3480_s2 }
  0x31   : > { %s792_s22 = sshll.u32 %s784_s5, 4  ;;  %p4264_p2 = pnand %p3615_p3, %p112_p5  ;;  %s793_s22 = int_to_ptr.vmem [resolvable:$true] %s792_s22 }
  0x32   : > { %s781_s10 = scalar_lea.sflag [#allocation3], %s780_s3 }
  0x33   : > { %p3924_p9 = pneg %p4264_p2 }
  0x36   : > { %s789_s26 = scalar_lea.hbm %s5113_s0, %s3582_s7 }
  0x37   : > { %s790_s23 = sshll.u32 %s789_s26, 4  ;;  %s3927_s26 = scalar_lea.hbm %s5113_s0, 48  ;;  %s791_s23 = int_to_ptr.hbm [resolvable:$true] %s790_s23 }
  0x38   : > { %s3920_s6 = sshra.s32 %s791_s23, 4  ;;  %s3921_s6 = int_to_ptr.hbm [resolvable:$true] %s3920_s6 }
  0x39   : > { %s3922_s8 = scalar_lea.hbm %s3921_s6, 16  ;;  %p3928_p12 = scmp.lt.s32.totalorder %s3921_s6, %s5113_s0 }
  0x3a   : > { %p3923_p7 = scmp.ne.s32.totalorder %s3921_s6, %s3922_s8  ;;  %p3929_p13 = scmp.lt.s32.totalorder %s3927_s26, %s3922_s8 }
  0x3c   : > { %p3925_p10 = pnand %p3924_p9, %p3923_p7  ;;  %p3930_p3 = por %p3929_p13, %p3928_p12 }
  0x3e   : > { %p3926_p11 = pneg %p3925_p10 }
  0x40   : > { %p3931_p5 = pnand %p3930_p3, %p3926_p11 }
  0x42   : > { %3934 = shalt.err (!%p3931_p5)
}
  0x43   : > { %s5115_s3 = smov 8   ;;  %s5116_s29 = smov 128  }
  0x44   : > { %3608 = dma.hbm_to_vmem [thread:$0]  (!%p4264_p2), %s791_s23, 256, %s793_s22, %s781_s10, %s5116_s29, %s5116_s29, %s5115_s3  }
  0x45   : > { %804 = sbr.rel (%p4223_p8) target bundleno = 5586 (0x15d2), region = 128  ;;  %s4284_s1 = sand.u32 (!%p4223_p8), 1, %s4012_s4  }
  0x46   : > { %s5071_s8 = sshll.u32 (!%p4223_p8), %s4284_s1, 4  ;;  %s807_s6 = scalar_lea.sflag (!%p4223_p8), [#allocation3], %s4284_s1 }
  0x47   : > { %s4290_s2 = scalar_lea.vmem (!%p4223_p8), [#allocation2], %s5071_s8 }
  0x4a   : > { %3995 = dma.done.wait (%p4210_p4), %s807_s6, 256  }
  0x4b   : > { %3997 = vsyncadd (%p4210_p4), %s807_s6, 4294967040 }
  0x4c   : > { %3999 = dma.done.wait (%p117_p1), [#allocation6], 1536  }
  0x4d   : > { %4001 = vsyncadd (%p117_p1), [#allocation6], 4294965760  ;;  %p902_p8 = scmp.lt.s32.totalorder %s4201_s9, 2  ;;  %vm930_vm0 = vcmask 1041408   ;;  %s5117_s28 = sld [smem:[#allocation17_spill]]  ;;  %vm923_vm1 = vcmask 15360  }
  0x4e   : > { %s5118_s7 = sld [smem:[#allocation20_spill]]  ;;  %v4026_v3 = vmov 16.0   ;;  %vm959_vm2 = vcmask 261120   ;;  %v1019_v34 = vld [vmem:[#allocation5 + $0x18] sm:$0xff]  ;;  %v1018_v35 = vld [vmem:[#allocation5 + $0x10] sm:$0xff]  ;;  %v1017_v37 = vld [vmem:[#allocation5 + $0x8] sm:$0xff] }
  0x4f   : > { %s4302_s22 = scalar_select %p902_p8, %s4201_s9, 2  ;;  %3726 = vrcp.f32 %v4026_v3  ;;  %1042 = vmatpush.msra.mxu1 %v1019_v34  ;;  %v1016_v39 = vld [vmem:[#allocation5] sm:$0xff] }
  0x50   : > { %s5119_s6 = sld [smem:[#allocation21_spill]]  ;;  %s5078_s26 = smov 125  }
  0x51   : > { %s3583_s24 = sshll.u32 %s4302_s22, 4  ;;  %1043 = vmatpush.msra.mxu1 %v1018_v35  ;;  %s5121_s5 = sld [smem:[#allocation23_spill]] }
  0x52   : > { %s5122_s29 = sld [smem:[#allocation25_spill]]  ;;  %s5076_s8 = smov 123  }
  0x53   : > { %s906_s10 = scalar_lea.vmem %s5117_s28, %s3583_s24  ;;  %1044 = vmatpush.msra.mxu1 %v1017_v37  ;;  %s5120_s28 = sld [smem:[#allocation22_spill]] }
  0x54   : > { %v918_v0 = vld [vmem:[%s5118_s7] sm:$0x3]  ;;  %v917_v2 = vld [vmem:[%s906_s10 + $0x8] sm:$0xff]  ;;  %s5123_s23 = sld [smem:[#allocation26_spill]]  ;;  %s5074_s7 = smov 121  }
  0x55   : > { %v916_v1 = vld [vmem:[%s906_s10] sm:$0xff]  ;;  %3492 = vmatpush.msk.msra.mxu0 %vm930_vm0, %v918_v0  ;;  %v3727_v6 = vpop.eup %3726  ;;  %1045 = vmatpush.msra.mxu1 %v1016_v39  ;;  %s5124_s3 = sld [smem:[#allocation18_spill]]  ;;  %s5072_s10 = smov 80  }
  0x56   : > { %3493 = vmatmul.msk.f32.vlgmr.msra.gmra.mxu0 %vm923_vm1, %v916_v1  ;;  %v3717_v5 = vld [vmem:[%s5119_s6] ss:$0 sm:$0xff]  ;;  %v970_v8 = vmul.f32 16.0, %v3727_v6  ;;  %vm974_vm3 = vweird.f32 %v3727_v6  ;;  %s5125_s11 = sld [smem:[#allocation27_spill]]  ;;  %s5132_s22 = smov 96  }
  0x57   : > { %v3719_v53 = vld [vmem:[%s5121_s5] ss:$0 sm:$0xff]  ;;  %s5081_s5 = smov 127   ;;  %s5126_s6 = sld [smem:[#allocation28_spill]] }
  0x58   : > { %v971_v13 = vsub.f32 1.0, %v970_v8  ;;  %v3720_v61 = vld [vmem:[%s5122_s29] ss:$0 sm:$0xff] }
  0x59   : > { %v3718_v50 = vld [vmem:[%s5120_s28] ss:$0 sm:$0xff]  ;;  %s5128_s28 = smov 112  }
  0x5a   : > { %v972_v16 = vmul.f32 %v3727_v6, %v971_v13  ;;  %v1120_v8 = vld [vmem:[%s5123_s23 + $0x18] sm:$0xff]  ;;  %v1121_v13 = vld [vmem:[%s5123_s23 + $0x20] sm:$0xff] }
  0x5b   : > { %1196 = vmatpush.msra.mxu3 %v1120_v8  ;;  %s911_s29 = scalar_lea.vmem %s5124_s3, %s3583_s24  ;;  %s5080_s3 = smov 112  }
  0x5c   : > { %v973_v19 = vadd.f32 %v3727_v6, %v972_v16  ;;  %v1130_v34 = vld [vmem:[%s5125_s11 + $0x28] sm:$0xff]  ;;  %v1129_v37 = vld [vmem:[%s5125_s11 + $0x20] sm:$0xff]  ;;  %v1128_v39 = vld [vmem:[%s5125_s11 + $0x18] sm:$0xff] }
  0x5e   : > { %3494 = vmatmul.msk.f32.gmra.mxu0 %vm923_vm1, %v917_v2  ;;  %v975_v22 = vsel %vm974_vm3, %v3727_v6, %v973_v19  ;;  %v914_v19 = vld [vmem:[%s911_s29] sm:$0xff] }
  0xd3   : > { %v951_v4 = vpop.f32.mrf.mxu0 }
  0xd4   : > { %v952_v7 = vadd.f32 %v3717_v5, %v951_v4 }
  0xd6   : > { %v960_v11 = vsel %vm959_vm2, %v952_v7, 0.0 }
  0xdb   : > { %v954_v9 = vpop.f32.mrf.mxu0 }
  0xdc   : > { %v955_v10 = vadd.f32 %v3717_v5, %v954_v9  ;;  %v1123_v9 = vld [vmem:[%s5123_s23 + $0x30] sm:$0xff] }
  0xde   : > { %v961_v12 = vsel %vm959_vm2, %v955_v10, 0.0 }
  0xdf   : > { %v962_v14 = vadd.f32 %v961_v12, %v960_v11  ;;  %v1122_v11 = vld [vmem:[%s5123_s23 + $0x28] sm:$0xff] }
  0xe0   : > { %v1118_v12 = vld [vmem:[%s5123_s23 + $0x8] sm:$0xff] }
  0xe1   : > { %v963_v15 = vrot.slane %v962_v14, 4 }
  0xe3   : > { %v964_v17 = vadd.f32 %v963_v15, %v962_v14  ;;  %v1117_v14 = vld [vmem:[%s5123_s23] sm:$0xff] }
  0xe5   : > { %v965_v18 = vrot.slane %v964_v17, 2 }
  0xe7   : > { %v966_v20 = vadd.f32 %v965_v18, %v964_v17 }
  0xe9   : > { %v967_v21 = vrot.slane %v966_v20, 1 }
  0xeb   : > { %v968_v23 = vadd.f32 %v967_v21, %v966_v20 }
  0xed   : > { %v976_v24 = vmul.f32 %v975_v22, %v968_v23 }
  0xef   : > { %v977_v25 = vsub.f32 %v952_v7, %v976_v24  ;;  %v978_v26 = vsub.f32 %v955_v10, %v976_v24  ;;  %v1124_v7 = vld [vmem:[%s5123_s23 + $0x38] sm:$0xff]  ;;  %v1119_v10 = vld [vmem:[%s5123_s23 + $0x10] sm:$0xff] }
  0xf0   : > { %1167 = vmatpush.msra.mxu2 %v1124_v7  ;;  %1197 = vmatpush.msra.mxu3 %v1119_v10  ;;  %v4027_v7 = vmov 2  }
  0xf1   : > { %v979_v27 = vmul.f32 %v977_v25, %v977_v25  ;;  %v980_v28 = vmul.f32 %v978_v26, %v978_v26  ;;  %3670 = vset.pattern.permute.xlu2 %v4027_v7 }
  0xf2   : > { %1168 = vmatpush.msra.mxu2 %v1123_v9  ;;  %1198 = vmatpush.msra.mxu3 %v1118_v12 }
  0xf3   : > { %v981_v29 = vsel %vm959_vm2, %v979_v27, 0.0  ;;  %v982_v30 = vsel %vm959_vm2, %v980_v28, 0.0  ;;  %v915_v28 = vld [vmem:[%s911_s29 + $0x8] sm:$0xff]  ;;  %s5073_s29 = smov 96  }
  0xf4   : > { %v983_v31 = vadd.f32 %v982_v30, %v981_v29  ;;  %1169 = vmatpush.msra.mxu2 %v1122_v11  ;;  %1199 = vmatpush.msra.mxu3 %v1117_v14  ;;  %v1132_v29 = vld [vmem:[%s5125_s11 + $0x38] sm:$0xff]  ;;  %v1131_v30 = vld [vmem:[%s5125_s11 + $0x30] sm:$0xff]  ;;  %v4028_v14 = vmov 0  }
  0xf5   : > { %3499 = vmatmul.msk.f32.vlgmr.msra.gmra.mxu3 %vm959_vm2, %v914_v19  ;;  %1222 = vmatpush.msrb.mxu0 %v1132_v29 }
  0xf6   : > { %v984_v32 = vrot.slane %v983_v31, 4  ;;  %1170 = vmatpush.msra.mxu2 %v1121_v13  ;;  %3676 = vset.pattern.permute.xlu1 %v4028_v14 }
  0xf7   : > { %1223 = vmatpush.msrb.mxu0 %v1131_v30 }
  0xf8   : > { %v985_v33 = vadd.f32 %v984_v32, %v983_v31 }
  0xf9   : > { %1224 = vmatpush.msrb.mxu0 %v1130_v34 }
  0xfa   : > { %v986_v36 = vrot.slane %v985_v33, 2 }
  0xfb   : > { %1225 = vmatpush.msrb.mxu0 %v1129_v37  ;;  %v4429_v37 = vld [vmem:[%s4290_s2] sm:$0xff] }
  0xfc   : > { %v987_v38 = vadd.f32 %v986_v36, %v985_v33 }
  0xfd   : > { %3500 = vmatmul.msk.f32.gmra.mxu3 %vm959_vm2, %v915_v28  ;;  %1226 = vmatpush.msrb.mxu0 %v1128_v39 }
  0xfe   : > { %v988_v40 = vrot.slane %v987_v38, 1 }
 0x100   : > { %v989_v41 = vadd.f32 %v988_v40, %v987_v38 }
 0x102   : > { %v990_v42 = vmul.f32 %v989_v41, %v975_v22 }
 0x104   : > { %v991_v43 = vadd.f32 1e-05, %v990_v42  ;;  %v1127_v42 = vld [vmem:[%s5125_s11 + $0x10] sm:$0xff] }
 0x105   : > { %1227 = vmatpush.msrb.mxu0 %v1127_v42 }
 0x106   : > { %3728 = vrsqrt.f32 %v991_v43  ;;  %vm998_vm5 = vweird.f32 %v991_v43 }
 0x10c   : > { %v3729_v44 = vpop.eup %3728 }
 0x10d   : > { %v993_v45 = vmul.f32 %v3729_v44, %v991_v43  ;;  %vm999_vm4 = vweird.f32 %v3729_v44 }
 0x10e   : > { %vm1000_vm6 = vmor %vm998_vm5, %vm999_vm4  ;;  %vm1207_vm4 = vcmask 523264  }
 0x10f   : > { %v994_v46 = vmul.f32 %v3729_v44, %v993_v45 }
 0x111   : > { %v995_v47 = vmul.f32 0.5, %v994_v46 }
 0x113   : > { %v996_v48 = vsub.f32 1.5, %v995_v47 }
 0x115   : > { %v997_v49 = vmul.f32 %v3729_v44, %v996_v48 }
 0x117   : > { %v1001_v51 = vsel %vm1000_vm6, %v3729_v44, %v997_v49  ;;  %vm1296_vm6 = vcmask 130048  }
 0x118   : > { %v1002_v52 = vmul.f32 %v1001_v51, %v977_v25  ;;  %v1003_v54 = vmul.f32 %v1001_v51, %v978_v26 }
 0x11a   : > { %v1007_v55 = vmul.f32 %v3718_v50, %v1002_v52  ;;  %v1008_v58 = vmul.f32 %v3718_v50, %v1003_v54 }
 0x11c   : > { %v1012_v56 = vadd.f32 %v3719_v53, %v1007_v55  ;;  %v1013_v59 = vadd.f32 %v3719_v53, %v1008_v58 }
 0x11e   : > { %v1014_v57 = vmax.f32 %v1012_v56, 0.0  ;;  %v1015_v60 = vmax.f32 %v1013_v59, 0.0 }
 0x120   : > { %3495 = vmatmul.msk.f32.vlgmr.msra.gmra.mxu1 %vm959_vm2, %v1014_v57 }
 0x128   : > { %3496 = vmatmul.msk.f32.gmra.mxu1 %vm959_vm2, %v1015_v60 }
 0x178   : > { %v1201_v8 = vpop.f32.mrf.mxu3 }
 0x19d   : > { %v1047_v62 = vpop.f32.mrf.mxu1 }
 0x19e   : > { %v4331_v63 = vadd.f32 %v3720_v61, %v1047_v62 }
 0x1a0   : > { %v1053_v0 = vmul.f32 %v4331_v63, %v4331_v63 }
 0x1a2   : > { %v1055_v1 = vsel %vm959_vm2, %v1053_v0, 0.0 }
 0x1a3   : > { %1056 = vadd.xlane.f32.xlu0 %v1055_v1 }
 0x1a5   : > { %v1050_v2 = vpop.f32.mrf.mxu1 }
 0x1a6   : > { %v4336_v3 = vadd.f32 %v3720_v61, %v1050_v2 }
 0x1a8   : > { %v1054_v4 = vmul.f32 %v4336_v3, %v4336_v3 }
 0x1aa   : > { %v1058_v5 = vsel %vm959_vm2, %v1054_v4, 0.0 }
 0x1ab   : > { %1059 = vadd.xlane.f32.xlu0 %v1058_v5 }
 0x216   : > { %v1057_v6 = vpop.xlane.xlu0 %1056 }
 0x217   : > { %3730 = vrsqrt.f32 %v1057_v6  ;;  %vm1068_vm7 = vcmp.eq.f32.partialorder %v1057_v6, inf  ;;  %v1071_v27 = vand.u32 2147483648, %v1057_v6  ;;  %vm1070_vm8 = vcmp.eq.f32.partialorder %v1057_v6, 0.0 }
 0x21d   : > { %v3731_v15 = vpop.eup %3730 }
 0x21e   : > { %v1062_v16 = vmul.f32 %v3731_v15, %v1057_v6  ;;  %v1060_v17 = vpop.xlane.xlu0 %1059 }
 0x21f   : > { %3732 = vrsqrt.f32 %v1060_v17  ;;  %vm1080_vm9 = vcmp.eq.f32.partialorder %v1060_v17, inf  ;;  %v1083_v41 = vand.u32 2147483648, %v1060_v17  ;;  %vm1082_vm10 = vcmp.eq.f32.partialorder %v1060_v17, 0.0 }
 0x220   : > { %v1063_v18 = vmul.f32 %v3731_v15, %v1062_v16 }
 0x222   : > { %v1064_v20 = vmul.f32 0.5, %v1063_v18  ;;  %v4034_v18 = vmov 6  }
 0x224   : > { %v1065_v21 = vsub.f32 1.5, %v1064_v20 }
 0x225   : > { %v3733_v22 = vpop.eup %3732 }
 0x226   : > { %v1066_v23 = vmul.f32 %v3731_v15, %v1065_v21  ;;  %v1074_v24 = vmul.f32 %v3733_v22, %v1060_v17 }
 0x228   : > { %v1067_v25 = vmul.f32 %v1066_v23, %v1057_v6  ;;  %v1075_v26 = vmul.f32 %v3733_v22, %v1074_v24 }
 0x22a   : > { %v1069_v31 = vsel %vm1068_vm7, %v1057_v6, %v1067_v25  ;;  %v1076_v32 = vmul.f32 0.5, %v1075_v26  ;;  %v1125_v6 = vld [vmem:[%s5125_s11] sm:$0xff] }
 0x22b   : > { %v1072_v33 = vsel %vm1070_vm8, %v1071_v27, %v1069_v31 }
 0x22c   : > { %v1085_v35 = vmax.f32 %v1072_v33, 1e-12  ;;  %v1077_v36 = vsub.f32 1.5, %v1076_v32 }
 0x22e   : > { %3734 = vrcp.f32 %v1085_v35  ;;  %v1078_v38 = vmul.f32 %v3733_v22, %v1077_v36  ;;  %v1098_v49 = vand.u32 2147483648, %v1085_v35  ;;  %v1096_v51 = vand.u32 2147483647, %v1085_v35 }
 0x22f   : > { %vm1092_vm12 = vweird.f32 %v1085_v35 }
 0x230   : > { %v1079_v40 = vmul.f32 %v1078_v38, %v1060_v17  ;;  %v1099_v54 = vor.u32 1.1754944e-38, %v1098_v49  ;;  %vm1097_vm14 = vcmp.eq.f32.partialorder %v1096_v51, 8.507059e+37 }
 0x232   : > { %v1081_v43 = vsel %vm1080_vm9, %v1060_v17, %v1079_v40  ;;  %v4031_v17 = vmov 4  }
 0x233   : > { %v1084_v44 = vsel %vm1082_vm10, %v1083_v41, %v1081_v43 }
 0x234   : > { %v3735_v45 = vpop.eup %3734  ;;  %v1086_v46 = vmax.f32 %v1084_v44, 1e-12 }
 0x235   : > { %v1088_v47 = vmul.f32 %v3735_v45, %v1085_v35  ;;  %vm1093_vm11 = vweird.f32 %v3735_v45 }
 0x236   : > { %3736 = vrcp.f32 %v1086_v46  ;;  %vm1094_vm13 = vmor %vm1092_vm12, %vm1093_vm11  ;;  %v1113_v60 = vand.u32 2147483648, %v1086_v46  ;;  %v1111_v62 = vand.u32 2147483647, %v1086_v46  ;;  %vm1107_vm0 = vweird.f32 %v1086_v46 }
 0x237   : > { %v1089_v48 = vsub.f32 1.0, %v1088_v47 }
 0x238   : > { %v1114_v1 = vor.u32 1.1754944e-38, %v1113_v60  ;;  %vm1112_vm3 = vcmp.eq.f32.partialorder %v1111_v62, 8.507059e+37 }
 0x239   : > { %v1090_v50 = vmul.f32 %v3735_v45, %v1089_v48 }
 0x23b   : > { %v1091_v52 = vadd.f32 %v3735_v45, %v1090_v50 }
 0x23c   : > { %v3737_v53 = vpop.eup %3736 }
 0x23d   : > { %v1095_v55 = vsel %vm1094_vm13, %v3735_v45, %v1091_v52  ;;  %v1103_v56 = vmul.f32 %v3737_v53, %v1086_v46  ;;  %vm1108_vm15 = vweird.f32 %v3737_v53  ;;  %v4437_v45 = vld [vmem:[%s4290_s2 + $0x8] sm:$0xff] }
 0x23e   : > { %v1100_v57 = vsel %vm1097_vm14, %v1099_v54, %v1095_v55  ;;  %vm1109_vm1 = vmor %vm1107_vm0, %vm1108_vm15 }
 0x23f   : > { %v1101_v58 = vmul.f32 %v1100_v57, %v4331_v63  ;;  %v1104_v59 = vsub.f32 1.0, %v1103_v56  ;;  %v1126_v63 = vld [vmem:[%s5125_s11 + $0x8] sm:$0xff] }
 0x240   : > { %1228 = vmatpush.msrb.mxu0 %v1126_v63 }
 0x241   : > { %3497 = vmatmul.msk.f32.vlgmr.msra.gmra.mxu2 %vm959_vm2, %v1101_v58  ;;  %v1105_v61 = vmul.f32 %v3737_v53, %v1104_v59 }
 0x242   : > { %1229 = vmatpush.msrb.mxu0 %v1125_v6 }
 0x243   : > { %v1106_v0 = vadd.f32 %v3737_v53, %v1105_v61 }
 0x245   : > { %v1110_v2 = vsel %vm1109_vm1, %v3737_v53, %v1106_v0 }
 0x246   : > { %v1115_v4 = vsel %vm1112_vm3, %v1114_v1, %v1110_v2 }
 0x247   : > { %v1116_v5 = vmul.f32 %v1115_v4, %v4336_v3  ;;  %v1204_v3 = vpop.f32.mrf.mxu3 }
 0x249   : > { %3498 = vmatmul.msk.f32.gmra.mxu2 %vm959_vm2, %v1116_v5 }
 0x2c4   : > { %v1172_v9 = vpop.f32.mrf.mxu2 }
 0x2c5   : > { %v1202_v10 = vadd.f32 %v1201_v8, %v1172_v9 }
 0x2c7   : > { %3501 = vmatmul.msk.f32.vlgmr.msrb.gmra.mxu0 %vm1207_vm4, %v1202_v10 }
 0x2cc   : > { %v1175_v11 = vpop.f32.mrf.mxu2 }
 0x2cd   : > { %v1205_v12 = vadd.f32 %v1204_v3, %v1175_v11 }
 0x2cf   : > { %3502 = vmatmul.msk.f32.gmra.mxu0 %vm1207_vm4, %v1205_v12  ;;  %1365 = vmatpush.msrb.mxu1 %v1205_v12  ;;  %v4403_v13 = vpack.i.bf16 %v1202_v10, %v1205_v12 }
 0x2d1   : > { %1366 = vmatpush.msrb.mxu1 %v1202_v10 }
 0x344   : > { %v1231_v15 = vpop.f32.mrf.mxu0 }
 0x345   : > { %1425 = vperm.xlu2 %3670, %v1231_v15   ;;  %1386 = vrot.lane.b32.xlu1 %v1231_v15, %s5078_s26 }
 0x34c   : > { %v1234_v16 = vpop.f32.mrf.mxu0 }
 0x34d   : > { %1429 = vperm.xlu2 %3670, %v1234_v16   ;;  %1388 = vrot.lane.b32.xlu1 %v1234_v16, %s5078_s26  ;;  %s5129_s26 = smov 125  }
 0x355   : > { %1239 = vrot.lane.b32.xlu2 %v1231_v15, %s5081_s5  ;;  %1241 = vrot.lane.b32.xlu1 %v1234_v16, %s5081_s5  ;;  %s5127_s5 = smov 127  }
 0x356   : > { %3677 = vset.pattern.permute.xlu2 %v4031_v17 }
 0x35d   : > { %1596 = vrot.lane.b32.xlu2 %v1231_v15, %s5076_s8  ;;  %1779 = vrot.lane.b32.xlu1 %v1231_v15, %s5074_s7 }
 0x365   : > { %1598 = vrot.lane.b32.xlu2 %v1234_v16, %s5076_s8  ;;  %1278 = vperm.xlu1 %3676, %v1231_v15   ;;  %s5130_s8 = smov 123  }
 0x36d   : > { %1781 = vrot.lane.b32.xlu2 %v1234_v16, %s5074_s7  ;;  %1282 = vperm.xlu1 %3676, %v1234_v16   ;;  %s5131_s7 = smov 121  }
 0x375   : > { %1635 = vperm.xlu2 %3677, %v1231_v15   ;;  %3678 = vset.pattern.permute.xlu1 %v4034_v18 }
 0x376   : > { %1818 = vperm.xlu1 %3678, %v1231_v15  }
 0x37e   : > { %3679 = vset.pattern.permute.xlu1 %v4031_v17 }
 0x37f   : > { %1639 = vperm.xlu1 %3679, %v1234_v16  }
 0x387   : > { %3680 = vset.pattern.permute.xlu1 %v4034_v18 }
 0x388   : > { %1822 = vperm.xlu1 %3680, %v1234_v16  }
 0x39f   : > { %v1426_v19 = vpop.permute.xlu2 %1425 }
 0x3a7   : > { %v1430_v20 = vpop.permute.xlu2 %1429 }
 0x3af   : > { %v1240_v21 = vpop.permute.xlu2 %1239 }
 0x3b0   : > { %1245 = vxpose.xlu2.b32.start [1/2] (short) (narrow) %v1240_v21, 8 }
 0x3b7   : > { %v1387_v22 = vpop.permute.xlu1 %1386  ;;  %v1597_v25 = vpop.permute.xlu2 %1596 }
 0x3b8   : > { %1392 = vxpose.xlu0.b32.start [1/2] (short) (narrow) %v1387_v22, 8 }
 0x3bf   : > { %v1389_v23 = vpop.permute.xlu1 %1388  ;;  %v1599_v26 = vpop.permute.xlu2 %1598 }
 0x3c0   : > { %1393 = vxpose.xlu0.b32.end [2/2] (short) (narrow) %v1389_v23, 8 }
 0x3c7   : > { %v1242_v24 = vpop.permute.xlu1 %1241  ;;  %v1782_v27 = vpop.permute.xlu2 %1781 }
 0x3c8   : > { %1246 = vxpose.xlu2.b32.end [2/2] (short) (narrow) %v1242_v24, 8 }
 0x3cf   : > { %v4421_v28 = vpop.permute.xlu2 %1635  ;;  %v1780_v29 = vpop.permute.xlu1 %1779 }
 0x3d7   : > { %v1279_v32 = vpop.permute.xlu1 %1278 }
 0x3df   : > { %v1283_v55 = vpop.permute.xlu1 %1282 }
 0x3e8   : > { %v4443_v56 = vpop.permute.xlu1 %1818 }
 0x3f1   : > { %v4445_v57 = vpop.permute.xlu1 %1639 }
 0x3fa   : > { %v4447_v58 = vpop.permute.xlu1 %1822 }
 0x427   : > { %3691 = vset.pattern.permute.xlu0 %v4028_v14 }
 0x42e   : > { %3672 = vrot.lane.b32.xlu0 %v4403_v13, %s5080_s3  ;;  %s5133_s3 = smov 80  }
 0x459   : > { %v4423_v30 = vpop.trf.xlu2 }
 0x45a   : > { %v1285_v31 = vperm.slane %v4423_v30, 0 }
 0x45c   : > { %v1286_v33 = vadd.f32 %v1285_v31, %v1279_v32  ;;  %v1408_v34 = vpop.trf.xlu0 }
 0x45d   : > { %v1432_v35 = vperm.slane %v1408_v34, 0 }
 0x45e   : > { %v1290_v36 = vmul.f32 0.2, %v1286_v33  ;;  %vm1288_vm5 = vcmp.gt.f32.partialorder %v1286_v33, 0.0 }
 0x45f   : > { %v1433_v38 = vadd.f32 %v1432_v35, %v1426_v19  ;;  %v1434_v39 = vadd.f32 %v1432_v35, %v1430_v20 }
 0x460   : > { %v1292_v40 = vsel %vm1288_vm5, %v1286_v33, %v1290_v36 }
 0x461   : > { %v1437_v41 = vmul.f32 0.2, %v1433_v38  ;;  %v1438_v42 = vmul.f32 0.2, %v1434_v39  ;;  %v4432_v43 = vadd.f32 %v1292_v40, %v4429_v37  ;;  %vm1436_vm7 = vcmp.gt.f32.partialorder %v1434_v39, 0.0 }
 0x462   : > { %vm1435_vm8 = vcmp.gt.f32.partialorder %v1433_v38, 0.0 }
 0x463   : > { %v1297_v44 = vsel %vm1296_vm6, %v4432_v43, -inf  ;;  %v1440_v46 = vsel %vm1436_vm7, %v1434_v39, %v1438_v42  ;;  %v1439_v47 = vsel %vm1435_vm8, %v1433_v38, %v1437_v41  ;;  %v1287_v38 = vadd.f32 %v1285_v31, %v1283_v55 }
 0x464   : > { %1298 = vmax.xlane.f32.xlu0 %v1297_v44  ;;  %v1442_v48 = vadd.f32 %v1440_v46, %v4437_v45  ;;  %v1441_v49 = vadd.f32 %v1439_v47, %v4429_v37 }
 0x465   : > { %v1291_v39 = vmul.f32 0.2, %v1287_v38  ;;  %vm1289_vm1 = vcmp.gt.f32.partialorder %v1287_v38, 0.0 }
 0x466   : > { %v1446_v50 = vsel %vm1296_vm6, %v1442_v48, -inf  ;;  %v1443_v51 = vsel %vm1296_vm6, %v1441_v49, -inf }
 0x467   : > { %1447 = vmax.xlane.f32.xlu2 %v1446_v50  ;;  %1444 = vmax.xlane.f32.xlu1 %v1443_v51  ;;  %v1293_v40 = vsel %vm1289_vm1, %v1287_v38, %v1291_v39 }
 0x468   : > { %v1295_v41 = vadd.f32 %v1293_v40, %v4437_v45 }
 0x46a   : > { %v1300_v42 = vsel %vm1296_vm6, %v1295_v41, -inf }
 0x4a0   : > { %v3673_v52 = vpop.permute.xlu0 %3672 }
 0x4a1   : > { %v3674_v53 = vunpack.i.l.bf16 %v3673_v52  ;;  %v3675_v54 = vunpack.i.h.bf16 %v3673_v52 }
 0x4a3   : > { %1517 = vmatpush.msrb.mxu2 %v3674_v53 }
 0x4a5   : > { %1518 = vmatpush.msrb.mxu2 %v3675_v54 }
 0x4da   : > { %v1448_v59 = vpop.xlane.xlu2 %1447  ;;  %v1445_v60 = vpop.xlane.xlu1 %1444 }
 0x4db   : > { %v1450_v61 = vsub.f32 %v1442_v48, %v1448_v59  ;;  %v1449_v62 = vsub.f32 %v1441_v49, %v1445_v60  ;;  %v1299_v59 = vpop.xlane.xlu0 %1298 }
 0x4dd   : > { %v1453_v0 = vmul.f32 1.442695, %v1450_v61  ;;  %v1451_v1 = vmul.f32 1.442695, %v1449_v62 }
 0x4df   : > { %3738 = vpow2.f32 %v1453_v0 }
 0x4e0   : > { %3740 = vpow2.f32 %v1451_v1 }
 0x4e5   : > { %v3739_v2 = vpop.eup %3738 }
 0x4e6   : > { %v3741_v4 = vpop.eup %3740  ;;  %v1458_v5 = vsel %vm1296_vm6, %v3739_v2, 0.0 }
 0x4e7   : > { %1459 = vadd.xlane.f32.xlu1 %v1458_v5  ;;  %v1455_v63 = vsel %vm1296_vm6, %v3741_v4, 0.0 }
 0x4e8   : > { %1456 = vadd.xlane.f32.xlu2 %v1455_v63 }
 0x511   : > { %1785 = vxpose.xlu2.b32.start [1/2] (short) (narrow) %v1780_v29, 8 }
 0x519   : > { %1786 = vxpose.xlu2.b32.end [2/2] (short) (narrow) %v1782_v27, 8 }
 0x521   : > { %1602 = vxpose.xlu1.b32.start [1/2] (short) (narrow) %v1597_v25, 8 }
 0x529   : > { %1603 = vxpose.xlu1.b32.end [2/2] (short) (narrow) %v1599_v26, 8 }
 0x55a   : > { %v1460_v6 = vpop.xlane.xlu1 %1459 }
 0x55b   : > { %v1457_v8 = vpop.xlane.xlu2 %1456  ;;  %3742 = vrcp.f32 %v1460_v6  ;;  %v1487_v26 = vand.u32 2147483648, %v1460_v6  ;;  %vm1481_vm14 = vweird.f32 %v1460_v6  ;;  %v1485_v32 = vand.u32 2147483647, %v1460_v6 }
 0x55c   : > { %3744 = vrcp.f32 %v1457_v8  ;;  %v1472_v16 = vand.u32 2147483648, %v1457_v8  ;;  %v1470_v20 = vand.u32 2147483647, %v1457_v8  ;;  %vm1466_vm10 = vweird.f32 %v1457_v8 }
 0x55d   : > { %v1488_v34 = vor.u32 1.1754944e-38, %v1487_v26  ;;  %vm1486_vm0 = vcmp.eq.f32.partialorder %v1485_v32, 8.507059e+37 }
 0x55e   : > { %v1473_v23 = vor.u32 1.1754944e-38, %v1472_v16  ;;  %vm1471_vm12 = vcmp.eq.f32.partialorder %v1470_v20, 8.507059e+37 }
 0x561   : > { %v3743_v9 = vpop.eup %3742 }
 0x562   : > { %v3745_v10 = vpop.eup %3744  ;;  %v1477_v3 = vmul.f32 %v3743_v9, %v1460_v6  ;;  %vm1482_vm13 = vweird.f32 %v3743_v9 }
 0x563   : > { %v1462_v11 = vmul.f32 %v3745_v10, %v1457_v8  ;;  %vm1467_vm9 = vweird.f32 %v3745_v10  ;;  %vm1483_vm15 = vmor %vm1481_vm14, %vm1482_vm13 }
 0x564   : > { %v1478_v12 = vsub.f32 1.0, %v1477_v3  ;;  %vm1468_vm11 = vmor %vm1466_vm10, %vm1467_vm9 }
 0x565   : > { %v1463_v15 = vsub.f32 1.0, %v1462_v11 }
 0x566   : > { %v1479_v21 = vmul.f32 %v3743_v9, %v1478_v12 }
 0x567   : > { %v1464_v19 = vmul.f32 %v3745_v10, %v1463_v15 }
 0x568   : > { %v1480_v25 = vadd.f32 %v3743_v9, %v1479_v21 }
 0x569   : > { %v1465_v22 = vadd.f32 %v3745_v10, %v1464_v19 }
 0x56a   : > { %v1484_v33 = vsel %vm1483_vm15, %v3743_v9, %v1480_v25  ;;  %v1135_v9 = vld [vmem:[%s5126_s6 + $0x10] sm:$0xff] }
 0x56b   : > { %v1469_v24 = vsel %vm1468_vm11, %v3745_v10, %v1465_v22  ;;  %v1489_v35 = vsel %vm1486_vm0, %v1488_v34, %v1484_v33 }
 0x56c   : > { %v1474_v27 = vsel %vm1471_vm12, %v1473_v23, %v1469_v24  ;;  %v1490_v36 = vmul.f32 %v3739_v2, %v1489_v35  ;;  %v1303_v2 = vsub.f32 %v4432_v43, %v1299_v59  ;;  %v1136_v43 = vld [vmem:[%s5126_s6 + $0x18] sm:$0xff] }
 0x56d   : > { %v1475_v29 = vmul.f32 %v3741_v4, %v1474_v27  ;;  %1558 = vmatpush.msrb.mxu3 %v1136_v43 }
 0x56e   : > { %v1305_v4 = vmul.f32 1.442695, %v1303_v2 }
 0x56f   : > { %3507 = vmatmul.msk.f32.vlgmr.msrb.gmra.mxu2 %vm1296_vm6, %v1475_v29  ;;  %1559 = vmatpush.msrb.mxu3 %v1135_v9 }
 0x570   : > { %3746 = vpow2.f32 %v1305_v4 }
 0x576   : > { %v4474_v6 = vpop.eup %3746 }
 0x577   : > { %3508 = vmatmul.msk.f32.gmra.mxu2 %vm1296_vm6, %v1490_v36  ;;  %v1309_v8 = vsel %vm1296_vm6, %v4474_v6, 0.0 }
 0x57b   : > { %3692 = vset.pattern.permute.xlu2 %v4028_v14 }
 0x58a   : > { %1301 = vmax.xlane.f32.xlu2 %v1300_v42 }
 0x5aa   : > { %v1801_v44 = vpop.trf.xlu2 }
 0x5ab   : > { %v1825_v46 = vperm.slane %v1801_v44, 0 }
 0x5ad   : > { %v1826_v47 = vadd.f32 %v1825_v46, %v4443_v56  ;;  %v1827_v52 = vadd.f32 %v1825_v46, %v4447_v58 }
 0x5af   : > { %v1830_v48 = vmul.f32 0.2, %v1826_v47  ;;  %vm1828_vm3 = vcmp.gt.f32.partialorder %v1826_v47, 0.0  ;;  %v1831_v60 = vmul.f32 0.2, %v1827_v52  ;;  %vm1829_vm8 = vcmp.gt.f32.partialorder %v1827_v52, 0.0 }
 0x5b1   : > { %v1832_v49 = vsel %vm1828_vm3, %v1826_v47, %v1830_v48 }
 0x5b2   : > { %v4460_v30 = vadd.f32 %v1832_v49, %v4429_v37 }
 0x5b4   : > { %v1836_v31 = vsel %vm1296_vm6, %v4460_v30, -inf }
 0x5b5   : > { %1837 = vmax.xlane.f32.xlu0 %v1836_v31 }
 0x5c5   : > { %v1618_v50 = vpop.trf.xlu1 }
 0x5c6   : > { %v1642_v51 = vperm.slane %v1618_v50, 0 }
 0x5c8   : > { %v1643_v53 = vadd.f32 %v1642_v51, %v4421_v28  ;;  %v1644_v54 = vadd.f32 %v1642_v51, %v4445_v57  ;;  %v1833_v57 = vsel %vm1829_vm8, %v1827_v52, %v1831_v60 }
 0x5c9   : > { %v1835_v5 = vadd.f32 %v1833_v57, %v4437_v45 }
 0x5ca   : > { %v1647_v55 = vmul.f32 0.2, %v1643_v53  ;;  %v1648_v56 = vmul.f32 0.2, %v1644_v54  ;;  %vm1645_vm5 = vcmp.gt.f32.partialorder %v1643_v53, 0.0  ;;  %vm1646_vm7 = vcmp.gt.f32.partialorder %v1644_v54, 0.0 }
 0x5cb   : > { %v1839_v63 = vsel %vm1296_vm6, %v1835_v5, -inf }
 0x5cc   : > { %v1649_v61 = vsel %vm1645_vm5, %v1643_v53, %v1647_v55  ;;  %v1650_v62 = vsel %vm1646_vm7, %v1644_v54, %v1648_v56 }
 0x5cd   : > { %v1651_v0 = vadd.f32 %v1649_v61, %v4429_v37  ;;  %v1652_v1 = vadd.f32 %v1650_v62, %v4437_v45 }
 0x5cf   : > { %v1653_v58 = vsel %vm1296_vm6, %v1651_v0, -inf  ;;  %v1656_v28 = vsel %vm1296_vm6, %v1652_v1, -inf }
 0x5d0   : > { %1654 = vmax.xlane.f32.xlu1 %v1653_v58  ;;  %1657 = vmax.xlane.f32.xlu0 %v1656_v28 }
 0x5d8   : > { %1840 = vmax.xlane.f32.xlu0 %v1839_v63 }
 0x5e0   : > { %1310 = vadd.xlane.f32.xlu0 %v1309_v8 }
 0x5e9   : > { %3687 = vrot.lane.b32.xlu1 %v4403_v13, %s5072_s10 }
 0x5f2   : > { %v1520_v10 = vpop.f32.mrf.mxu2 }
 0x5f3   : > { %v1528_v3 = vmin.f32 %v1520_v10, 0.0  ;;  %vm1526_vm9 = vcmp.gt.f32.partialorder %v1520_v10, 0.0 }
 0x5f5   : > { %v1530_v11 = vmul.f32 1.442695, %v1528_v3 }
 0x5f7   : > { %3748 = vpow2.f32 %v1530_v11 }
 0x5fa   : > { %v1523_v12 = vpop.f32.mrf.mxu2 }
 0x5fb   : > { %v1529_v15 = vmin.f32 %v1523_v12, 0.0  ;;  %vm1527_vm10 = vcmp.gt.f32.partialorder %v1523_v12, 0.0 }
 0x5fd   : > { %v3749_v16 = vpop.eup %3748  ;;  %v1532_v19 = vmul.f32 1.442695, %v1529_v15  ;;  %v1302_v20 = vpop.xlane.xlu2 %1301 }
 0x5fe   : > { %v3509_v21 = vadd.f32 -1.0, %v3749_v16  ;;  %v1304_v22 = vsub.f32 %v1295_v41, %v1302_v20 }
 0x5ff   : > { %3750 = vpow2.f32 %v1532_v19 }
 0x600   : > { %v1307_v23 = vmul.f32 1.442695, %v1304_v22  ;;  %v1536_v24 = vsel %vm1526_vm9, %v1520_v10, %v3509_v21  ;;  %v1134_v21 = vld [vmem:[%s5126_s6 + $0x8] sm:$0xff] }
 0x601   : > { %3511 = vmatmul.msk.f32.vlgmr.msrb.gmra.mxu3 %vm1296_vm6, %v1536_v24  ;;  %1587 = vmatpush.msra.mxu0 %v1134_v21 }
 0x602   : > { %3752 = vpow2.f32 %v1307_v23  ;;  %v1133_v23 = vld [vmem:[%s5126_s6] sm:$0xff] }
 0x603   : > { %1588 = vmatpush.msra.mxu0 %v1133_v23 }
 0x605   : > { %v3751_v25 = vpop.eup %3750 }
 0x606   : > { %v3510_v26 = vadd.f32 -1.0, %v3751_v25 }
 0x608   : > { %v4487_v27 = vpop.eup %3752  ;;  %v1537_v29 = vsel %vm1527_vm10, %v1523_v12, %v3510_v26 }
 0x609   : > { %3512 = vmatmul.msk.f32.gmra.mxu3 %vm1296_vm6, %v1537_v29  ;;  %v1312_v32 = vsel %vm1296_vm6, %v4487_v27, 0.0 }
 0x60a   : > { %1313 = vadd.xlane.f32.xlu0 %v1312_v32 }
 0x628   : > { %v1838_v33 = vpop.xlane.xlu0 %1837 }
 0x629   : > { %v1842_v38 = vsub.f32 %v4460_v30, %v1838_v33 }
 0x62b   : > { %v1844_v40 = vmul.f32 1.442695, %v1842_v38 }
 0x643   : > { %v1655_v34 = vpop.xlane.xlu1 %1654  ;;  %v1658_v35 = vpop.xlane.xlu0 %1657 }
 0x644   : > { %v1659_v36 = vsub.f32 %v1651_v0, %v1655_v34  ;;  %v1660_v44 = vsub.f32 %v1652_v1, %v1658_v35 }
 0x646   : > { %v1661_v39 = vmul.f32 1.442695, %v1659_v36  ;;  %v1663_v47 = vmul.f32 1.442695, %v1660_v44 }
 0x648   : > { %3754 = vpow2.f32 %v1661_v39 }
 0x649   : > { %3756 = vpow2.f32 %v1844_v40 }
 0x64b   : > { %v1841_v41 = vpop.xlane.xlu0 %1840 }
 0x64c   : > { %v1843_v31 = vsub.f32 %v1835_v5, %v1841_v41 }
 0x64e   : > { %v4493_v42 = vpop.eup %3754  ;;  %v1846_v51 = vmul.f32 1.442695, %v1843_v31 }
 0x64f   : > { %v1665_v46 = vsel %vm1296_vm6, %v4493_v42, 0.0  ;;  %v4497_v49 = vpop.eup %3756 }
 0x650   : > { %1666 = vadd.xlane.f32.xlu0 %v1665_v46  ;;  %v1848_v30 = vsel %vm1296_vm6, %v4497_v49, 0.0 }
 0x653   : > { %v1311_v48 = vpop.xlane.xlu0 %1310 }
 0x654   : > { %3758 = vrcp.f32 %v1311_v48  ;;  %v1326_v59 = vand.u32 2147483648, %v1311_v48  ;;  %v1324_v62 = vand.u32 2147483647, %v1311_v48  ;;  %vm1320_vm12 = vweird.f32 %v1311_v48 }
 0x655   : > { %3760 = vpow2.f32 %v1663_v47 }
 0x656   : > { %3762 = vpow2.f32 %v1846_v51  ;;  %v1327_v2 = vor.u32 1.1754944e-38, %v1326_v59  ;;  %vm1325_vm14 = vcmp.eq.f32.partialorder %v1324_v62, 8.507059e+37 }
 0x658   : > { %1849 = vadd.xlane.f32.xlu0 %v1848_v30 }
 0x65a   : > { %v3759_v50 = vpop.eup %3758 }
 0x65b   : > { %v1316_v52 = vmul.f32 %v3759_v50, %v1311_v48  ;;  %v3688_v53 = vpop.permute.xlu1 %3687  ;;  %v4501_v54 = vpop.eup %3760  ;;  %vm1321_vm11 = vweird.f32 %v3759_v50 }
 0x65c   : > { %v3689_v55 = vunpack.i.l.bf16 %v3688_v53  ;;  %v3690_v60 = vunpack.i.h.bf16 %v3688_v53  ;;  %v1668_v0 = vsel %vm1296_vm6, %v4501_v54, 0.0  ;;  %vm1322_vm13 = vmor %vm1320_vm12, %vm1321_vm11  ;;  %v4505_v28 = vpop.eup %3762 }
 0x65d   : > { %v1317_v56 = vsub.f32 1.0, %v1316_v52  ;;  %v1851_v5 = vsel %vm1296_vm6, %v4505_v28, 0.0 }
 0x65e   : > { %1910 = vmatpush.msra.mxu3 %v3689_v55 }
 0x65f   : > { %v1318_v61 = vmul.f32 %v3759_v50, %v1317_v56 }
 0x660   : > { %1911 = vmatpush.msra.mxu3 %v3690_v60  ;;  %1669 = vadd.xlane.f32.xlu0 %v1668_v0 }
 0x661   : > { %v1319_v1 = vadd.f32 %v3759_v50, %v1318_v61 }
 0x663   : > { %v1323_v58 = vsel %vm1322_vm13, %v3759_v50, %v1319_v1 }
 0x664   : > { %v1328_v57 = vsel %vm1325_vm14, %v1327_v2, %v1323_v58 }
 0x665   : > { %v1329_v4 = vmul.f32 %v4474_v6, %v1328_v57 }
 0x667   : > { %3503 = vmatmul.msk.f32.vlgmr.msrb.gmra.mxu1 %vm1296_vm6, %v1329_v4 }
 0x668   : > { %1852 = vadd.xlane.f32.xlu0 %v1851_v5 }
 0x67c   : > { %3682 = vrot.lane.b32.xlu0 %v4403_v13, %s5073_s29  ;;  %s5137_s29 = sld [smem:[#allocation29_spill]] }
 0x67d   : > { %v1314_v63 = vpop.xlane.xlu0 %1313 }
 0x67e   : > { %3764 = vrcp.f32 %v1314_v63  ;;  %v1341_v10 = vand.u32 2147483648, %v1314_v63  ;;  %v1339_v11 = vand.u32 2147483647, %v1314_v63  ;;  %vm1335_vm0 = vweird.f32 %v1314_v63 }
 0x680   : > { %v1342_v12 = vor.u32 1.1754944e-38, %v1341_v10  ;;  %vm1340_vm3 = vcmp.eq.f32.partialorder %v1339_v11, 8.507059e+37 }
 0x684   : > { %v3765_v43 = vpop.eup %3764 }
 0x685   : > { %v1331_v8 = vmul.f32 %v3765_v43, %v1314_v63  ;;  %vm1336_vm15 = vweird.f32 %v3765_v43 }
 0x686   : > { %vm1337_vm1 = vmor %vm1335_vm0, %vm1336_vm15 }
 0x687   : > { %v1332_v9 = vsub.f32 1.0, %v1331_v8 }
 0x689   : > { %v1333_v3 = vmul.f32 %v3765_v43, %v1332_v9 }
 0x68b   : > { %v1334_v6 = vadd.f32 %v3765_v43, %v1333_v3 }
 0x68d   : > { %v1338_v15 = vsel %vm1337_vm1, %v3765_v43, %v1334_v6 }
 0x68e   : > { %v1343_v16 = vsel %vm1340_vm3, %v1342_v12, %v1338_v15 }
 0x68f   : > { %v1344_v19 = vmul.f32 %v4487_v27, %v1343_v16 }
 0x691   : > { %3504 = vmatmul.msk.f32.gmra.mxu1 %vm1296_vm6, %v1344_v19 }
 0x6c3   : > { %v4515_v13 = vpop.xlane.xlu0 %1666 }
 0x6c4   : > { %v1682_v61 = vand.u32 2147483648, %v4515_v13  ;;  %vm1676_vm13 = vweird.f32 %v4515_v13  ;;  %v1680_v0 = vand.u32 2147483647, %v4515_v13 }
 0x6c6   : > { %v1683_v5 = vor.u32 1.1754944e-38, %v1682_v61  ;;  %vm1681_vm1 = vcmp.eq.f32.partialorder %v1680_v0, 8.507059e+37 }
 0x6cb   : > { %v1850_v20 = vpop.xlane.xlu0 %1849 }
 0x6cc   : > { %3766 = vrcp.f32 %v1850_v20  ;;  %v1865_v27 = vand.u32 2147483648, %v1850_v20  ;;  %v1863_v32 = vand.u32 2147483647, %v1850_v20  ;;  %vm1859_vm7 = vweird.f32 %v1850_v20 }
 0x6cd   : > { %3768 = vrcp.f32 %v4515_v13 }
 0x6ce   : > { %v1866_v35 = vor.u32 1.1754944e-38, %v1865_v27  ;;  %vm1864_vm9 = vcmp.eq.f32.partialorder %v1863_v32, 8.507059e+37  ;;  %v1140_v27 = vld [vmem:[%s5126_s6 + $0x38] sm:$0xff] }
 0x6cf   : > { %1951 = vmatpush.msrb.mxu0 %v1140_v27 }
 0x6d2   : > { %v3767_v22 = vpop.eup %3766 }
 0x6d3   : > { %v1855_v24 = vmul.f32 %v3767_v22, %v1850_v20  ;;  %v4524_v25 = vpop.xlane.xlu0 %1669  ;;  %vm1860_vm5 = vweird.f32 %v3767_v22  ;;  %v3769_v33 = vpop.eup %3768 }
 0x6d4   : > { %vm1861_vm8 = vmor %vm1859_vm7, %vm1860_vm5  ;;  %3770 = vrcp.f32 %v4524_v25  ;;  %v1672_v39 = vmul.f32 %v3769_v33, %v4515_v13  ;;  %vm1677_vm11 = vweird.f32 %v3769_v33  ;;  %v1697_v6 = vand.u32 2147483648, %v4524_v25 }
 0x6d5   : > { %v1856_v26 = vsub.f32 1.0, %v1855_v24  ;;  %vm1678_vm15 = vmor %vm1676_vm13, %vm1677_vm11  ;;  %vm1691_vm7 = vweird.f32 %v4524_v25  ;;  %v1695_v16 = vand.u32 2147483647, %v4524_v25 }
 0x6d6   : > { %v1673_v44 = vsub.f32 1.0, %v1672_v39  ;;  %v1698_v13 = vor.u32 1.1754944e-38, %v1697_v6 }
 0x6d7   : > { %v1857_v29 = vmul.f32 %v3767_v22, %v1856_v26 }
 0x6d8   : > { %v1674_v31 = vmul.f32 %v3769_v33, %v1673_v44 }
 0x6d9   : > { %v1858_v34 = vadd.f32 %v3767_v22, %v1857_v29  ;;  %v1561_v29 = vpop.f32.mrf.mxu3 }
 0x6da   : > { %v3771_v46 = vpop.eup %3770  ;;  %v1675_v60 = vadd.f32 %v3769_v33, %v1674_v31 }
 0x6db   : > { %v1862_v36 = vsel %vm1861_vm8, %v3767_v22, %v1858_v34  ;;  %v1853_v38 = vpop.xlane.xlu0 %1852  ;;  %v1687_v30 = vmul.f32 %v3771_v46, %v4524_v25  ;;  %vm1692_vm3 = vweird.f32 %v3771_v46  ;;  %v1137_v34 = vld [vmem:[%s5126_s6 + $0x20] sm:$0xff] }
 0x6dc   : > { %v1867_v40 = vsel %vm1864_vm9, %v1866_v35, %v1862_v36  ;;  %3772 = vrcp.f32 %v1853_v38  ;;  %v1880_v53 = vand.u32 2147483648, %v1853_v38  ;;  %v1878_v59 = vand.u32 2147483647, %v1853_v38  ;;  %vm1693_vm8 = vmor %vm1691_vm7, %vm1692_vm3 }
 0x6dd   : > { %v1868_v41 = vmul.f32 %v4497_v49, %v1867_v40  ;;  %v1688_v49 = vsub.f32 1.0, %v1687_v30  ;;  %vm1874_vm12 = vweird.f32 %v1853_v38  ;;  %v1679_v58 = vsel %vm1678_vm15, %v3769_v33, %v1675_v60  ;;  %v1138_v33 = vld [vmem:[%s5126_s6 + $0x28] sm:$0xff] }
 0x6de   : > { %v1881_v1 = vor.u32 1.1754944e-38, %v1880_v53  ;;  %vm1879_vm0 = vcmp.eq.f32.partialorder %v1878_v59, 8.507059e+37  ;;  %v1684_v9 = vsel %vm1681_vm1, %v1683_v5, %v1679_v58  ;;  %vm1696_vm9 = vcmp.eq.f32.partialorder %v1695_v16, 8.507059e+37  ;;  %1768 = vmatpush.msra.mxu2 %v1138_v33  ;;  %v1146_v58 = vld [vmem:[%s5043_s12 + $0x28] sm:$0xff]  ;;  %v1143_v5 = vld [vmem:[%s5043_s12 + $0x10] sm:$0xff] }
 0x6df   : > { %3521 = vmatmul.msk.f32.vlgmr.msra.gmra.mxu3 %vm1296_vm6, %v1868_v41  ;;  %v1689_v57 = vmul.f32 %v3771_v46, %v1688_v49 }
 0x6e0   : > { %1769 = vmatpush.msra.mxu2 %v1137_v34 }
 0x6e1   : > { %v1690_v11 = vadd.f32 %v3771_v46, %v1689_v57  ;;  %v4551_v32 = vpop.f32.mrf.mxu3  ;;  %v1145_v57 = vld [vmem:[%s5043_s12 + $0x20] sm:$0xff] }
 0x6e2   : > { %v3773_v47 = vpop.eup %3772 }
 0x6e3   : > { %v1870_v48 = vmul.f32 %v3773_v47, %v1853_v38  ;;  %vm1875_vm10 = vweird.f32 %v3773_v47  ;;  %v1694_v19 = vsel %vm1693_vm8, %v3771_v46, %v1690_v11 }
 0x6e4   : > { %v1368_v50 = vpop.f32.mrf.mxu1  ;;  %vm1876_vm14 = vmor %vm1874_vm12, %vm1875_vm10  ;;  %v1699_v20 = vsel %vm1696_vm9, %v1698_v13, %v1694_v19 }
 0x6e5   : > { %v1871_v51 = vsub.f32 1.0, %v1870_v48  ;;  %v1376_v52 = vmin.f32 %v1368_v50, 0.0  ;;  %vm1374_vm5 = vcmp.gt.f32.partialorder %v1368_v50, 0.0  ;;  %v1700_v21 = vmul.f32 %v4501_v54, %v1699_v20  ;;  %v1139_v54 = vld [vmem:[%s5126_s6 + $0x30] sm:$0xff] }
 0x6e6   : > { %1952 = vmatpush.msrb.mxu0 %v1139_v54 }
 0x6e7   : > { %v1872_v55 = vmul.f32 %v3773_v47, %v1871_v51  ;;  %v1378_v56 = vmul.f32 1.442695, %v1376_v52 }
 0x6e9   : > { %3774 = vpow2.f32 %v1378_v56  ;;  %v1873_v62 = vadd.f32 %v3773_v47, %v1872_v55 }
 0x6eb   : > { %v1877_v2 = vsel %vm1876_vm14, %v3773_v47, %v1873_v62 }
 0x6ec   : > { %v1882_v4 = vsel %vm1879_vm0, %v1881_v1, %v1877_v2  ;;  %v1148_v1 = vld [vmem:[%s5043_s12 + $0x38] sm:$0xff]  ;;  %v1147_v2 = vld [vmem:[%s5043_s12 + $0x30] sm:$0xff] }
 0x6ed   : > { %v1883_v63 = vmul.f32 %v4505_v28, %v1882_v4  ;;  %v1685_v28 = vmul.f32 %v4493_v42, %v1684_v9  ;;  %v1144_v4 = vld [vmem:[%s5043_s12 + $0x18] sm:$0xff] }
 0x6ee   : > { %v3683_v43 = vpop.permute.xlu0 %3682 }
 0x6ef   : > { %v3775_v8 = vpop.eup %3774  ;;  %v3684_v10 = vunpack.i.l.bf16 %v3683_v43  ;;  %3522 = vmatmul.msk.f32.gmra.mxu3 %vm1296_vm6, %v1883_v63  ;;  %v3685_v12 = vunpack.i.h.bf16 %v3683_v43  ;;  %v1142_v63 = vld [vmem:[%s5043_s12 + $0x8] sm:$0xff]  ;;  %v1141_v43 = vld [vmem:[%s5043_s12] sm:$0xff] }
 0x6f0   : > { %v3505_v3 = vadd.f32 -1.0, %v3775_v8 }
 0x6f1   : > { %1727 = vmatpush.msra.mxu1 %v3684_v10 }
 0x6f2   : > { %v1384_v15 = vsel %vm1374_vm5, %v1368_v50, %v3505_v3 }
 0x6f3   : > { %3513 = vmatmul.msk.f32.vlgmr.msra.gmra.mxu0 %vm1296_vm6, %v1384_v15  ;;  %1728 = vmatpush.msra.mxu1 %v3685_v12 }
 0x6f4   : > { %3515 = vmatmul.msk.f32.vlgmr.msra.gmra.mxu1 %vm1296_vm6, %v1685_v28 }
 0x6f5   : > { %1976 = vmatpush.msrb.mxu1 %v1148_v1 }
 0x6f7   : > { %1977 = vmatpush.msrb.mxu1 %v1147_v2 }
 0x6f9   : > { %1978 = vmatpush.msrb.mxu1 %v1146_v58 }
 0x6fb   : > { %1979 = vmatpush.msrb.mxu1 %v1145_v57 }
 0x6fc   : > { %3516 = vmatmul.msk.f32.gmra.mxu1 %vm1296_vm6, %v1700_v21 }
 0x6fd   : > { %1980 = vmatpush.msrb.mxu1 %v1144_v4 }
 0x6ff   : > { %1981 = vmatpush.msrb.mxu1 %v1143_v5 }
 0x701   : > { %1982 = vmatpush.msrb.mxu1 %v1142_v63 }
 0x703   : > { %1983 = vmatpush.msrb.mxu1 %v1141_v43 }
 0x70e   : > { %v1371_v22 = vpop.f32.mrf.mxu1 }
 0x70f   : > { %v1377_v23 = vmin.f32 %v1371_v22, 0.0  ;;  %vm1375_vm10 = vcmp.gt.f32.partialorder %v1371_v22, 0.0 }
 0x711   : > { %v1380_v24 = vmul.f32 1.442695, %v1377_v23 }
 0x713   : > { %3776 = vpow2.f32 %v1380_v24 }
 0x719   : > { %v3777_v42 = vpop.eup %3776 }
 0x71a   : > { %v3506_v25 = vadd.f32 -1.0, %v3777_v42 }
 0x71c   : > { %v1385_v26 = vsel %vm1375_vm10, %v1371_v22, %v3506_v25 }
 0x71d   : > { %3514 = vmatmul.msk.f32.gmra.mxu0 %vm1296_vm6, %v1385_v26 }
 0x762   : > { %v1913_v35 = vpop.f32.mrf.mxu3 }
 0x763   : > { %v1921_v36 = vmin.f32 %v1913_v35, 0.0  ;;  %vm1919_vm11 = vcmp.gt.f32.partialorder %v1913_v35, 0.0 }
 0x765   : > { %v1923_v38 = vmul.f32 1.442695, %v1921_v36 }
 0x767   : > { %3778 = vpow2.f32 %v1923_v38 }
 0x76d   : > { %v3779_v39 = vpop.eup %3778 }
 0x76e   : > { %v3523_v40 = vadd.f32 -1.0, %v3779_v39 }
 0x770   : > { %v1929_v41 = vsel %vm1919_vm11, %v1913_v35, %v3523_v40  ;;  %v1590_v8 = vpop.f32.mrf.mxu0 }
 0x771   : > { %v1730_v44 = vpop.f32.mrf.mxu1  ;;  %3525 = vmatmul.msk.f32.vlgmr.msrb.gmra.mxu0 %vm1296_vm6, %v1929_v41  ;;  %v1591_v10 = vadd.f32 %v1590_v8, %v1561_v29 }
 0x772   : > { %v1738_v46 = vmin.f32 %v1730_v44, 0.0  ;;  %v1916_v47 = vpop.f32.mrf.mxu3  ;;  %vm1736_vm12 = vcmp.gt.f32.partialorder %v1730_v44, 0.0 }
 0x773   : > { %v1922_v48 = vmin.f32 %v1916_v47, 0.0  ;;  %vm1920_vm13 = vcmp.gt.f32.partialorder %v1916_v47, 0.0 }
 0x774   : > { %v1740_v31 = vmul.f32 1.442695, %v1738_v46 }
 0x775   : > { %v1925_v30 = vmul.f32 1.442695, %v1922_v48 }
 0x776   : > { %3780 = vpow2.f32 %v1740_v31 }
 0x777   : > { %3782 = vpow2.f32 %v1925_v30 }
 0x779   : > { %v1733_v50 = vpop.f32.mrf.mxu1 }
 0x77a   : > { %v1739_v51 = vmin.f32 %v1733_v50, 0.0  ;;  %vm1737_vm14 = vcmp.gt.f32.partialorder %v1733_v50, 0.0 }
 0x77c   : > { %v3781_v52 = vpop.eup %3780  ;;  %v1742_v53 = vmul.f32 1.442695, %v1739_v51 }
 0x77d   : > { %v3783_v55 = vpop.eup %3782  ;;  %v3517_v56 = vadd.f32 -1.0, %v3781_v52 }
 0x77e   : > { %3784 = vpow2.f32 %v1742_v53  ;;  %v3524_v59 = vadd.f32 -1.0, %v3783_v55 }
 0x77f   : > { %v1746_v60 = vsel %vm1736_vm12, %v1730_v44, %v3517_v56 }
 0x780   : > { %3519 = vmatmul.msk.f32.vlgmr.msra.gmra.mxu2 %vm1296_vm6, %v1746_v60  ;;  %v1930_v49 = vsel %vm1920_vm13, %v1916_v47, %v3524_v59 }
 0x781   : > { %3526 = vmatmul.msk.f32.gmra.mxu0 %vm1296_vm6, %v1930_v49 }
 0x784   : > { %v3785_v61 = vpop.eup %3784 }
 0x785   : > { %v3518_v62 = vadd.f32 -1.0, %v3785_v61 }
 0x787   : > { %v1747_v0 = vsel %vm1737_vm14, %v1733_v50, %v3518_v62 }
 0x788   : > { %3520 = vmatmul.msk.f32.gmra.mxu2 %vm1296_vm6, %v1747_v0 }
 0x79a   : > { %v1593_v9 = vpop.f32.mrf.mxu0 }
 0x79b   : > { %v1594_v15 = vadd.f32 %v1593_v9, %v4551_v32 }
 0x7ee   : > { %v1954_v6 = vpop.f32.mrf.mxu0 }
 0x7fe   : > { %v1957_v19 = vpop.f32.mrf.mxu0 }
 0x803   : > { %v1771_v3 = vpop.f32.mrf.mxu2 }
 0x804   : > { %v1777_v11 = vadd.f32 %v1771_v3, %v1591_v10  ;;  %v2146_v3 = vld [vmem:[%s5044_s13 + $0x38] sm:$0xff] }
 0x805   : > { %2185 = vmatpush.msrb.mxu3 %v2146_v3 }
 0x806   : > { %v1960_v12 = vadd.f32 %v1954_v6, %v1777_v11  ;;  %v2145_v11 = vld [vmem:[%s5044_s13 + $0x30] sm:$0xff]  ;;  %v2144_v6 = vld [vmem:[%s5044_s13 + $0x28] sm:$0xff] }
 0x807   : > { %2186 = vmatpush.msrb.mxu3 %v2145_v11 }
 0x808   : > { %3527 = vmatmul.msk.f32.vlgmr.msrb.gmra.mxu1 %vm1207_vm4, %v1960_v12 }
 0x809   : > { %2187 = vmatpush.msrb.mxu3 %v2144_v6 }
 0x80b   : > { %v1774_v28 = vpop.f32.mrf.mxu2 }
 0x80c   : > { %v1778_v16 = vadd.f32 %v1774_v28, %v1594_v15  ;;  %v2142_v15 = vld [vmem:[%s5044_s13 + $0x18] sm:$0xff]  ;;  %v2141_v28 = vld [vmem:[%s5044_s13 + $0x10] sm:$0xff] }
 0x80e   : > { %v1961_v13 = vadd.f32 %v1957_v19, %v1778_v16  ;;  %v2140_v16 = vld [vmem:[%s5044_s13 + $0x8] sm:$0xff]  ;;  %v2139_v19 = vld [vmem:[%s5044_s13] sm:$0xff] }
 0x810   : > { %3528 = vmatmul.msk.f32.gmra.mxu1 %vm1207_vm4, %v1961_v13  ;;  %2118 = vmatpush.msrb.mxu2 %v1961_v13  ;;  %v2154_v13 = vld [vmem:[%s5045_s14 + $0x38] sm:$0xff] }
 0x811   : > { %2214 = vmatpush.msra.mxu0 %v2154_v13 }
 0x812   : > { %2119 = vmatpush.msrb.mxu2 %v1960_v12  ;;  %v2143_v12 = vld [vmem:[%s5044_s13 + $0x20] sm:$0xff] }
 0x813   : > { %2188 = vmatpush.msrb.mxu3 %v2143_v12 }
 0x815   : > { %2189 = vmatpush.msrb.mxu3 %v2142_v15 }
 0x817   : > { %2190 = vmatpush.msrb.mxu3 %v2141_v28 }
 0x819   : > { %2191 = vmatpush.msrb.mxu3 %v2140_v16 }
 0x81b   : > { %2192 = vmatpush.msrb.mxu3 %v2139_v19 }
 0x885   : > { %v1985_v20 = vpop.f32.mrf.mxu1 }
 0x886   : > { %1993 = vrot.lane.b32.xlu2 %v1985_v20, %s5127_s5 }
 0x88d   : > { %v1988_v21 = vpop.f32.mrf.mxu1 }
 0x88e   : > { %2036 = vperm.xlu2 %3692, %v1988_v21   ;;  %1995 = vrot.lane.b32.xlu0 %v1988_v21, %s5127_s5  ;;  %v2152_v21 = vld [vmem:[%s5045_s14 + $0x28] sm:$0xff] }
 0x896   : > { %2032 = vperm.xlu0 %3691, %v1985_v20   ;;  %3702 = vset.pattern.permute.xlu2 %v4027_v7  ;;  %v2153_v20 = vld [vmem:[%s5045_s14 + $0x30] sm:$0xff] }
 0x897   : > { %2215 = vmatpush.msra.mxu0 %v2153_v20 }
 0x899   : > { %2216 = vmatpush.msra.mxu0 %v2152_v21 }
 0x89e   : > { %3698 = vset.pattern.permute.xlu0 %v4027_v7 }
 0x8e0   : > { %v1994_v22 = vpop.permute.xlu2 %1993 }
 0x8e1   : > { %1999 = vxpose.xlu1.b32.start [1/2] (short) (narrow) %v1994_v22, 8  ;;  %v2151_v22 = vld [vmem:[%s5045_s14 + $0x20] sm:$0xff] }
 0x8e2   : > { %2217 = vmatpush.msra.mxu0 %v2151_v22 }
 0x8e8   : > { %v2037_v25 = vpop.permute.xlu2 %2036 }
 0x900   : > { %v1996_v23 = vpop.permute.xlu0 %1995 }
 0x901   : > { %2000 = vxpose.xlu1.b32.end [2/2] (short) (narrow) %v1996_v23, 8  ;;  %v2150_v23 = vld [vmem:[%s5045_s14 + $0x18] sm:$0xff] }
 0x902   : > { %2218 = vmatpush.msra.mxu0 %v2150_v23 }
 0x908   : > { %v2033_v26 = vpop.permute.xlu0 %2032 }
 0x954   : > { %3699 = vset.pattern.permute.xlu1 %v4031_v17 }
 0x99d   : > { %v2015_v24 = vpop.trf.xlu1 }
 0x99e   : > { %v2039_v42 = vperm.slane %v2015_v24, 0  ;;  %v2149_v24 = vld [vmem:[%s5045_s14 + $0x10] sm:$0xff] }
 0x99f   : > { %2219 = vmatpush.msra.mxu0 %v2149_v24 }
 0x9a0   : > { %v2040_v27 = vadd.f32 %v2039_v42, %v2033_v26  ;;  %v2041_v29 = vadd.f32 %v2039_v42, %v2037_v25  ;;  %v2148_v26 = vld [vmem:[%s5045_s14 + $0x8] sm:$0xff] }
 0x9a1   : > { %2220 = vmatpush.msra.mxu0 %v2148_v26 }
 0x9a2   : > { %v2044_v54 = vmul.f32 0.2, %v2040_v27  ;;  %v2045_v32 = vmul.f32 0.2, %v2041_v29  ;;  %vm2043_vm15 = vcmp.gt.f32.partialorder %v2041_v29, 0.0  ;;  %vm2042_vm0 = vcmp.gt.f32.partialorder %v2040_v27, 0.0 }
 0x9a4   : > { %v2047_v33 = vsel %vm2043_vm15, %v2041_v29, %v2045_v32  ;;  %v2046_v34 = vsel %vm2042_vm0, %v2040_v27, %v2044_v54 }
 0x9a5   : > { %v2049_v7 = vadd.f32 %v2047_v33, %v4437_v45  ;;  %v2048_v35 = vadd.f32 %v2046_v34, %v4429_v37 }
 0x9a7   : > { %v2053_v36 = vsel %vm1296_vm6, %v2049_v7, -inf  ;;  %v2050_v38 = vsel %vm1296_vm6, %v2048_v35, -inf }
 0x9a8   : > { %2054 = vmax.xlane.f32.xlu0 %v2053_v36  ;;  %2051 = vmax.xlane.f32.xlu2 %v2050_v38 }
 0xa1b   : > { %v2052_v39 = vpop.xlane.xlu2 %2051  ;;  %v2055_v40 = vpop.xlane.xlu0 %2054 }
 0xa1c   : > { %v2056_v41 = vsub.f32 %v2048_v35, %v2052_v39  ;;  %v2057_v44 = vsub.f32 %v2049_v7, %v2055_v40  ;;  %v2147_v39 = vld [vmem:[%s5045_s14] sm:$0xff] }
 0xa1d   : > { %2221 = vmatpush.msra.mxu0 %v2147_v39 }
 0xa1e   : > { %v2058_v46 = vmul.f32 1.442695, %v2056_v41  ;;  %v2060_v47 = vmul.f32 1.442695, %v2057_v44 }
 0xa20   : > { %3786 = vpow2.f32 %v2058_v46 }
 0xa21   : > { %3788 = vpow2.f32 %v2060_v47 }
 0xa26   : > { %v3787_v48 = vpop.eup %3786 }
 0xa27   : > { %v3789_v31 = vpop.eup %3788  ;;  %v2062_v45 = vsel %vm1296_vm6, %v3787_v48, 0.0 }
 0xa28   : > { %2063 = vadd.xlane.f32.xlu2 %v2062_v45  ;;  %v2065_v37 = vsel %vm1296_vm6, %v3789_v31, 0.0 }
 0xa29   : > { %2066 = vadd.xlane.f32.xlu0 %v2065_v37 }
 0xa9b   : > { %v2064_v30 = vpop.xlane.xlu2 %2063 }
 0xa9c   : > { %3790 = vrcp.f32 %v2064_v30  ;;  %v2067_v50 = vpop.xlane.xlu0 %2066  ;;  %v2079_v59 = vand.u32 2147483648, %v2064_v30  ;;  %v2077_v61 = vand.u32 2147483647, %v2064_v30  ;;  %vm2073_vm3 = vweird.f32 %v2064_v30 }
 0xa9d   : > { %3792 = vrcp.f32 %v2067_v50  ;;  %v2094_v4 = vand.u32 2147483648, %v2067_v50  ;;  %vm2088_vm9 = vweird.f32 %v2067_v50  ;;  %v2092_v63 = vand.u32 2147483647, %v2067_v50 }
 0xa9e   : > { %v2080_v1 = vor.u32 1.1754944e-38, %v2079_v59  ;;  %vm2078_vm7 = vcmp.eq.f32.partialorder %v2077_v61, 8.507059e+37  ;;  %v4680_v61 = vld [vmem:[%s4290_s2 + $0x8] sm:$0xff] }
 0xa9f   : > { %v2095_v8 = vor.u32 1.1754944e-38, %v2094_v4  ;;  %vm2093_vm11 = vcmp.eq.f32.partialorder %v2092_v63, 8.507059e+37 }
 0xaa2   : > { %v3791_v51 = vpop.eup %3790 }
 0xaa3   : > { %v3793_v52 = vpop.eup %3792  ;;  %v2069_v53 = vmul.f32 %v3791_v51, %v2064_v30  ;;  %vm2074_vm1 = vweird.f32 %v3791_v51 }
 0xaa4   : > { %v2084_v55 = vmul.f32 %v3793_v52, %v2067_v50  ;;  %vm2075_vm5 = vmor %vm2073_vm3, %vm2074_vm1  ;;  %vm2089_vm8 = vweird.f32 %v3793_v52 }
 0xaa5   : > { %v2070_v56 = vsub.f32 1.0, %v2069_v53  ;;  %vm2090_vm10 = vmor %vm2088_vm9, %vm2089_vm8 }
 0xaa6   : > { %v2085_v60 = vsub.f32 1.0, %v2084_v55 }
 0xaa7   : > { %v2071_v49 = vmul.f32 %v3791_v51, %v2070_v56 }
 0xaa8   : > { %v2086_v62 = vmul.f32 %v3793_v52, %v2085_v60 }
 0xaa9   : > { %v2072_v0 = vadd.f32 %v3791_v51, %v2071_v49 }
 0xaaa   : > { %v2087_v58 = vadd.f32 %v3793_v52, %v2086_v62 }
 0xaab   : > { %v2076_v2 = vsel %vm2075_vm5, %v3791_v51, %v2072_v0  ;;  %v4684_v0 = vld [vmem:[%s4290_s2] sm:$0xff] }
 0xaac   : > { %v2081_v57 = vsel %vm2078_vm7, %v2080_v1, %v2076_v2  ;;  %v2091_v43 = vsel %vm2090_vm10, %v3793_v52, %v2087_v58 }
 0xaad   : > { %v2082_v5 = vmul.f32 %v3787_v48, %v2081_v57  ;;  %v2096_v9 = vsel %vm2093_vm11, %v2095_v8, %v2091_v43 }
 0xaae   : > { %v2097_v10 = vmul.f32 %v3789_v31, %v2096_v9 }
 0xaaf   : > { %3529 = vmatmul.msk.f32.vlgmr.msrb.gmra.mxu2 %vm1296_vm6, %v2082_v5 }
 0xab7   : > { %3530 = vmatmul.msk.f32.gmra.mxu2 %vm1296_vm6, %v2097_v10 }
 0xb32   : > { %v2121_v42 = vpop.f32.mrf.mxu2 }
 0xb33   : > { %v2129_v25 = vmin.f32 %v2121_v42, 0.0  ;;  %vm2127_vm12 = vcmp.gt.f32.partialorder %v2121_v42, 0.0 }
 0xb35   : > { %v2131_v27 = vmul.f32 1.442695, %v2129_v25 }
 0xb37   : > { %3794 = vpow2.f32 %v2131_v27 }
 0xb3a   : > { %v2124_v29 = vpop.f32.mrf.mxu2 }
 0xb3b   : > { %v2130_v54 = vmin.f32 %v2124_v29, 0.0  ;;  %vm2128_vm13 = vcmp.gt.f32.partialorder %v2124_v29, 0.0 }
 0xb3d   : > { %v3795_v32 = vpop.eup %3794  ;;  %v2133_v33 = vmul.f32 1.442695, %v2130_v54 }
 0xb3e   : > { %v3531_v34 = vadd.f32 -1.0, %v3795_v32 }
 0xb3f   : > { %3796 = vpow2.f32 %v2133_v33 }
 0xb40   : > { %v2137_v7 = vsel %vm2127_vm12, %v2121_v42, %v3531_v34 }
 0xb41   : > { %3533 = vmatmul.msk.f32.vlgmr.msrb.gmra.mxu3 %vm1207_vm4, %v2137_v7 }
 0xb45   : > { %v3797_v35 = vpop.eup %3796 }
 0xb46   : > { %v3532_v36 = vadd.f32 -1.0, %v3797_v35 }
 0xb48   : > { %v2138_v38 = vsel %vm2128_vm13, %v2124_v29, %v3532_v36 }
 0xb49   : > { %3534 = vmatmul.msk.f32.gmra.mxu3 %vm1207_vm4, %v2138_v38 }
 0xbc4   : > { %v2194_v40 = vpop.f32.mrf.mxu3 }
 0xbc5   : > { %3535 = vmatmul.msk.f32.vlgmr.msra.gmra.mxu0 %vm1207_vm4, %v2194_v40 }
 0xbcc   : > { %v2197_v41 = vpop.f32.mrf.mxu3 }
 0xbcd   : > { %3536 = vmatmul.msk.f32.gmra.mxu0 %vm1207_vm4, %v2197_v41  ;;  %2356 = vmatpush.msra.mxu1 %v2197_v41  ;;  %v4655_v44 = vpack.i.bf16 %v2194_v40, %v2197_v41 }
 0xbcf   : > { %3694 = vrot.lane.b32.xlu0 %v4655_v44, %s5128_s28  ;;  %2357 = vmatpush.msra.mxu1 %v2194_v40 }
 0xc41   : > { %v3695_v46 = vpop.permute.xlu0 %3694 }
 0xc42   : > { %v3696_v47 = vunpack.i.l.bf16 %v3695_v46  ;;  %v2223_v48 = vpop.f32.mrf.mxu0  ;;  %v3697_v31 = vunpack.i.h.bf16 %v3695_v46 }
 0xc43   : > { %2377 = vrot.lane.b32.xlu2 %v2223_v48, %s5129_s26  ;;  %2416 = vperm.xlu0 %3698, %v2223_v48  }
 0xc44   : > { %2508 = vmatpush.msra.mxu2 %v3696_v47 }
 0xc46   : > { %2509 = vmatpush.msra.mxu2 %v3697_v31 }
 0xc4a   : > { %v4660_v45 = vpop.f32.mrf.mxu0 }
 0xc4b   : > { %2231 = vrot.lane.b32.xlu0 %v2223_v48, %s5127_s5  ;;  %2420 = vperm.xlu2 %3702, %v4660_v45  }
 0xc4c   : > { %2379 = vrot.lane.b32.xlu1 %v4660_v45, %s5129_s26  ;;  %3700 = vset.pattern.permute.xlu0 %v4034_v18  ;;  %s5139_s26 = sld [smem:[#allocation33_spill]] }
 0xc52   : > { %s3970_s24 = scalar_lea.hbm %s5139_s26, 48 }
 0xc53   : > { %2587 = vrot.lane.b32.xlu0 %v2223_v48, %s5130_s8 }
 0xc54   : > { %2770 = vrot.lane.b32.xlu1 %v2223_v48, %s5131_s7 }
 0xc5b   : > { %2809 = vperm.xlu0 %3700, %v2223_v48  }
 0xc5c   : > { %2626 = vperm.xlu1 %3699, %v2223_v48  }
 0xc63   : > { %3701 = vset.pattern.permute.xlu0 %v4028_v14 }
 0xc64   : > { %2772 = vrot.lane.b32.xlu1 %v4660_v45, %s5131_s7  ;;  %2270 = vperm.xlu0 %3701, %v2223_v48   ;;  %s5136_s7 = sld [smem:[#allocation31_spill]] }
 0xc6c   : > { %2233 = vrot.lane.b32.xlu0 %v4660_v45, %s5127_s5 }
 0xc74   : > { %2589 = vrot.lane.b32.xlu0 %v4660_v45, %s5130_s8 }
 0xc7c   : > { %2274 = vperm.xlu0 %3701, %v4660_v45  }
 0xc84   : > { %3703 = vset.pattern.permute.xlu0 %v4031_v17 }
 0xc9d   : > { %v2378_v37 = vpop.permute.xlu2 %2377 }
 0xc9e   : > { %2383 = vxpose.xlu2.b32.start [1/2] (short) (narrow) %v2378_v37, 8 }
 0xca5   : > { %v2421_v50 = vpop.permute.xlu2 %2420 }
 0xcb5   : > { %v2417_v53 = vpop.permute.xlu0 %2416 }
 0xcbd   : > { %v2232_v58 = vpop.permute.xlu0 %2231 }
 0xcbe   : > { %v2380_v30 = vpop.permute.xlu1 %2379 }
 0xcbf   : > { %2384 = vxpose.xlu2.b32.end [2/2] (short) (narrow) %v2380_v30, 8 }
 0xcc5   : > { %v2588_v4 = vpop.permute.xlu0 %2587 }
 0xcc6   : > { %v2771_v57 = vpop.permute.xlu1 %2770 }
 0xccd   : > { %v4692_v63 = vpop.permute.xlu0 %2809 }
 0xcce   : > { %v4690_v5 = vpop.permute.xlu1 %2626 }
 0xcd6   : > { %v2773_v43 = vpop.permute.xlu1 %2772  ;;  %v4694_v8 = vpop.permute.xlu0 %2270 }
 0xcde   : > { %v2234_v9 = vpop.permute.xlu0 %2233 }
 0xce6   : > { %v2590_v10 = vpop.permute.xlu0 %2589 }
 0xcee   : > { %v4696_v3 = vpop.permute.xlu0 %2274 }
 0xd21   : > { %3704 = vset.pattern.permute.xlu2 %v4034_v18 }
 0xd50   : > { %v2399_v51 = vpop.trf.xlu2 }
 0xd51   : > { %v2423_v52 = vperm.slane %v2399_v51, 0 }
 0xd53   : > { %v2424_v55 = vadd.f32 %v2423_v52, %v2417_v53  ;;  %v2425_v56 = vadd.f32 %v2423_v52, %v2421_v50 }
 0xd55   : > { %v2428_v59 = vmul.f32 0.2, %v2424_v55  ;;  %v2429_v60 = vmul.f32 0.2, %v2425_v56  ;;  %vm2427_vm14 = vcmp.gt.f32.partialorder %v2425_v56, 0.0  ;;  %vm2426_vm15 = vcmp.gt.f32.partialorder %v2424_v55, 0.0 }
 0xd57   : > { %v2431_v49 = vsel %vm2427_vm14, %v2425_v56, %v2429_v60  ;;  %v2430_v17 = vsel %vm2426_vm15, %v2424_v55, %v2428_v59 }
 0xd58   : > { %v2433_v62 = vadd.f32 %v4680_v61, %v2431_v49  ;;  %v2432_v18 = vadd.f32 %v4684_v0, %v2430_v17 }
 0xd5a   : > { %v2437_v1 = vsel %vm1296_vm6, %v2433_v62, -inf  ;;  %v2434_v2 = vsel %vm1296_vm6, %v2432_v18, -inf }
 0xd5b   : > { %2438 = vmax.xlane.f32.xlu2 %v2437_v1  ;;  %2435 = vmax.xlane.f32.xlu0 %v2434_v2 }
 0xd73   : > { %2813 = vperm.xlu2 %3704, %v4660_v45  }
 0xd99   : > { %2776 = vxpose.xlu2.b32.start [1/2] (short) (narrow) %v2771_v57, 8 }
 0xda1   : > { %2777 = vxpose.xlu2.b32.end [2/2] (short) (narrow) %v2773_v43, 8 }
 0xdce   : > { %v2439_v11 = vpop.xlane.xlu2 %2438  ;;  %v2436_v6 = vpop.xlane.xlu0 %2435 }
 0xdcf   : > { %v2441_v12 = vsub.f32 %v2433_v62, %v2439_v11  ;;  %v2440_v15 = vsub.f32 %v2432_v18, %v2436_v6 }
 0xdd1   : > { %v2444_v28 = vmul.f32 1.442695, %v2441_v12  ;;  %v2442_v16 = vmul.f32 1.442695, %v2440_v15 }
 0xdd3   : > { %3798 = vpow2.f32 %v2444_v28 }
 0xdd4   : > { %3800 = vpow2.f32 %v2442_v16 }
 0xdd6   : > { %v2814_v37 = vpop.permute.xlu2 %2813 }
 0xdd9   : > { %v3799_v19 = vpop.eup %3798 }
 0xdda   : > { %v3801_v13 = vpop.eup %3800  ;;  %v2449_v20 = vsel %vm1296_vm6, %v3799_v19, 0.0 }
 0xddb   : > { %2450 = vadd.xlane.f32.xlu1 %v2449_v20  ;;  %v2446_v21 = vsel %vm1296_vm6, %v3801_v13, 0.0 }
 0xddc   : > { %2447 = vadd.xlane.f32.xlu0 %v2446_v21 }
 0xdf0   : > { %2630 = vperm.xlu0 %3703, %v4660_v45  }
 0xe03   : > { %3716 = vset.pattern.permute.xlu2 %v4028_v14 }
 0xe12   : > { %2593 = vxpose.xlu0.b32.start [1/2] (short) (narrow) %v2588_v4, 8 }
 0xe15   : > { %2237 = vxpose.xlu1.b32.start [1/2] (short) (narrow) %v2232_v58, 8 }
 0xe1a   : > { %2594 = vxpose.xlu0.b32.end [2/2] (short) (narrow) %v2590_v10, 8 }
 0xe1d   : > { %2238 = vxpose.xlu1.b32.end [2/2] (short) (narrow) %v2234_v9, 8 }
 0xe32   : > { %v2792_v50 = vpop.trf.xlu2 }
 0xe33   : > { %v2816_v53 = vperm.slane %v2792_v50, 0 }
 0xe35   : > { %v2817_v49 = vadd.f32 %v2816_v53, %v4692_v63  ;;  %v2818_v15 = vadd.f32 %v2816_v53, %v2814_v37 }
 0xe37   : > { %v2821_v58 = vmul.f32 0.2, %v2817_v49  ;;  %vm2819_vm14 = vcmp.gt.f32.partialorder %v2817_v49, 0.0 }
 0xe4e   : > { %v2451_v22 = vpop.xlane.xlu1 %2450 }
 0xe4f   : > { %v2448_v23 = vpop.xlane.xlu0 %2447  ;;  %3802 = vrcp.f32 %v2451_v22  ;;  %v2478_v40 = vand.u32 2147483648, %v2451_v22  ;;  %vm2472_vm8 = vweird.f32 %v2451_v22  ;;  %v2476_v46 = vand.u32 2147483647, %v2451_v22 }
 0xe50   : > { %3804 = vrcp.f32 %v2448_v23  ;;  %v2463_v54 = vand.u32 2147483648, %v2448_v23  ;;  %v2461_v33 = vand.u32 2147483647, %v2448_v23  ;;  %vm2457_vm1 = vweird.f32 %v2448_v23 }
 0xe51   : > { %v2479_v48 = vor.u32 1.1754944e-38, %v2478_v40  ;;  %vm2477_vm10 = vcmp.eq.f32.partialorder %v2476_v46, 8.507059e+37 }
 0xe52   : > { %v2464_v35 = vor.u32 1.1754944e-38, %v2463_v54  ;;  %vm2462_vm5 = vcmp.eq.f32.partialorder %v2461_v33, 8.507059e+37 }
 0xe55   : > { %v3803_v24 = vpop.eup %3802 }
 0xe56   : > { %v3805_v42 = vpop.eup %3804  ;;  %v2468_v25 = vmul.f32 %v3803_v24, %v2451_v22  ;;  %vm2473_vm7 = vweird.f32 %v3803_v24  ;;  %v2157_v22 = vld [vmem:[%s5046_s15 + $0x10] sm:$0xff] }
 0xe57   : > { %v2453_v26 = vmul.f32 %v3805_v42, %v2448_v23  ;;  %vm2458_vm0 = vweird.f32 %v3805_v42  ;;  %vm2474_vm9 = vmor %vm2472_vm8, %vm2473_vm7 }
 0xe58   : > { %v2469_v27 = vsub.f32 1.0, %v2468_v25  ;;  %vm2459_vm3 = vmor %vm2457_vm1, %vm2458_vm0  ;;  %vm2820_vm0 = vcmp.gt.f32.partialorder %v2818_v15, 0.0 }
 0xe59   : > { %v2454_v29 = vsub.f32 1.0, %v2453_v26 }
 0xe5a   : > { %v2470_v34 = vmul.f32 %v3803_v24, %v2469_v27 }
 0xe5b   : > { %v2455_v32 = vmul.f32 %v3805_v42, %v2454_v29 }
 0xe5c   : > { %v2471_v38 = vadd.f32 %v3803_v24, %v2470_v34 }
 0xe5d   : > { %v2456_v7 = vadd.f32 %v3805_v42, %v2455_v32 }
 0xe5e   : > { %v2475_v47 = vsel %vm2474_vm9, %v3803_v24, %v2471_v38 }
 0xe5f   : > { %v2460_v36 = vsel %vm2459_vm3, %v3805_v42, %v2456_v7  ;;  %v2480_v31 = vsel %vm2477_vm10, %v2479_v48, %v2475_v47 }
 0xe60   : > { %v2465_v39 = vsel %vm2462_vm5, %v2464_v35, %v2460_v36  ;;  %v2481_v45 = vmul.f32 %v3799_v19, %v2480_v31  ;;  %v2822_v19 = vmul.f32 0.2, %v2818_v15 }
 0xe61   : > { %v2466_v41 = vmul.f32 %v3801_v13, %v2465_v39  ;;  %v2158_v13 = vld [vmem:[%s5046_s15 + $0x18] sm:$0xff] }
 0xe62   : > { %v2631_v30 = vpop.permute.xlu0 %2630  ;;  %2549 = vmatpush.msra.mxu3 %v2158_v13  ;;  %v2824_v21 = vsel %vm2820_vm0, %v2818_v15, %v2822_v19 }
 0xe63   : > { %3541 = vmatmul.msk.f32.vlgmr.msra.gmra.mxu2 %vm1296_vm6, %v2466_v41  ;;  %v2826_v23 = vadd.f32 %v4680_v61, %v2824_v21 }
 0xe64   : > { %2550 = vmatpush.msra.mxu3 %v2157_v22 }
 0xe65   : > { %v2830_v24 = vsel %vm1296_vm6, %v2826_v23, -inf }
 0xe6b   : > { %3542 = vmatmul.msk.f32.gmra.mxu2 %vm1296_vm6, %v2481_v45 }
 0xe81   : > { %3715 = vset.pattern.permute.xlu0 %v4028_v14 }
 0xeb6   : > { %v2609_v51 = vpop.trf.xlu0 }
 0xeb7   : > { %v2633_v52 = vperm.slane %v2609_v51, 0 }
 0xeb9   : > { %v2634_v55 = vadd.f32 %v2633_v52, %v4690_v5  ;;  %v2253_v56 = vpop.trf.xlu1  ;;  %v2635_v10 = vadd.f32 %v2633_v52, %v2631_v30 }
 0xeba   : > { %v2277_v59 = vperm.slane %v2253_v56, 0 }
 0xebb   : > { %v2638_v60 = vmul.f32 0.2, %v2634_v55  ;;  %vm2636_vm11 = vcmp.gt.f32.partialorder %v2634_v55, 0.0  ;;  %v2639_v6 = vmul.f32 0.2, %v2635_v10  ;;  %vm2637_vm15 = vcmp.gt.f32.partialorder %v2635_v10, 0.0 }
 0xebc   : > { %v2278_v17 = vadd.f32 %v2277_v59, %v4694_v8  ;;  %v2279_v62 = vadd.f32 %v2277_v59, %v4696_v3  ;;  %v2823_v3 = vsel %vm2819_vm14, %v2817_v49, %v2821_v58 }
 0xebd   : > { %v2640_v18 = vsel %vm2636_vm11, %v2634_v55, %v2638_v60  ;;  %v2825_v11 = vadd.f32 %v4684_v0, %v2823_v3  ;;  %v2641_v28 = vsel %vm2637_vm15, %v2635_v10, %v2639_v6 }
 0xebe   : > { %v2282_v14 = vmul.f32 0.2, %v2278_v17  ;;  %v2283_v1 = vmul.f32 0.2, %v2279_v62  ;;  %v4710_v2 = vadd.f32 %v4684_v0, %v2640_v18  ;;  %vm2281_vm12 = vcmp.gt.f32.partialorder %v2279_v62, 0.0 }
 0xebf   : > { %vm2280_vm13 = vcmp.gt.f32.partialorder %v2278_v17, 0.0  ;;  %v2827_v12 = vsel %vm1296_vm6, %v2825_v11, -inf  ;;  %v2643_v16 = vadd.f32 %v4680_v61, %v2641_v28 }
 0xec0   : > { %v2644_v57 = vsel %vm1296_vm6, %v4710_v2, -inf  ;;  %v2285_v4 = vsel %vm2281_vm12, %v2279_v62, %v2283_v1  ;;  %v2284_v5 = vsel %vm2280_vm13, %v2278_v17, %v2282_v14 }
 0xec1   : > { %2645 = vmax.xlane.f32.xlu2 %v2644_v57  ;;  %v2287_v63 = vadd.f32 %v4680_v61, %v2285_v4  ;;  %v2286_v43 = vadd.f32 %v4684_v0, %v2284_v5  ;;  %v2647_v20 = vsel %vm1296_vm6, %v2643_v16, -inf }
 0xec3   : > { %v2291_v8 = vsel %vm1296_vm6, %v2287_v63, -inf  ;;  %v2288_v9 = vsel %vm1296_vm6, %v2286_v43, -inf }
 0xec4   : > { %2292 = vmax.xlane.f32.xlu0 %v2291_v8  ;;  %2289 = vmax.xlane.f32.xlu1 %v2288_v9 }
 0xecc   : > { %2828 = vmax.xlane.f32.xlu1 %v2827_v12 }
 0xed4   : > { %2648 = vmax.xlane.f32.xlu1 %v2647_v20 }
 0xedc   : > { %2831 = vmax.xlane.f32.xlu1 %v2830_v24 }
 0xee6   : > { %v2511_v42 = vpop.f32.mrf.mxu2 }
 0xee7   : > { %v2519_v25 = vmin.f32 %v2511_v42, 0.0  ;;  %vm2517_vm1 = vcmp.gt.f32.partialorder %v2511_v42, 0.0 }
 0xee9   : > { %v2521_v26 = vmul.f32 1.442695, %v2519_v25 }
 0xeeb   : > { %3806 = vpow2.f32 %v2521_v26 }
 0xeee   : > { %v2514_v27 = vpop.f32.mrf.mxu2 }
 0xeef   : > { %v2520_v29 = vmin.f32 %v2514_v27, 0.0  ;;  %vm2518_vm3 = vcmp.gt.f32.partialorder %v2514_v27, 0.0 }
 0xef1   : > { %v3807_v54 = vpop.eup %3806  ;;  %v2523_v32 = vmul.f32 1.442695, %v2520_v29 }
 0xef2   : > { %v3543_v33 = vadd.f32 -1.0, %v3807_v54 }
 0xef3   : > { %3808 = vpow2.f32 %v2523_v32 }
 0xef4   : > { %v2527_v34 = vsel %vm2517_vm1, %v2511_v42, %v3543_v33 }
 0xef5   : > { %3545 = vmatmul.msk.f32.vlgmr.msra.gmra.mxu3 %vm1296_vm6, %v2527_v34 }
 0xef9   : > { %v3809_v7 = vpop.eup %3808 }
 0xefa   : > { %v3544_v35 = vadd.f32 -1.0, %v3809_v7 }
 0xefc   : > { %v2528_v36 = vsel %vm2518_vm3, %v2514_v27, %v3544_v35 }
 0xefd   : > { %3546 = vmatmul.msk.f32.gmra.mxu3 %vm1296_vm6, %v2528_v36 }
 0xf34   : > { %v2646_v40 = vpop.xlane.xlu2 %2645 }
 0xf35   : > { %v2650_v31 = vsub.f32 %v4710_v2, %v2646_v40 }
 0xf37   : > { %v2293_v38 = vpop.xlane.xlu0 %2292  ;;  %v2290_v39 = vpop.xlane.xlu1 %2289  ;;  %v2652_v45 = vmul.f32 1.442695, %v2650_v31 }
 0xf38   : > { %v2295_v41 = vsub.f32 %v2287_v63, %v2293_v38  ;;  %v2294_v46 = vsub.f32 %v2286_v43, %v2290_v39 }
 0xf3a   : > { %v2298_v47 = vmul.f32 1.442695, %v2295_v41  ;;  %v2296_v48 = vmul.f32 1.442695, %v2294_v46 }
 0xf3c   : > { %3810 = vpow2.f32 %v2298_v47 }
 0xf3d   : > { %3812 = vpow2.f32 %v2296_v48 }
 0xf3e   : > { %3814 = vpow2.f32 %v2652_v45 }
 0xf3f   : > { %v2829_v37 = vpop.xlane.xlu1 %2828 }
 0xf40   : > { %v2833_v30 = vsub.f32 %v2825_v11, %v2829_v37 }
 0xf42   : > { %v4733_v50 = vpop.eup %3810  ;;  %v2835_v51 = vmul.f32 1.442695, %v2833_v30 }
 0xf43   : > { %v4735_v52 = vpop.eup %3812  ;;  %v2303_v53 = vsel %vm1296_vm6, %v4733_v50, 0.0 }
 0xf44   : > { %3816 = vpow2.f32 %v2835_v51  ;;  %2304 = vadd.xlane.f32.xlu1 %v2303_v53  ;;  %v2300_v55 = vsel %vm1296_vm6, %v4735_v52, 0.0  ;;  %v4741_v60 = vpop.eup %3814 }
 0xf45   : > { %2301 = vadd.xlane.f32.xlu0 %v2300_v55  ;;  %v2656_v18 = vsel %vm1296_vm6, %v4741_v60, 0.0 }
 0xf47   : > { %v2649_v56 = vpop.xlane.xlu1 %2648 }
 0xf48   : > { %v2651_v59 = vsub.f32 %v2643_v16, %v2649_v56 }
 0xf4a   : > { %v4743_v49 = vpop.eup %3816  ;;  %v2654_v17 = vmul.f32 1.442695, %v2651_v59 }
 0xf4b   : > { %v2839_v62 = vsel %vm1296_vm6, %v4743_v49, 0.0 }
 0xf4c   : > { %3818 = vpow2.f32 %v2654_v17  ;;  %2840 = vadd.xlane.f32.xlu1 %v2839_v62 }
 0xf4d   : > { %2657 = vadd.xlane.f32.xlu0 %v2656_v18 }
 0xf4f   : > { %v2832_v14 = vpop.xlane.xlu1 %2831 }
 0xf50   : > { %v2834_v1 = vsub.f32 %v2826_v23, %v2832_v14 }
 0xf52   : > { %v4749_v2 = vpop.eup %3818  ;;  %v2837_v58 = vmul.f32 1.442695, %v2834_v1 }
 0xf53   : > { %v2659_v57 = vsel %vm1296_vm6, %v4749_v2, 0.0 }
 0xf54   : > { %3820 = vpow2.f32 %v2837_v58  ;;  %2660 = vadd.xlane.f32.xlu2 %v2659_v57 }
 0xf5a   : > { %v4753_v4 = vpop.eup %3820 }
 0xf5b   : > { %v2842_v5 = vsel %vm1296_vm6, %v4753_v4, 0.0 }
 0xf5c   : > { %2843 = vadd.xlane.f32.xlu0 %v2842_v5 }
 0xf65   : > { %3706 = vrot.lane.b32.xlu1 %v4655_v44, %s5132_s22  ;;  %s5138_s22 = sld [smem:[#allocation32_spill]] }
 0xf6c   : > { %3711 = vrot.lane.b32.xlu2 %v4655_v44, %s5133_s3  ;;  %s3585_s3 = sshll.u32 %s4201_s9, 4  ;;  %s3344_s9 = scalar_lea.sflag [#allocation4], %s4284_s1 }
 0xf6d   : > { %s3355_s8 = scalar_lea.hbm %s5139_s26, %s3585_s3 }
 0xfb7   : > { %v2305_v63 = vpop.xlane.xlu1 %2304 }
 0xfb8   : > { %v2302_v43 = vpop.xlane.xlu0 %2301  ;;  %3822 = vrcp.f32 %v2305_v63  ;;  %vm2326_vm11 = vweird.f32 %v2305_v63  ;;  %v2332_v29 = vand.u32 2147483648, %v2305_v63  ;;  %v2330_v7 = vand.u32 2147483647, %v2305_v63 }
 0xfb9   : > { %3824 = vrcp.f32 %v2302_v43  ;;  %v2315_v28 = vand.u32 2147483647, %v2302_v43  ;;  %v2317_v16 = vand.u32 2147483648, %v2302_v43  ;;  %vm2311_vm7 = vweird.f32 %v2302_v43 }
 0xfba   : > { %v2333_v40 = vor.u32 1.1754944e-38, %v2332_v29  ;;  %vm2331_vm0 = vcmp.eq.f32.partialorder %v2330_v7, 8.507059e+37  ;;  %v2159_v29 = vld [vmem:[%s5046_s15 + $0x20] sm:$0xff] }
 0xfbb   : > { %vm2316_vm9 = vcmp.eq.f32.partialorder %v2315_v28, 8.507059e+37  ;;  %v2318_v22 = vor.u32 1.1754944e-38, %v2317_v16 }
 0xfbe   : > { %v3823_v8 = vpop.eup %3822 }
 0xfbf   : > { %v3825_v9 = vpop.eup %3824  ;;  %v2322_v10 = vmul.f32 %v3823_v8, %v2305_v63  ;;  %v2841_v3 = vpop.xlane.xlu1 %2840  ;;  %vm2327_vm10 = vweird.f32 %v3823_v8 }
 0xfc0   : > { %v2307_v11 = vmul.f32 %v3825_v9, %v2302_v43  ;;  %v4761_v6 = vpop.xlane.xlu0 %2657  ;;  %3826 = vrcp.f32 %v2841_v3  ;;  %vm2312_vm5 = vweird.f32 %v3825_v9  ;;  %v2856_v33 = vand.u32 2147483648, %v2841_v3  ;;  %vm4773_vm13 = vmor %vm2326_vm11, %vm2327_vm10 }
 0xfc1   : > { %v2323_v12 = vsub.f32 1.0, %v2322_v10  ;;  %3828 = vrcp.f32 %v4761_v6  ;;  %vm2313_vm8 = vmor %vm2311_vm7, %vm2312_vm5  ;;  %v2854_v36 = vand.u32 2147483647, %v2841_v3  ;;  %vm2850_vm14 = vweird.f32 %v2841_v3 }
 0xfc2   : > { %v2308_v15 = vsub.f32 1.0, %v2307_v11  ;;  %v2857_v48 = vor.u32 1.1754944e-38, %v2856_v33  ;;  %v2673_v59 = vand.u32 2147483648, %v4761_v6  ;;  %vm2667_vm5 = vweird.f32 %v4761_v6 }
 0xfc3   : > { %v2324_v44 = vmul.f32 %v3823_v8, %v2323_v12  ;;  %vm2855_vm1 = vcmp.eq.f32.partialorder %v2854_v36, 8.507059e+37  ;;  %v2671_v18 = vand.u32 2147483647, %v4761_v6 }
 0xfc4   : > { %v2309_v19 = vmul.f32 %v3825_v9, %v2308_v15  ;;  %v2674_v57 = vor.u32 1.1754944e-38, %v2673_v59 }
 0xfc5   : > { %v2325_v26 = vadd.f32 %v3823_v8, %v2324_v44 }
 0xfc6   : > { %v3827_v13 = vpop.eup %3826  ;;  %v2310_v20 = vadd.f32 %v3825_v9, %v2309_v19 }
 0xfc7   : > { %v4764_v21 = vpop.eup %3828  ;;  %v2846_v23 = vmul.f32 %v3827_v13, %v2841_v3  ;;  %v4766_v24 = vpop.xlane.xlu2 %2660  ;;  %vm2851_vm12 = vweird.f32 %v3827_v13  ;;  %v2329_v39 = vsel %vm4773_vm13, %v3823_v8, %v2325_v26  ;;  %v2161_v26 = vld [vmem:[%s5046_s15 + $0x30] sm:$0xff] }
 0xfc8   : > { %v2314_v42 = vsel %vm2313_vm8, %v3825_v9, %v2310_v20  ;;  %v2663_v25 = vmul.f32 %v4764_v21, %v4761_v6  ;;  %3830 = vrcp.f32 %v4766_v24  ;;  %vm2852_vm15 = vmor %vm2850_vm14, %vm2851_vm12  ;;  %v2334_v51 = vsel %vm2331_vm0, %v2333_v40, %v2329_v39 }
 0xfc9   : > { %v2319_v27 = vsel %vm2316_vm9, %v2318_v22, %v2314_v42  ;;  %v2847_v54 = vsub.f32 1.0, %v2846_v23  ;;  %vm2668_vm3 = vweird.f32 %v4764_v21  ;;  %v2335_v62 = vmul.f32 %v4733_v50, %v2334_v51  ;;  %v2155_v42 = vld [vmem:[%s5046_s15] sm:$0xff] }
 0xfca   : > { %v2664_v32 = vsub.f32 1.0, %v2663_v25  ;;  %v2320_v34 = vmul.f32 %v4735_v52, %v2319_v27  ;;  %vm2669_vm7 = vmor %vm2667_vm5, %vm2668_vm3  ;;  %vm2672_vm8 = vcmp.eq.f32.partialorder %v2671_v18, 8.507059e+37  ;;  %vm2682_vm10 = vweird.f32 %v4766_v24  ;;  %v4817_v25 = vpop.f32.mrf.mxu3 }
 0xfcb   : > { %v2848_v35 = vmul.f32 %v3827_v13, %v2847_v54  ;;  %v2686_v12 = vand.u32 2147483647, %v4766_v24 }
 0xfcc   : > { %3537 = vmatmul.msk.f32.vlgmr.msra.gmra.mxu1 %vm1296_vm6, %v2320_v34  ;;  %v2665_v41 = vmul.f32 %v4764_v21, %v2664_v32 }
 0xfcd   : > { %v2849_v46 = vadd.f32 %v3827_v13, %v2848_v35 }
 0xfce   : > { %v4781_v47 = vpop.eup %3830  ;;  %v2666_v55 = vadd.f32 %v4764_v21, %v2665_v41 }
 0xfcf   : > { %v2853_v31 = vsel %vm2852_vm15, %v3827_v13, %v2849_v46  ;;  %v2678_v45 = vmul.f32 %v4781_v47, %v4766_v24  ;;  %v3712_v37 = vpop.permute.xlu2 %3711  ;;  %v2844_v30 = vpop.xlane.xlu0 %2843  ;;  %vm2683_vm9 = vweird.f32 %v4781_v47  ;;  %vm2687_vm15 = vcmp.eq.f32.partialorder %v2686_v12, 8.507059e+37  ;;  %v2164_v12 = vld [vmem:[%s5047_s16 + $0x8] sm:$0xff] }
 0xfd0   : > { %v2858_v52 = vsel %vm2855_vm1, %v2857_v48, %v2853_v31  ;;  %v3713_v53 = vunpack.i.l.bf16 %v3712_v37  ;;  %3832 = vrcp.f32 %v2844_v30  ;;  %v3714_v17 = vunpack.i.h.bf16 %v3712_v37  ;;  %vm2684_vm12 = vmor %vm2682_vm10, %vm2683_vm9 }
 0xfd1   : > { %v2679_v56 = vsub.f32 1.0, %v2678_v45  ;;  %v2859_v14 = vmul.f32 %v4743_v49, %v2858_v52  ;;  %v2670_v1 = vsel %vm2669_vm7, %v4764_v21, %v2666_v55  ;;  %v2688_v49 = vand.u32 2147483648, %v4766_v24  ;;  %v2156_v24 = vld [vmem:[%s5046_s15 + $0x8] sm:$0xff] }
 0xfd2   : > { %2901 = vmatpush.msrb.mxu3 %v3713_v53  ;;  %v2675_v63 = vsel %vm2672_vm8, %v2674_v57, %v2670_v1  ;;  %v2871_v11 = vand.u32 2147483648, %v2844_v30  ;;  %v2869_v28 = vand.u32 2147483647, %v2844_v30  ;;  %vm2865_vm13 = vweird.f32 %v2844_v30  ;;  %2578 = vmatpush.msrb.mxu0 %v2156_v24  ;;  %v4828_v33 = vpop.f32.mrf.mxu3 }
 0xfd3   : > { %v2680_v58 = vmul.f32 %v4781_v47, %v2679_v56  ;;  %v2676_v6 = vmul.f32 %v4741_v60, %v2675_v63  ;;  %v2689_v19 = vor.u32 1.1754944e-38, %v2688_v49  ;;  %v2169_v49 = vld [vmem:[%s5047_s16 + $0x30] sm:$0xff] }
 0xfd4   : > { %3538 = vmatmul.msk.f32.gmra.mxu1 %vm1296_vm6, %v2335_v62  ;;  %2902 = vmatpush.msrb.mxu3 %v3714_v17  ;;  %v2872_v13 = vor.u32 1.1754944e-38, %v2871_v11  ;;  %vm2870_vm0 = vcmp.eq.f32.partialorder %v2869_v28, 8.507059e+37  ;;  %v2166_v11 = vld [vmem:[%s5047_s16 + $0x18] sm:$0xff] }
 0xfd5   : > { %3555 = vmatmul.msk.f32.vlgmr.msrb.gmra.mxu3 %vm1296_vm6, %v2859_v14  ;;  %v2681_v9 = vadd.f32 %v4781_v47, %v2680_v58  ;;  %2579 = vmatpush.msrb.mxu0 %v2155_v42 }
 0xfd6   : > { %v3833_v5 = vpop.eup %3832 }
 0xfd7   : > { %v3707_v50 = vpop.permute.xlu1 %3706  ;;  %v2861_v43 = vmul.f32 %v3833_v5, %v2844_v30  ;;  %vm2866_vm11 = vweird.f32 %v3833_v5  ;;  %v2685_v16 = vsel %vm2684_vm12, %v4781_v47, %v2681_v9  ;;  %v2170_v9 = vld [vmem:[%s5047_s16 + $0x38] sm:$0xff] }
 0xfd8   : > { %v3708_v8 = vunpack.i.l.bf16 %v3707_v50  ;;  %v3709_v3 = vunpack.i.h.bf16 %v3707_v50  ;;  %vm2867_vm14 = vmor %vm2865_vm13, %vm2866_vm11  ;;  %v2690_v60 = vsel %vm2687_vm15, %v2689_v19, %v2685_v16 }
 0xfd9   : > { %v2862_v10 = vsub.f32 1.0, %v2861_v43  ;;  %v2691_v23 = vmul.f32 %v4749_v2, %v2690_v60  ;;  %v2160_v2 = vld [vmem:[%s5046_s15 + $0x28] sm:$0xff] }
 0xfda   : > { %2718 = vmatpush.msrb.mxu1 %v3708_v8  ;;  %2759 = vmatpush.msrb.mxu2 %v2160_v2 }
 0xfdb   : > { %v2863_v15 = vmul.f32 %v3833_v5, %v2862_v10  ;;  %v2168_v10 = vld [vmem:[%s5047_s16 + $0x28] sm:$0xff] }
 0xfdc   : > { %2719 = vmatpush.msrb.mxu1 %v3709_v3  ;;  %2760 = vmatpush.msrb.mxu2 %v2159_v29  ;;  %v2167_v3 = vld [vmem:[%s5047_s16 + $0x20] sm:$0xff] }
 0xfdd   : > { %3549 = vmatmul.msk.f32.vlgmr.msrb.gmra.mxu1 %vm1296_vm6, %v2676_v6  ;;  %v2864_v44 = vadd.f32 %v3833_v5, %v2863_v15  ;;  %v2165_v6 = vld [vmem:[%s5047_s16 + $0x10] sm:$0xff]  ;;  %v2163_v15 = vld [vmem:[%s5047_s16] sm:$0xff] }
 0xfde   : > { %2967 = vmatpush.msra.mxu1 %v2170_v9 }
 0xfdf   : > { %v2868_v20 = vsel %vm2867_vm14, %v3833_v5, %v2864_v44 }
 0xfe0   : > { %v2873_v21 = vsel %vm2870_vm0, %v2872_v13, %v2868_v20  ;;  %2968 = vmatpush.msra.mxu1 %v2169_v49 }
 0xfe1   : > { %v2874_v22 = vmul.f32 %v4753_v4, %v2873_v21  ;;  %v2162_v4 = vld [vmem:[%s5046_s15 + $0x38] sm:$0xff] }
 0xfe2   : > { %2942 = vmatpush.msra.mxu0 %v2162_v4  ;;  %2969 = vmatpush.msra.mxu1 %v2168_v10 }
 0xfe3   : > { %3556 = vmatmul.msk.f32.gmra.mxu3 %vm1296_vm6, %v2874_v22 }
 0xfe4   : > { %2943 = vmatpush.msra.mxu0 %v2161_v26  ;;  %2970 = vmatpush.msra.mxu1 %v2167_v3 }
 0xfe5   : > { %3550 = vmatmul.msk.f32.gmra.mxu1 %vm1296_vm6, %v2691_v23 }
 0xfe6   : > { %2971 = vmatpush.msra.mxu1 %v2166_v11 }
 0xfe8   : > { %2972 = vmatpush.msra.mxu1 %v2165_v6 }
 0xfea   : > { %2973 = vmatpush.msra.mxu1 %v2164_v12 }
 0xfec   : > { %2974 = vmatpush.msra.mxu1 %v2163_v15 }
0x1049   : > { %v2359_v27 = vpop.f32.mrf.mxu1 }
0x104a   : > { %v2367_v54 = vmin.f32 %v2359_v27, 0.0  ;;  %vm2365_vm1 = vcmp.gt.f32.partialorder %v2359_v27, 0.0 }
0x104c   : > { %v2369_v32 = vmul.f32 1.442695, %v2367_v54 }
0x104e   : > { %3834 = vpow2.f32 %v2369_v32 }
0x1051   : > { %v2362_v34 = vpop.f32.mrf.mxu1 }
0x1052   : > { %v2368_v7 = vmin.f32 %v2362_v34, 0.0  ;;  %vm2366_vm3 = vcmp.gt.f32.partialorder %v2362_v34, 0.0 }
0x1054   : > { %v3835_v35 = vpop.eup %3834  ;;  %v2371_v36 = vmul.f32 1.442695, %v2368_v7 }
0x1055   : > { %v3539_v38 = vadd.f32 -1.0, %v3835_v35 }
0x1056   : > { %3836 = vpow2.f32 %v2371_v36 }
0x1057   : > { %v2375_v39 = vsel %vm2365_vm1, %v2359_v27, %v3539_v38 }
0x1058   : > { %3547 = vmatmul.msk.f32.vlgmr.msrb.gmra.mxu0 %vm1296_vm6, %v2375_v39  ;;  %v2904_v40 = vpop.f32.mrf.mxu3 }
0x1059   : > { %v2912_v41 = vmin.f32 %v2904_v40, 0.0  ;;  %vm2910_vm5 = vcmp.gt.f32.partialorder %v2904_v40, 0.0 }
0x105a   : > { %v2721_v46 = vpop.f32.mrf.mxu1 }
0x105b   : > { %v2914_v47 = vmul.f32 1.442695, %v2912_v41  ;;  %v2729_v48 = vmin.f32 %v2721_v46, 0.0  ;;  %vm2727_vm7 = vcmp.gt.f32.partialorder %v2721_v46, 0.0 }
0x105c   : > { %v3837_v31 = vpop.eup %3836 }
0x105d   : > { %3838 = vpow2.f32 %v2914_v47  ;;  %v2731_v45 = vmul.f32 1.442695, %v2729_v48  ;;  %v3540_v37 = vadd.f32 -1.0, %v3837_v31 }
0x105f   : > { %3840 = vpow2.f32 %v2731_v45  ;;  %v2376_v30 = vsel %vm2366_vm3, %v2362_v34, %v3540_v37 }
0x1060   : > { %3548 = vmatmul.msk.f32.gmra.mxu0 %vm1296_vm6, %v2376_v30 }
0x1062   : > { %v2724_v51 = vpop.f32.mrf.mxu1 }
0x1063   : > { %v3839_v52 = vpop.eup %3838  ;;  %v2730_v53 = vmin.f32 %v2724_v51, 0.0  ;;  %vm2728_vm8 = vcmp.gt.f32.partialorder %v2724_v51, 0.0 }
0x1064   : > { %v3557_v55 = vadd.f32 -1.0, %v3839_v52 }
0x1065   : > { %v3841_v56 = vpop.eup %3840  ;;  %v2733_v59 = vmul.f32 1.442695, %v2730_v53 }
0x1066   : > { %v2920_v17 = vsel %vm2910_vm5, %v2904_v40, %v3557_v55  ;;  %v3551_v62 = vadd.f32 -1.0, %v3841_v56  ;;  %v2907_v18 = vpop.f32.mrf.mxu3 }
0x1067   : > { %3842 = vpow2.f32 %v2733_v59  ;;  %v2913_v1 = vmin.f32 %v2907_v18, 0.0  ;;  %vm2911_vm9 = vcmp.gt.f32.partialorder %v2907_v18, 0.0 }
0x1068   : > { %v2737_v14 = vsel %vm2727_vm7, %v2721_v46, %v3551_v62  ;;  %3559 = vmatmul.msk.f32.vlgmr.msra.gmra.mxu0 %vm1296_vm6, %v2920_v17 }
0x1069   : > { %3553 = vmatmul.msk.f32.vlgmr.msrb.gmra.mxu2 %vm1296_vm6, %v2737_v14  ;;  %v2916_v58 = vmul.f32 1.442695, %v2913_v1 }
0x106b   : > { %3844 = vpow2.f32 %v2916_v58 }
0x106d   : > { %v3843_v57 = vpop.eup %3842 }
0x106e   : > { %v3552_v5 = vadd.f32 -1.0, %v3843_v57 }
0x1070   : > { %v2738_v50 = vsel %vm2728_vm8, %v2724_v51, %v3552_v5 }
0x1071   : > { %3554 = vmatmul.msk.f32.gmra.mxu2 %vm1296_vm6, %v2738_v50  ;;  %v3845_v63 = vpop.eup %3844 }
0x1072   : > { %v3558_v43 = vadd.f32 -1.0, %v3845_v63 }
0x1074   : > { %v2921_v8 = vsel %vm2911_vm9, %v2907_v18, %v3558_v43 }
0x1075   : > { %3560 = vmatmul.msk.f32.gmra.mxu0 %vm1296_vm6, %v2921_v8 }
0x10d5   : > { %v2581_v28 = vpop.f32.mrf.mxu0 }
0x10d6   : > { %v2582_v19 = vadd.f32 %v2581_v28, %v4817_v25  ;;  %v3137_v28 = vld [vmem:[%s5048_s17 + $0x38] sm:$0xff] }
0x10d7   : > { %3156 = vmatpush.msra.mxu3 %v3137_v28 }
0x10dd   : > { %v2584_v16 = vpop.f32.mrf.mxu0 }
0x10de   : > { %v2585_v21 = vadd.f32 %v2584_v16, %v4828_v33  ;;  %v3136_v16 = vld [vmem:[%s5048_s17 + $0x30] sm:$0xff] }
0x10df   : > { %3157 = vmatpush.msra.mxu3 %v3136_v16 }
0x10e5   : > { %v2945_v20 = vpop.f32.mrf.mxu0 }
0x10ec   : > { %v2762_v44 = vpop.f32.mrf.mxu2 }
0x10ed   : > { %v2768_v13 = vadd.f32 %v2762_v44, %v2582_v19  ;;  %v3135_v19 = vld [vmem:[%s5048_s17 + $0x28] sm:$0xff]  ;;  %v3134_v44 = vld [vmem:[%s5048_s17 + $0x20] sm:$0xff] }
0x10ee   : > { %3158 = vmatpush.msra.mxu3 %v3135_v19 }
0x10ef   : > { %v2951_v60 = vadd.f32 %v2945_v20, %v2768_v13  ;;  %v3133_v13 = vld [vmem:[%s5048_s17 + $0x18] sm:$0xff]  ;;  %v3132_v20 = vld [vmem:[%s5048_s17 + $0x10] sm:$0xff] }
0x10f0   : > { %3159 = vmatpush.msra.mxu3 %v3134_v44 }
0x10f1   : > { %3561 = vmatmul.msk.f32.vlgmr.msra.gmra.mxu1 %vm1207_vm4, %v2951_v60 }
0x10f2   : > { %v2948_v24 = vpop.f32.mrf.mxu0  ;;  %3160 = vmatpush.msra.mxu3 %v3133_v13 }
0x10f4   : > { %v2765_v22 = vpop.f32.mrf.mxu2  ;;  %3161 = vmatpush.msra.mxu3 %v3132_v20 }
0x10f5   : > { %v2769_v23 = vadd.f32 %v2765_v22, %v2585_v21  ;;  %v3130_v21 = vld [vmem:[%s5048_s17] sm:$0xff]  ;;  %v3180_v22 = vld [vmem:[%s5050_s19 + $0x38] sm:$0xff] }
0x10f6   : > { %3226 = vmatpush.msrb.mxu0 %v3180_v22 }
0x10f7   : > { %v2952_v42 = vadd.f32 %v2948_v24, %v2769_v23  ;;  %v3198_v23 = vld [vmem:[#allocation7 + $0x38] sm:$0xff]  ;;  %v3179_v24 = vld [vmem:[%s5050_s19 + $0x30] sm:$0xff] }
0x10f8   : > { %3227 = vmatpush.msrb.mxu0 %v3179_v24  ;;  %v3724_v24 = vld [vmem:[%s5137_s29] ss:$0 sm:$0xff]  ;;  %s3358_s29 = sshll.u32 %s3355_s8, 4  ;;  %s3359_s29 = int_to_ptr.hbm [resolvable:$true] %s3358_s29 }
0x10f9   : > { %3562 = vmatmul.msk.f32.gmra.mxu1 %vm1207_vm4, %v2952_v42  ;;  %3109 = vmatpush.msra.mxu2 %v2952_v42  ;;  %v3197_v42 = vld [vmem:[#allocation7 + $0x30] sm:$0xff]  ;;  %s3964_s10 = sshra.s32 %s3359_s29, 4  ;;  %s3965_s10 = int_to_ptr.hbm [resolvable:$true] %s3964_s10 }
0x10fa   : > { %s3966_s0 = scalar_lea.hbm %s3965_s10, 16  ;;  %p3971_p7 = scmp.lt.s32.totalorder %s3965_s10, %s5139_s26 }
0x10fb   : > { %3110 = vmatpush.msra.mxu2 %v2951_v60  ;;  %v3131_v60 = vld [vmem:[%s5048_s17 + $0x8] sm:$0xff]  ;;  %p3967_p1 = scmp.ne.s32.totalorder %s3965_s10, %s3966_s0  ;;  %p3972_p9 = scmp.lt.s32.totalorder %s3970_s24, %s3966_s0 }
0x10fc   : > { %3162 = vmatpush.msra.mxu3 %v3131_v60 }
0x10fd   : > { %3288 = vmatpush.msrb.mxu2 %v3198_v23  ;;  %p3968_p4 = pnand %p3967_p1, %p4251_p0  ;;  %p3973_p10 = por %p3972_p9, %p3971_p7 }
0x10fe   : > { %3163 = vmatpush.msra.mxu3 %v3130_v21 }
0x10ff   : > { %3289 = vmatpush.msrb.mxu2 %v3197_v42  ;;  %v3725_v42 = vld [vmem:[%s5138_s22] ss:$0 sm:$0xff]  ;;  %p3969_p2 = pneg %p3968_p4 }
0x1101   : > { %p3974_p11 = pnand %p3973_p10, %p3969_p2 }
0x116e   : > { %v2976_v4 = vpop.f32.mrf.mxu1 }
0x116f   : > { %2984 = vrot.lane.b32.xlu0 %v2976_v4, %s5127_s5 }
0x1176   : > { %v2979_v25 = vpop.f32.mrf.mxu1 }
0x1177   : > { %3023 = vperm.xlu0 %3715, %v2976_v4   ;;  %3027 = vperm.xlu2 %3716, %v2979_v25   ;;  %v3178_v4 = vld [vmem:[%s5050_s19 + $0x28] sm:$0xff] }
0x1178   : > { %2986 = vrot.lane.b32.xlu1 %v2979_v25, %s5127_s5  ;;  %v3196_v25 = vld [vmem:[#allocation7 + $0x28] sm:$0xff]  ;;  %3228 = vmatpush.msrb.mxu0 %v3178_v4 }
0x1179   : > { %3290 = vmatpush.msrb.mxu2 %v3196_v25 }
0x11d1   : > { %v3028_v54 = vpop.permute.xlu2 %3027 }
0x11e1   : > { %v2985_v2 = vpop.permute.xlu0 %2984 }
0x11e2   : > { %2990 = vxpose.xlu1.b32.start [1/2] (short) (narrow) %v2985_v2, 8  ;;  %v3177_v2 = vld [vmem:[%s5050_s19 + $0x20] sm:$0xff] }
0x11e3   : > { %3229 = vmatpush.msrb.mxu0 %v3177_v2 }
0x11e9   : > { %v3024_v32 = vpop.permute.xlu0 %3023 }
0x11ea   : > { %v2987_v26 = vpop.permute.xlu1 %2986 }
0x11eb   : > { %2991 = vxpose.xlu1.b32.end [2/2] (short) (narrow) %v2987_v26, 8  ;;  %v3195_v26 = vld [vmem:[#allocation7 + $0x20] sm:$0xff] }
0x11ec   : > { %3291 = vmatpush.msrb.mxu2 %v3195_v26 }
0x1287   : > { %v3006_v27 = vpop.trf.xlu1 }
0x1288   : > { %v3030_v29 = vperm.slane %v3006_v27, 0  ;;  %v3176_v27 = vld [vmem:[%s5050_s19 + $0x18] sm:$0xff] }
0x1289   : > { %3230 = vmatpush.msrb.mxu0 %v3176_v27 }
0x128a   : > { %v3031_v33 = vadd.f32 %v3030_v29, %v3024_v32  ;;  %v3032_v34 = vadd.f32 %v3030_v29, %v3028_v54  ;;  %v3194_v29 = vld [vmem:[#allocation7 + $0x18] sm:$0xff] }
0x128b   : > { %3292 = vmatpush.msrb.mxu2 %v3194_v29 }
0x128c   : > { %v3035_v7 = vmul.f32 0.2, %v3031_v33  ;;  %v3036_v35 = vmul.f32 0.2, %v3032_v34  ;;  %vm3034_vm10 = vcmp.gt.f32.partialorder %v3032_v34, 0.0  ;;  %vm3033_vm11 = vcmp.gt.f32.partialorder %v3031_v33, 0.0 }
0x128e   : > { %v3038_v36 = vsel %vm3034_vm10, %v3032_v34, %v3036_v35  ;;  %v3037_v38 = vsel %vm3033_vm11, %v3031_v33, %v3035_v7 }
0x128f   : > { %v3040_v39 = vadd.f32 %v4680_v61, %v3038_v36  ;;  %v3039_v40 = vadd.f32 %v4684_v0, %v3037_v38 }
0x1291   : > { %v3044_v41 = vsel %vm1296_vm6, %v3040_v39, -inf  ;;  %v3041_v46 = vsel %vm1296_vm6, %v3039_v40, -inf }
0x1292   : > { %3045 = vmax.xlane.f32.xlu0 %v3044_v41  ;;  %3042 = vmax.xlane.f32.xlu2 %v3041_v46 }
0x1305   : > { %v3046_v47 = vpop.xlane.xlu0 %3045  ;;  %v3043_v48 = vpop.xlane.xlu2 %3042 }
0x1306   : > { %v3048_v31 = vsub.f32 %v3040_v39, %v3046_v47  ;;  %v3047_v45 = vsub.f32 %v3039_v40, %v3043_v48  ;;  %v3175_v47 = vld [vmem:[%s5050_s19 + $0x10] sm:$0xff] }
0x1307   : > { %v3193_v48 = vld [vmem:[#allocation7 + $0x10] sm:$0xff]  ;;  %3231 = vmatpush.msrb.mxu0 %v3175_v47 }
0x1308   : > { %v3051_v37 = vmul.f32 1.442695, %v3048_v31  ;;  %v3049_v30 = vmul.f32 1.442695, %v3047_v45  ;;  %3293 = vmatpush.msrb.mxu2 %v3193_v48  ;;  %v3174_v31 = vld [vmem:[%s5050_s19 + $0x8] sm:$0xff] }
0x1309   : > { %v3192_v45 = vld [vmem:[#allocation7 + $0x8] sm:$0xff]  ;;  %3232 = vmatpush.msrb.mxu0 %v3174_v31 }
0x130a   : > { %3846 = vpow2.f32 %v3051_v37  ;;  %3294 = vmatpush.msrb.mxu2 %v3192_v45  ;;  %v3173_v37 = vld [vmem:[%s5050_s19] sm:$0xff] }
0x130b   : > { %3848 = vpow2.f32 %v3049_v30  ;;  %v3191_v30 = vld [vmem:[#allocation7] sm:$0xff]  ;;  %3233 = vmatpush.msrb.mxu0 %v3173_v37 }
0x130c   : > { %3295 = vmatpush.msrb.mxu2 %v3191_v30 }
0x1310   : > { %v3847_v51 = vpop.eup %3846 }
0x1311   : > { %v3849_v52 = vpop.eup %3848  ;;  %v3056_v61 = vsel %vm1296_vm6, %v3847_v51, 0.0 }
0x1312   : > { %3057 = vadd.xlane.f32.xlu0 %v3056_v61  ;;  %v3053_v0 = vsel %vm1296_vm6, %v3849_v52, 0.0  ;;  %v3207_v61 = vld [vmem:[%s5056_s25 + $0x38] sm:$0xff] }
0x1313   : > { %3054 = vadd.xlane.f32.xlu2 %v3053_v0  ;;  %v3187_v0 = vld [vmem:[%s5052_s21 + $0x28] sm:$0xff]  ;;  %3322 = vmatpush.msrb.mxu3 %v3207_v61 }
0x1385   : > { %v3058_v53 = vpop.xlane.xlu0 %3057 }
0x1386   : > { %3850 = vrcp.f32 %v3058_v53  ;;  %v3055_v55 = vpop.xlane.xlu2 %3054  ;;  %v3085_v9 = vand.u32 2147483648, %v3058_v53  ;;  %vm3079_vm1 = vweird.f32 %v3058_v53  ;;  %v3083_v10 = vand.u32 2147483647, %v3058_v53 }
0x1387   : > { %3852 = vrcp.f32 %v3055_v55  ;;  %v3070_v1 = vand.u32 2147483648, %v3055_v55  ;;  %v3068_v5 = vand.u32 2147483647, %v3055_v55  ;;  %vm3064_vm13 = vweird.f32 %v3055_v55 }
0x1388   : > { %v3086_v6 = vor.u32 1.1754944e-38, %v3085_v9  ;;  %vm3084_vm5 = vcmp.eq.f32.partialorder %v3083_v10, 8.507059e+37  ;;  %v3202_v9 = vld [vmem:[%s5056_s25 + $0x10] sm:$0xff]  ;;  %v3200_v10 = vld [vmem:[%s5056_s25] sm:$0xff] }
0x1389   : > { %v3071_v63 = vor.u32 1.1754944e-38, %v3070_v1  ;;  %vm3069_vm0 = vcmp.eq.f32.partialorder %v3068_v5, 8.507059e+37  ;;  %v3205_v5 = vld [vmem:[%s5056_s25 + $0x28] sm:$0xff] }
0x138c   : > { %v3851_v56 = vpop.eup %3850 }
0x138d   : > { %v3853_v59 = vpop.eup %3852  ;;  %v3075_v17 = vmul.f32 %v3851_v56, %v3058_v53  ;;  %vm3080_vm15 = vweird.f32 %v3851_v56  ;;  %v3206_v53 = vld [vmem:[%s5056_s25 + $0x30] sm:$0xff] }
0x138e   : > { %v3060_v62 = vmul.f32 %v3853_v59, %v3055_v55  ;;  %vm3065_vm12 = vweird.f32 %v3853_v59  ;;  %vm3081_vm3 = vmor %vm3079_vm1, %vm3080_vm15  ;;  %v3186_v55 = vld [vmem:[%s5052_s21 + $0x20] sm:$0xff]  ;;  %3323 = vmatpush.msrb.mxu3 %v3206_v53 }
0x138f   : > { %v3076_v18 = vsub.f32 1.0, %v3075_v17  ;;  %vm3066_vm14 = vmor %vm3064_vm13, %vm3065_vm12 }
0x1390   : > { %v3061_v14 = vsub.f32 1.0, %v3060_v62  ;;  %3324 = vmatpush.msrb.mxu3 %v3205_v5 }
0x1391   : > { %v3077_v58 = vmul.f32 %v3851_v56, %v3076_v18 }
0x1392   : > { %v3062_v57 = vmul.f32 %v3853_v59, %v3061_v14 }
0x1393   : > { %v3078_v43 = vadd.f32 %v3851_v56, %v3077_v58 }
0x1394   : > { %v3063_v50 = vadd.f32 %v3853_v59, %v3062_v57  ;;  %v3184_v57 = vld [vmem:[%s5052_s21 + $0x10] sm:$0xff] }
0x1395   : > { %v3082_v11 = vsel %vm3081_vm3, %v3851_v56, %v3078_v43  ;;  %v3185_v56 = vld [vmem:[%s5052_s21 + $0x18] sm:$0xff]  ;;  %v3182_v43 = vld [vmem:[%s5052_s21] sm:$0xff] }
0x1396   : > { %v3067_v8 = vsel %vm3066_vm14, %v3853_v59, %v3063_v50  ;;  %v3087_v12 = vsel %vm3084_vm5, %v3086_v6, %v3082_v11  ;;  %v3721_v59 = vld [vmem:[%s5049_s18] ss:$0 sm:$0xff]  ;;  %v3183_v50 = vld [vmem:[%s5052_s21 + $0x8] sm:$0xff] }
0x1397   : > { %v3072_v49 = vsel %vm3069_vm0, %v3071_v63, %v3067_v8  ;;  %v3088_v15 = vmul.f32 %v3847_v51, %v3087_v12  ;;  %v3189_v51 = vld [vmem:[%s5052_s21 + $0x38] sm:$0xff]  ;;  %v3204_v63 = vld [vmem:[%s5056_s25 + $0x20] sm:$0xff] }
0x1398   : > { %v3073_v3 = vmul.f32 %v3849_v52, %v3072_v49  ;;  %v3188_v52 = vld [vmem:[%s5052_s21 + $0x30] sm:$0xff]  ;;  %3260 = vmatpush.msrb.mxu1 %v3189_v51  ;;  %3325 = vmatpush.msrb.mxu3 %v3204_v63  ;;  %v3203_v8 = vld [vmem:[%s5056_s25 + $0x18] sm:$0xff]  ;;  %v3201_v49 = vld [vmem:[%s5056_s25 + $0x8] sm:$0xff] }
0x139a   : > { %3563 = vmatmul.msk.f32.vlgmr.msra.gmra.mxu2 %vm1296_vm6, %v3073_v3  ;;  %3261 = vmatpush.msrb.mxu1 %v3188_v52  ;;  %v3722_v3 = vld [vmem:[%s5051_s20] ss:$0 sm:$0xff] }
0x139b   : > { %3326 = vmatpush.msrb.mxu3 %v3203_v8 }
0x139c   : > { %3262 = vmatpush.msrb.mxu1 %v3187_v0 }
0x139d   : > { %3327 = vmatpush.msrb.mxu3 %v3202_v9 }
0x139e   : > { %3263 = vmatpush.msrb.mxu1 %v3186_v55 }
0x139f   : > { %3328 = vmatpush.msrb.mxu3 %v3201_v49 }
0x13a0   : > { %3264 = vmatpush.msrb.mxu1 %v3185_v56 }
0x13a1   : > { %3329 = vmatpush.msrb.mxu3 %v3200_v10 }
0x13a2   : > { %3564 = vmatmul.msk.f32.gmra.mxu2 %vm1296_vm6, %v3088_v15  ;;  %3265 = vmatpush.msrb.mxu1 %v3184_v57  ;;  %v3723_v15 = vld [vmem:[%s5136_s7] ss:$0 sm:$0xff]  ;;  %s5140_s7 = sshll.u32 %s4284_s1, 4 }
0x13a3   : > { %s901_s2 = scalar_lea.vmem [#allocation8], %s5140_s7 }
0x13a4   : > { %3266 = vmatpush.msrb.mxu1 %v3183_v50  ;;  %s3356_s5 = sshll.u32 %s901_s2, 4  ;;  %s3357_s5 = int_to_ptr.vmem [resolvable:$true] %s3356_s5 }
0x13a6   : > { %3267 = vmatpush.msrb.mxu1 %v3182_v43 }
0x141d   : > { %v3112_v54 = vpop.f32.mrf.mxu2 }
0x141e   : > { %v3120_v32 = vmin.f32 %v3112_v54, 0.0  ;;  %vm3118_vm6 = vcmp.gt.f32.partialorder %v3112_v54, 0.0 }
0x1420   : > { %v3122_v33 = vmul.f32 1.442695, %v3120_v32 }
0x1422   : > { %3854 = vpow2.f32 %v3122_v33 }
0x1425   : > { %v3115_v34 = vpop.f32.mrf.mxu2 }
0x1426   : > { %v3121_v7 = vmin.f32 %v3115_v34, 0.0  ;;  %vm3119_vm7 = vcmp.gt.f32.partialorder %v3115_v34, 0.0 }
0x1428   : > { %v3855_v35 = vpop.eup %3854  ;;  %v3124_v36 = vmul.f32 1.442695, %v3121_v7 }
0x1429   : > { %v3565_v38 = vadd.f32 -1.0, %v3855_v35 }
0x142a   : > { %3856 = vpow2.f32 %v3124_v36 }
0x142b   : > { %v3128_v39 = vsel %vm3118_vm6, %v3112_v54, %v3565_v38 }
0x142c   : > { %3567 = vmatmul.msk.f32.vlgmr.msra.gmra.mxu3 %vm1207_vm4, %v3128_v39 }
0x1430   : > { %v3857_v40 = vpop.eup %3856 }
0x1431   : > { %v3566_v41 = vadd.f32 -1.0, %v3857_v40 }
0x1433   : > { %v3129_v46 = vsel %vm3119_vm7, %v3115_v34, %v3566_v41 }
0x1434   : > { %3568 = vmatmul.msk.f32.gmra.mxu3 %vm1207_vm4, %v3129_v46 }
0x14af   : > { %v3165_v17 = vpop.f32.mrf.mxu3 }
0x14b0   : > { %v3166_v62 = vadd.f32 %v3721_v59, %v3165_v17 }
0x14b2   : > { %v3171_v18 = vmax.f32 %v3166_v62, 0.0 }
0x14b4   : > { %3569 = vmatmul.msk.f32.vlgmr.msrb.gmra.mxu0 %vm1207_vm4, %v3171_v18  ;;  %3573 = vmatmul.msk.f32.vlgmr.msrb.gmra.mxu2 %vm1207_vm4, %v3171_v18 }
0x14b7   : > { %v3168_v14 = vpop.f32.mrf.mxu3 }
0x14b8   : > { %v3169_v1 = vadd.f32 %v3721_v59, %v3168_v14 }
0x14ba   : > { %v3172_v58 = vmax.f32 %v3169_v1, 0.0 }
0x14bc   : > { %3570 = vmatmul.msk.f32.gmra.mxu0 %vm1207_vm4, %v3172_v58  ;;  %3574 = vmatmul.msk.f32.gmra.mxu2 %vm1207_vm4, %v3172_v58 }
0x1531   : > { %v3235_v11 = vpop.f32.mrf.mxu0 }
0x1532   : > { %v3236_v6 = vadd.f32 %v3722_v3, %v3235_v11 }
0x1534   : > { %v3241_v12 = vmax.f32 %v3236_v6, 0.0 }
0x1536   : > { %3571 = vmatmul.msk.f32.vlgmr.msrb.gmra.mxu1 %vm1207_vm4, %v3241_v12 }
0x1537   : > { %v3297_v28 = vpop.f32.mrf.mxu2 }
0x1538   : > { %v3298_v16 = vadd.f32 %v3723_v15, %v3297_v28 }
0x1539   : > { %v3238_v19 = vpop.f32.mrf.mxu0 }
0x153a   : > { %v3303_v44 = vmax.f32 %v3298_v16, 0.0  ;;  %v3239_v13 = vadd.f32 %v3722_v3, %v3238_v19 }
0x153c   : > { %v3242_v20 = vmax.f32 %v3239_v13, 0.0  ;;  %3575 = vmatmul.msk.f32.vlgmr.msrb.gmra.mxu3 %vm1207_vm4, %v3303_v44 }
0x153e   : > { %3572 = vmatmul.msk.f32.gmra.mxu1 %vm1207_vm4, %v3242_v20 }
0x153f   : > { %v3300_v60 = vpop.f32.mrf.mxu2 }
0x1540   : > { %v3301_v21 = vadd.f32 %v3723_v15, %v3300_v60 }
0x1542   : > { %v3304_v22 = vmax.f32 %v3301_v21, 0.0 }
0x1544   : > { %3576 = vmatmul.msk.f32.gmra.mxu3 %vm1207_vm4, %v3304_v22 }
0x15b3   : > { %v3269_v23 = vpop.f32.mrf.mxu1 }
0x15b4   : > { %v3270_v4 = vadd.f32 %v3724_v24, %v3269_v23 }
0x15b6   : > { %v3275_v26 = vmax.f32 %v3270_v4, 0.0 }
0x15bb   : > { %v3272_v29 = vpop.f32.mrf.mxu1 }
0x15bc   : > { %v3273_v32 = vadd.f32 %v3724_v24, %v3272_v29 }
0x15be   : > { %v3276_v7 = vmax.f32 %v3273_v32, 0.0 }
0x15bf   : > { %v3331_v25 = vpop.f32.mrf.mxu3 }
0x15c0   : > { %v3332_v2 = vadd.f32 %v3725_v42, %v3331_v25 }
0x15c2   : > { %v3337_v27 = vmax.f32 %v3332_v2, 0.0 }
0x15c4   : > { %v3339_v54 = vmul.f32 %v3337_v27, %v3275_v26 }
0x15c6   : > { %3341 = vst.msk [vmem:[%s901_s2] sm:$0xff] %vm959_vm2, %v3339_v54 }
0x15c7   : > { %v3334_v33 = vpop.f32.mrf.mxu3 }
0x15c8   : > { %v3335_v34 = vadd.f32 %v3725_v42, %v3334_v33 }
0x15ca   : > { %v3338_v35 = vmax.f32 %v3335_v34, 0.0 }
0x15cc   : > { %v3340_v36 = vmul.f32 %v3338_v35, %v3276_v7 }
0x15ce   : > { %3342 = vst.msk [vmem:[%s901_s2 + $0x8] sm:$0xff] %vm959_vm2, %v3340_v36 }
0x15cf   : > { %3977 = shalt.err (!%p3974_p11)
}
0x15d0   : > { %s4038_s1 = smov 128   ;;  %s4039_s7 = smov 8  }
0x15d1   : > { %3596 = dma.vmem_to_hbm [thread:$0]  (%p4251_p0), %s3357_s5, 256, %s3359_s29, %s3344_s9, %s4038_s1, %s4038_s1, %s4039_s7  }
0x15d2 PF: > { %s5141_s2 = sld [smem:[#allocation12_spill]]  ;;  %p3618_p12 = scmp.ge.s32.totalorder %s4020_s30, 2 }
0x15d4   : > { %p3610_p13 = pnand %p3618_p12, %p4215_p6 }
0x15d6   : > { %p3611_p3 = pneg %p3610_p13 }
0x15d8   : > { %s3373_s22 = sand.u32 1, %s5141_s2  }
0x15d9   : > { %s3374_s3 = scalar_lea.sflag [#allocation4], %s3373_s22 }
0x15da   : > { %4003 = dma.done.wait (%p3611_p3), %s3374_s3, 256  }
0x15db   : > { %4005 = vsyncadd (%p3611_p3), %s3374_s3, 4294967040  ;;  %s5143_s30 = sld [smem:[#allocation15_spill]]  ;;  %s5146_s7 = smov %s4012_s4 }
0x15dc   : > { %s5144_s10 = sld [smem:[#allocation13_spill]] }
0x15dd   : > { %s5145_s8 = sld [smem:[#allocation16_spill]] }
0x15e1   : > { %p41_p5 = scmp.ge.s32.totalorder %s5143_s30, 5  }
0x15e2   : > { %s5147_s4 = smov %s5144_s10 }
0x15e3   :  { %43 = sbr.rel (!%p41_p5) target bundleno = 24 (0x18), region = 187 }
0x15e8   :  { %3380 = vsyncpa [#allocation3], 1 }
0x15e9   :  { %3382 = vsyncpa [#allocation3 + $0x1], 1 }
0x15ea   :  { %3383 = vsyncpa [#allocation6], 1 }
0x15eb   :  { %3384 = vsyncpa [#allocation4], 1 }
0x15ec   :  { %3386 = vsyncpa [#allocation4 + $0x1], 1 }

</bundles_post_ra>
